<compile_context>
chip_gen: v5e
topology: v5e:2x2
jax: 0.10.0
libtpu: 0.0.40
codegen_flags: <defaults>
</compile_context>

<pallas_src>
import math
import functools

import jax
import jax.numpy as jnp
from jax import lax
from jax.experimental import pallas as pl
from jax.experimental.pallas import tpu as pltpu

LANE = 128
SUBLANE = 8


def _round_up(n, m):
    return ((n + m - 1) // m) * m


def _pick_time_chunk(T):
    """Largest even chunk <= 32 that divides T, else T itself (no remainder)."""
    if T <= 32:
        return T
    for tt in range(32, 1, -1):
        if T % tt == 0 and tt % 2 == 0:
            return tt
    return T


# ---------------------------------------------------------------------------
# Fused kernel: all layers + time recurrence + output projection, one call.
# ---------------------------------------------------------------------------
def _stock_lstm_kernel(L, H, TT, Bp, unroll, *refs):
    """refs layout:
         inputs : x(TT*Bp,Dp), wih_0..L-1, whh_0..L-1, b_0..L-1,
                  h0(L,Bp,H), c0(L,Bp,H), w_last(H,Vp), b_last(1,Vp)
         outputs: logits(TT*Bp,Vp), h_n(L,Bp,H), c_n(L,Bp,H)
         scratch: h_sc(L,Bp,H), c_sc(L,Bp,H), seq_sc(TT*Bp,H), xin_sc(TT*Bp,G4p)
    """
    bf16 = jnp.bfloat16
    x_ref = refs[0]
    wih_refs = refs[1:1 + L]
    whh_refs = refs[1 + L:1 + 2 * L]
    b_refs = refs[1 + 2 * L:1 + 3 * L]
    h0_ref, c0_ref, wlast_ref, blast_ref = refs[1 + 3 * L:5 + 3 * L]
    out_ref, hn_ref, cn_ref = refs[5 + 3 * L:8 + 3 * L]
    h_sc, c_sc, seq_sc, xin_sc = refs[8 + 3 * L:12 + 3 * L]

    ci = pl.program_id(0)

    @pl.when(ci == 0)
    def _():
        h_sc[...] = h0_ref[...]
        c_sc[...] = c0_ref[...]

    def sigmoid(v):
        # tanh form: single EUP push per element (cheaper than exp + divide).
        return 0.5 * (jnp.tanh(0.5 * v) + 1.0)

    for l in range(L):
        # ---- 1) Input-side contribution for all TT steps: one batched GEMM,
        #         bias folded in (hoisted out of the time loop).
        if l == 0:
            src = x_ref[...]                                    # (TT*Bp, Dp) bf16
        else:
            src = seq_sc[...].astype(bf16)                      # (TT*Bp, H)
        xin_sc[...] = (
            jnp.dot(src, wih_refs[l][...], preferred_element_type=jnp.float32)
            + b_refs[l][...])

        # Tiny (H, G4p) recurrent weight: load once per layer (loop-invariant).
        w_hh = whh_refs[l][...]

        # ---- 2) Sequential recurrence: only h @ W_hh on the critical path.
        def step(t, carry, l=l, w_hh=w_hh):
            row = pl.multiple_of(t * Bp, Bp)
            h = h_sc[l]                                         # (Bp, H) f32
            c = c_sc[l]
            gates = xin_sc[pl.ds(row, Bp), :] + jnp.dot(
                h.astype(bf16), w_hh, preferred_element_type=jnp.float32)
            # PyTorch gate order i, f, g, o; each gate H wide (compacted).
            i_g = sigmoid(gates[:, 0 * H:1 * H])
            f_g = sigmoid(gates[:, 1 * H:2 * H])
            g_g = jnp.tanh(gates[:, 2 * H:3 * H])
            o_g = sigmoid(gates[:, 3 * H:4 * H])
            c_new = f_g * c + i_g * g_g
            h_new = o_g * jnp.tanh(c_new)
            h_sc[l] = h_new
            c_sc[l] = c_new
            # Overwrite this layer's input slot in place (already consumed by
            # the GEMM above); becomes the next layer's input sequence.
            seq_sc[pl.ds(row, Bp), :] = h_new
            return carry

        lax.fori_loop(0, TT, step, 0, unroll=unroll)

    # ---- 3) Fused output projection for this chunk: one GEMM, lane-dense store.
    out_ref[...] = (
        jnp.dot(seq_sc[...].astype(bf16), wlast_ref[...],
                preferred_element_type=jnp.float32)
        + blast_ref[...]).astype(out_ref.dtype)

    # Final states live in resident output blocks (constant index map); the last
    # chunk's write is the one that reaches HBM.
    hn_ref[...] = h_sc[...].astype(hn_ref.dtype)
    cn_ref[...] = c_sc[...].astype(cn_ref.dtype)


# ---------------------------------------------------------------------------
# Wrapper: packing / padding in plain JAX, then one pallas_call.
# ---------------------------------------------------------------------------
def stock_lstm_forward(params, input_x, st):
    """input_x: (B, T, x + R*W) batch-first; st = (h0, c0), each (L, B, H).
    Returns (last(o) -> (B, T, v_t), (h_n, c_n))."""
    h0_all, c0_all = st
    B, T, D_in = input_x.shape
    L, _, H = h0_all.shape
    V = params["last_b"].shape[0]
    f32, bf16 = jnp.float32, jnp.bfloat16

    Bp = _round_up(B, SUBLANE)
    Dp = _round_up(D_in, 16)           # small pad for bf16 packing, NOT to 128
    G4p = _round_up(4 * H, LANE)       # compacted gate width
    Vp = _round_up(V, LANE)            # lane-dense output store

    TT = _pick_time_chunk(T)
    n_chunks = T // TT
    unroll = True if TT <= 16 else 4   # partial unroll for long chunks

    # Time-major, batch-padded, flattened to (T*Bp, Dp); bf16 MXU operand.
    x_tm = jnp.transpose(input_x, (1, 0, 2)).astype(f32)
    x_p = (jnp.zeros((T, Bp, Dp), f32).at[:, :B, :D_in].set(x_tm)
           .astype(bf16).reshape(T * Bp, Dp))

    # Padded initial states (padded batch rows are zero and independent).
    h0_p = jnp.zeros((L, Bp, H), f32).at[:, :B, :].set(h0_all.astype(f32))
    c0_p = jnp.zeros((L, Bp, H), f32).at[:, :B, :].set(c0_all.astype(f32))

    # Per-layer weights: gates packed contiguously into the first 4H columns.
    wih_list, whh_list, b_list = [], [], []
    for l, p in enumerate(params["lstm"]):
        w_ih_t = p["w_ih_t"].astype(f32)            # (d_in, 4H)
        w_hh_t = p["w_hh_t"].astype(f32)            # (H, 4H)
        d_in = w_ih_t.shape[0]
        d_in_pad = Dp if l == 0 else d_in
        wih_list.append(jnp.zeros((d_in_pad, G4p), f32)
                        .at[:d_in, :4 * H].set(w_ih_t).astype(bf16))
        whh_list.append(jnp.zeros((H, G4p), f32)
                        .at[:, :4 * H].set(w_hh_t).astype(bf16))
        b_list.append(jnp.zeros((1, G4p), f32).at[0, :4 * H].set(p["b"].astype(f32)))

    w_last_p = (jnp.zeros((H, Vp), f32).at[:, :V]
                .set(params["last_w_t"].astype(f32)).astype(bf16))
    b_last_p = jnp.zeros((1, Vp), f32).at[0, :V].set(params["last_b"].astype(f32))

    in_arrays = [x_p, *wih_list, *whh_list, *b_list, h0_p, c0_p, w_last_p, b_last_p]

    def full_spec(shape):
        nd = len(shape)
        return pl.BlockSpec(shape, lambda ci, _nd=nd: (0,) * _nd)

    in_specs = [pl.BlockSpec((TT * Bp, Dp), lambda ci: (ci, 0))]
    in_specs += [full_spec(a.shape) for a in in_arrays[1:]]

    out_shapes = (jax.ShapeDtypeStruct((T * Bp, Vp), f32),
                  jax.ShapeDtypeStruct((L, Bp, H), f32),
                  jax.ShapeDtypeStruct((L, Bp, H), f32))
    out_specs = (pl.BlockSpec((TT * Bp, Vp), lambda ci: (ci, 0)),
                 pl.BlockSpec((L, Bp, H), lambda ci: (0, 0, 0)),
                 pl.BlockSpec((L, Bp, H), lambda ci: (0, 0, 0)))

    scratch = [pltpu.VMEM((L, Bp, H), f32),        # h state (persists over chunks)
               pltpu.VMEM((L, Bp, H), f32),        # c state
               pltpu.VMEM((TT * Bp, H), f32),      # layer input/output sequence
               pltpu.VMEM((TT * Bp, G4p), f32)]    # precomputed gate contribution

    # Explicit VMEM budget (double-buffered blocks + scratch) with headroom.
    def nbytes(shape, dt):
        return math.prod(shape) * jnp.dtype(dt).itemsize
    block_bytes = (nbytes((TT * Bp, Dp), bf16) + nbytes((TT * Bp, Vp), f32)
                   + 2 * nbytes((L, Bp, H), f32)
                   + sum(nbytes(a.shape, a.dtype) for a in in_arrays[1:]))
    scratch_bytes = (2 * nbytes((L, Bp, H), f32) + nbytes((TT * Bp, H), f32)
                     + nbytes((TT * Bp, G4p), f32))
    vmem_limit = int(min(max(2 * block_bytes + scratch_bytes + (4 << 20), 16 << 20),
                         96 << 20))

    kernel = functools.partial(_stock_lstm_kernel, L, H, TT, Bp, unroll)

    logits_p, hn_p, cn_p = pl.pallas_call(
        kernel,
        out_shape=out_shapes,
        grid=(n_chunks,),
        in_specs=in_specs,
        out_specs=out_specs,
        scratch_shapes=scratch,
        compiler_params=pltpu.CompilerParams(
            dimension_semantics=("arbitrary",),   # time chunks carry h/c state
            vmem_limit_bytes=vmem_limit),
    )(*in_arrays)

    logits = jnp.transpose(logits_p.reshape(T, Bp, Vp)[:, :B, :V], (1, 0, 2))
    return logits, (hn_p[:, :B, :], cn_p[:, :B, :])


# ---------------------------------------------------------------------------
# Pure-JAX reference for sanity checking.
# ---------------------------------------------------------------------------
def stock_lstm_ref(params, input_x, st):
    h0_all, c0_all = st
    cur = jnp.transpose(input_x, (1, 0, 2))
    hns, cns = [], []
    for l, p in enumerate(params["lstm"]):
        H = h0_all.shape[-1]

        def step(carry, x_t, p=p, H=H):
            h, c = carry
            gates = x_t @ p["w_ih_t"] + h @ p["w_hh_t"] + p["b"]
            i = jax.nn.sigmoid(gates[:, :H])
            f = jax.nn.sigmoid(gates[:, H:2 * H])
            g = jnp.tanh(gates[:, 2 * H:3 * H])
            o = jax.nn.sigmoid(gates[:, 3 * H:])
            c = f * c + i * g
            h = o * jnp.tanh(c)
            return (h, c), h

        (hn, cn), y = lax.scan(step, (h0_all[l], c0_all[l]), cur)
        cur = y
        hns.append(hn)
        cns.append(cn)
    o = cur @ params["last_w_t"] + params["last_b"]
    return jnp.transpose(o, (1, 0, 2)), (jnp.stack(hns), jnp.stack(cns))


# ---------------------------------------------------------------------------
if __name__ == "__main__":
    # Stock_LSTM(x=4, R=2, W=4, h=32, L=2, v_t=16); LSTM input size = 12.
    X, R, W, H, L, V_T = 4, 2, 4, 32, 2, 16
    B, T = 2, 8
    D_IN0 = X + R * W

    key = jax.random.PRNGKey(0)
    keys = jax.random.split(key, 4 * L + 4)
    ki = 0
    k_init = 1.0 / math.sqrt(H)

    params = {"lstm": []}
    for l in range(L):
        d_in = D_IN0 if l == 0 else H
        w_ih = jax.random.uniform(keys[ki], (4 * H, d_in), jnp.float32, -k_init, k_init); ki += 1
        w_hh = jax.random.uniform(keys[ki], (4 * H, H), jnp.float32, -k_init, k_init);    ki += 1
        b_ih = jax.random.uniform(keys[ki], (4 * H,), jnp.float32, -k_init, k_init);      ki += 1
        b_hh = jax.random.uniform(keys[ki], (4 * H,), jnp.float32, -k_init, k_init);      ki += 1
        params["lstm"].append({"w_ih_t": w_ih.T, "w_hh_t": w_hh.T, "b": b_ih + b_hh})

    last_w = jax.random.uniform(keys[ki], (V_T, H), jnp.float32, -k_init, k_init); ki += 1
    last_b = jax.random.uniform(keys[ki], (V_T,), jnp.float32, -k_init, k_init);   ki += 1
    params["last_w_t"] = last_w.T
    params["last_b"] = last_b

    input_x = jax.random.normal(keys[ki], (B, T, D_IN0), jnp.float32); ki += 1
    h0 = jax.random.normal(keys[ki], (L, B, H), jnp.float32) * 0.1;    ki += 1
    c0 = jnp.zeros((L, B, H), jnp.float32)

    out, (h_n, c_n) = stock_lstm_forward(params, input_x, (h0, c0))
    jax.block_until_ready((out, h_n, c_n))

    ref_out, (ref_h, ref_c) = stock_lstm_ref(params, input_x, (h0, c0))
    assert out.shape == (B, T, V_T)
    assert h_n.shape == (L, B, H) and c_n.shape == (L, B, H)
    assert jnp.allclose(out, ref_out, atol=2e-2, rtol=2e-2)
    assert jnp.allclose(h_n, ref_h, atol=2e-2, rtol=2e-2)
    assert jnp.allclose(c_n, ref_c, atol=2e-2, rtol=2e-2)

    print("KERNEL_OK")
</pallas_src>

<mosaic_0001>
module attributes {stable_mosaic.version = 11 : i64} {
  func.func @_stock_lstm_kernel(%arg0: i32, %arg1: memref<64x16xbf16, #tpu.memory_space<vmem>>, %arg2: memref<16x128xbf16, #tpu.memory_space<vmem>>, %arg3: memref<32x128xbf16, #tpu.memory_space<vmem>>, %arg4: memref<32x128xbf16, #tpu.memory_space<vmem>>, %arg5: memref<32x128xbf16, #tpu.memory_space<vmem>>, %arg6: memref<1x128xf32, #tpu.memory_space<vmem>>, %arg7: memref<1x128xf32, #tpu.memory_space<vmem>>, %arg8: memref<2x8x32xf32, #tpu.memory_space<vmem>>, %arg9: memref<2x8x32xf32, #tpu.memory_space<vmem>>, %arg10: memref<32x128xbf16, #tpu.memory_space<vmem>>, %arg11: memref<1x128xf32, #tpu.memory_space<vmem>>, %arg12: memref<64x128xf32, #tpu.memory_space<vmem>>, %arg13: memref<2x8x32xf32, #tpu.memory_space<vmem>>, %arg14: memref<2x8x32xf32, #tpu.memory_space<vmem>>, %arg15: memref<2x8x32xf32, #tpu.memory_space<vmem>>, %arg16: memref<2x8x32xf32, #tpu.memory_space<vmem>>, %arg17: memref<64x32xf32, #tpu.memory_space<vmem>>, %arg18: memref<64x128xf32, #tpu.memory_space<vmem>>) attributes {dimension_semantics = [#tpu.dimension_semantics<arbitrary>], iteration_bounds = array<i64: 1>, scalar_prefetch = 0 : i64, scratch_operands = 4 : i64, tpu.core_type = #tpu.core_type<tc>, window_params = [{transform_indices = @transform_0, window_bounds = array<i64: 64, 16>}, {pipeline_mode = #tpu.pipeline_mode<synchronous>, transform_indices = @transform_1, window_bounds = array<i64: 16, 128>}, {pipeline_mode = #tpu.pipeline_mode<synchronous>, transform_indices = @transform_2, window_bounds = array<i64: 32, 128>}, {pipeline_mode = #tpu.pipeline_mode<synchronous>, transform_indices = @transform_3, window_bounds = array<i64: 32, 128>}, {pipeline_mode = #tpu.pipeline_mode<synchronous>, transform_indices = @transform_4, window_bounds = array<i64: 32, 128>}, {pipeline_mode = #tpu.pipeline_mode<synchronous>, transform_indices = @transform_5, window_bounds = array<i64: 1, 128>}, {pipeline_mode = #tpu.pipeline_mode<synchronous>, transform_indices = @transform_6, window_bounds = array<i64: 1, 128>}, {pipeline_mode = #tpu.pipeline_mode<synchronous>, transform_indices = @transform_7, window_bounds = array<i64: 2, 8, 32>}, {pipeline_mode = #tpu.pipeline_mode<synchronous>, transform_indices = @transform_8, window_bounds = array<i64: 2, 8, 32>}, {pipeline_mode = #tpu.pipeline_mode<synchronous>, transform_indices = @transform_9, window_bounds = array<i64: 32, 128>}, {pipeline_mode = #tpu.pipeline_mode<synchronous>, transform_indices = @transform_10, window_bounds = array<i64: 1, 128>}, {transform_indices = @transform_11, window_bounds = array<i64: 64, 128>}, {pipeline_mode = #tpu.pipeline_mode<synchronous>, transform_indices = @transform_12, window_bounds = array<i64: 2, 8, 32>}, {pipeline_mode = #tpu.pipeline_mode<synchronous>, transform_indices = @transform_13, window_bounds = array<i64: 2, 8, 32>}]} {
    %c0_i32 = arith.constant 0 : i32
    %0 = arith.cmpi eq, %arg0, %c0_i32 : i32
    %1 = arith.extui %0 : i1 to i32
    %c0_i32_0 = arith.constant 0 : i32
    %2 = arith.cmpi ne, %1, %c0_i32_0 : i32
    scf.if %2 {
      %c0_451 = arith.constant 0 : index
      %c0_452 = arith.constant 0 : index
      %c0_453 = arith.constant 0 : index
      %832 = vector.load %arg8[%c0_451, %c0_452, %c0_453] : memref<2x8x32xf32, #tpu.memory_space<vmem>>, vector<2x8x32xf32>
      %c0_454 = arith.constant 0 : index
      %c0_455 = arith.constant 0 : index
      %c0_456 = arith.constant 0 : index
      %833 = vector.load %arg15[%c0_454, %c0_455, %c0_456] : memref<2x8x32xf32, #tpu.memory_space<vmem>>, vector<2x8x32xf32>
      tpu.vector_store %arg15[%c0_454, %c0_455, %c0_456], %832 {strides = array<i32>} : memref<2x8x32xf32, #tpu.memory_space<vmem>>, vector<2x8x32xf32>,
      %c0_457 = arith.constant 0 : index
      %c0_458 = arith.constant 0 : index
      %c0_459 = arith.constant 0 : index
      %834 = vector.load %arg9[%c0_457, %c0_458, %c0_459] : memref<2x8x32xf32, #tpu.memory_space<vmem>>, vector<2x8x32xf32>
      %c0_460 = arith.constant 0 : index
      %c0_461 = arith.constant 0 : index
      %c0_462 = arith.constant 0 : index
      %835 = vector.load %arg16[%c0_460, %c0_461, %c0_462] : memref<2x8x32xf32, #tpu.memory_space<vmem>>, vector<2x8x32xf32>
      tpu.vector_store %arg16[%c0_460, %c0_461, %c0_462], %834 {strides = array<i32>} : memref<2x8x32xf32, #tpu.memory_space<vmem>>, vector<2x8x32xf32>,
    } else {
    }
    %c0 = arith.constant 0 : index
    %c0_1 = arith.constant 0 : index
    %3 = vector.load %arg1[%c0, %c0_1] : memref<64x16xbf16, #tpu.memory_space<vmem>>, vector<64x16xbf16>
    %c0_2 = arith.constant 0 : index
    %c0_3 = arith.constant 0 : index
    %4 = vector.load %arg2[%c0_2, %c0_3] : memref<16x128xbf16, #tpu.memory_space<vmem>>, vector<16x128xbf16>
    %cst = arith.constant dense<0.000000e+00> : vector<64x128xf32>
    %5 = tpu.matmul %3, %4, %cst {dimension_numbers = #tpu.dot_dimension_numbers<[1], [0], [0], [1], [0, 0, 1, 1], [], []>} : vector<64x16xbf16>, vector<16x128xbf16>, vector<64x128xf32> -> vector<64x128xf32>
    %c0_4 = arith.constant 0 : index
    %c0_5 = arith.constant 0 : index
    %6 = vector.load %arg6[%c0_4, %c0_5] : memref<1x128xf32, #tpu.memory_space<vmem>>, vector<1x128xf32>
    %7 = vector.broadcast %6 : vector<1x128xf32> to vector<64x128xf32>
    %8 = arith.addf %5, %7 : vector<64x128xf32>
    %c0_6 = arith.constant 0 : index
    %c0_7 = arith.constant 0 : index
    %9 = vector.load %arg18[%c0_6, %c0_7] : memref<64x128xf32, #tpu.memory_space<vmem>>, vector<64x128xf32>
    tpu.vector_store %arg18[%c0_6, %c0_7], %8 {strides = array<i32>} : memref<64x128xf32, #tpu.memory_space<vmem>>, vector<64x128xf32>,
    %c0_8 = arith.constant 0 : index
    %c0_9 = arith.constant 0 : index
    %10 = vector.load %arg4[%c0_8, %c0_9] : memref<32x128xbf16, #tpu.memory_space<vmem>>, vector<32x128xbf16>
    %c0_i32_10 = arith.constant 0 : i32
    %c8_i32 = arith.constant 8 : i32
    %11 = arith.muli %c0_i32_10, %c8_i32 : i32
    %12 = tpu.assume_multiple %11, 8 : i32
    %c0_11 = arith.constant 0 : index
    %c0_12 = arith.constant 0 : index
    %c0_13 = arith.constant 0 : index
    %13 = vector.load %arg15[%c0_11, %c0_12, %c0_13] : memref<2x8x32xf32, #tpu.memory_space<vmem>>, vector<1x8x32xf32>
    %14 = vector.shape_cast %13 : vector<1x8x32xf32> to vector<8x32xf32>
    %c0_14 = arith.constant 0 : index
    %c0_15 = arith.constant 0 : index
    %c0_16 = arith.constant 0 : index
    %15 = vector.load %arg16[%c0_14, %c0_15, %c0_16] : memref<2x8x32xf32, #tpu.memory_space<vmem>>, vector<1x8x32xf32>
    %16 = vector.shape_cast %15 : vector<1x8x32xf32> to vector<8x32xf32>
    %17 = arith.index_cast %12 : i32 to index
    %c0_17 = arith.constant 0 : index
    %18 = vector.load %arg18[%17, %c0_17] : memref<64x128xf32, #tpu.memory_space<vmem>>, vector<8x128xf32>
    %19 = arith.truncf %14 : vector<8x32xf32> to vector<8x32xbf16>
    %cst_18 = arith.constant dense<0.000000e+00> : vector<8x128xf32>
    %20 = tpu.matmul %19, %10, %cst_18 {dimension_numbers = #tpu.dot_dimension_numbers<[1], [0], [0], [1], [0, 0, 1, 1], [], []>} : vector<8x32xbf16>, vector<32x128xbf16>, vector<8x128xf32> -> vector<8x128xf32>
    %21 = arith.addf %18, %20 : vector<8x128xf32>
    %22 = vector.extract_strided_slice %21 {offsets = [0, 0], sizes = [8, 32], strides = [1, 1]} : vector<8x128xf32> to vector<8x32xf32>
    %cst_19 = arith.constant 5.000000e-01 : f32
    %23 = vector.broadcast %cst_19 : f32 to vector<8x32xf32>
    %24 = arith.mulf %23, %22 : vector<8x32xf32>
    %25 = math.tanh %24 : vector<8x32xf32>
    %cst_20 = arith.constant 1.000000e+00 : f32
    %26 = vector.broadcast %cst_20 : f32 to vector<8x32xf32>
    %27 = arith.addf %25, %26 : vector<8x32xf32>
    %cst_21 = arith.constant 5.000000e-01 : f32
    %28 = vector.broadcast %cst_21 : f32 to vector<8x32xf32>
    %29 = arith.mulf %28, %27 : vector<8x32xf32>
    %30 = vector.extract_strided_slice %21 {offsets = [0, 32], sizes = [8, 32], strides = [1, 1]} : vector<8x128xf32> to vector<8x32xf32>
    %cst_22 = arith.constant 5.000000e-01 : f32
    %31 = vector.broadcast %cst_22 : f32 to vector<8x32xf32>
    %32 = arith.mulf %31, %30 : vector<8x32xf32>
    %33 = math.tanh %32 : vector<8x32xf32>
    %cst_23 = arith.constant 1.000000e+00 : f32
    %34 = vector.broadcast %cst_23 : f32 to vector<8x32xf32>
    %35 = arith.addf %33, %34 : vector<8x32xf32>
    %cst_24 = arith.constant 5.000000e-01 : f32
    %36 = vector.broadcast %cst_24 : f32 to vector<8x32xf32>
    %37 = arith.mulf %36, %35 : vector<8x32xf32>
    %38 = vector.extract_strided_slice %21 {offsets = [0, 64], sizes = [8, 32], strides = [1, 1]} : vector<8x128xf32> to vector<8x32xf32>
    %39 = math.tanh %38 : vector<8x32xf32>
    %40 = vector.extract_strided_slice %21 {offsets = [0, 96], sizes = [8, 32], strides = [1, 1]} : vector<8x128xf32> to vector<8x32xf32>
    %cst_25 = arith.constant 5.000000e-01 : f32
    %41 = vector.broadcast %cst_25 : f32 to vector<8x32xf32>
    %42 = arith.mulf %41, %40 : vector<8x32xf32>
    %43 = math.tanh %42 : vector<8x32xf32>
    %cst_26 = arith.constant 1.000000e+00 : f32
    %44 = vector.broadcast %cst_26 : f32 to vector<8x32xf32>
    %45 = arith.addf %43, %44 : vector<8x32xf32>
    %cst_27 = arith.constant 5.000000e-01 : f32
    %46 = vector.broadcast %cst_27 : f32 to vector<8x32xf32>
    %47 = arith.mulf %46, %45 : vector<8x32xf32>
    %48 = arith.mulf %37, %16 : vector<8x32xf32>
    %49 = arith.mulf %29, %39 : vector<8x32xf32>
    %50 = arith.addf %48, %49 : vector<8x32xf32>
    %51 = math.tanh %50 : vector<8x32xf32>
    %52 = arith.mulf %47, %51 : vector<8x32xf32>
    %c0_28 = arith.constant 0 : index
    %c0_29 = arith.constant 0 : index
    %c0_30 = arith.constant 0 : index
    %53 = vector.load %arg15[%c0_28, %c0_29, %c0_30] : memref<2x8x32xf32, #tpu.memory_space<vmem>>, vector<1x8x32xf32>
    %54 = vector.shape_cast %53 : vector<1x8x32xf32> to vector<8x32xf32>
    %55 = vector.shape_cast %52 : vector<8x32xf32> to vector<1x8x32xf32>
    tpu.vector_store %arg15[%c0_28, %c0_29, %c0_30], %55 {strides = array<i32>} : memref<2x8x32xf32, #tpu.memory_space<vmem>>, vector<1x8x32xf32>,
    %c0_31 = arith.constant 0 : index
    %c0_32 = arith.constant 0 : index
    %c0_33 = arith.constant 0 : index
    %56 = vector.load %arg16[%c0_31, %c0_32, %c0_33] : memref<2x8x32xf32, #tpu.memory_space<vmem>>, vector<1x8x32xf32>
    %57 = vector.shape_cast %56 : vector<1x8x32xf32> to vector<8x32xf32>
    %58 = vector.shape_cast %50 : vector<8x32xf32> to vector<1x8x32xf32>
    tpu.vector_store %arg16[%c0_31, %c0_32, %c0_33], %58 {strides = array<i32>} : memref<2x8x32xf32, #tpu.memory_space<vmem>>, vector<1x8x32xf32>,
    %59 = arith.index_cast %12 : i32 to index
    %c0_34 = arith.constant 0 : index
    %60 = vector.load %arg17[%59, %c0_34] : memref<64x32xf32, #tpu.memory_space<vmem>>, vector<8x32xf32>
    tpu.vector_store %arg17[%59, %c0_34], %52 {strides = array<i32>} : memref<64x32xf32, #tpu.memory_space<vmem>>, vector<8x32xf32>,
    %c1_i32 = arith.constant 1 : i32
    %c8_i32_35 = arith.constant 8 : i32
    %61 = arith.muli %c1_i32, %c8_i32_35 : i32
    %62 = tpu.assume_multiple %61, 8 : i32
    %c0_36 = arith.constant 0 : index
    %c0_37 = arith.constant 0 : index
    %c0_38 = arith.constant 0 : index
    %63 = vector.load %arg15[%c0_36, %c0_37, %c0_38] : memref<2x8x32xf32, #tpu.memory_space<vmem>>, vector<1x8x32xf32>
    %64 = vector.shape_cast %63 : vector<1x8x32xf32> to vector<8x32xf32>
    %c0_39 = arith.constant 0 : index
    %c0_40 = arith.constant 0 : index
    %c0_41 = arith.constant 0 : index
    %65 = vector.load %arg16[%c0_39, %c0_40, %c0_41] : memref<2x8x32xf32, #tpu.memory_space<vmem>>, vector<1x8x32xf32>
    %66 = vector.shape_cast %65 : vector<1x8x32xf32> to vector<8x32xf32>
    %67 = arith.index_cast %62 : i32 to index
    %c0_42 = arith.constant 0 : index
    %68 = vector.load %arg18[%67, %c0_42] : memref<64x128xf32, #tpu.memory_space<vmem>>, vector<8x128xf32>
    %69 = arith.truncf %64 : vector<8x32xf32> to vector<8x32xbf16>
    %cst_43 = arith.constant dense<0.000000e+00> : vector<8x128xf32>
    %70 = tpu.matmul %69, %10, %cst_43 {dimension_numbers = #tpu.dot_dimension_numbers<[1], [0], [0], [1], [0, 0, 1, 1], [], []>} : vector<8x32xbf16>, vector<32x128xbf16>, vector<8x128xf32> -> vector<8x128xf32>
    %71 = arith.addf %68, %70 : vector<8x128xf32>
    %72 = vector.extract_strided_slice %71 {offsets = [0, 0], sizes = [8, 32], strides = [1, 1]} : vector<8x128xf32> to vector<8x32xf32>
    %cst_44 = arith.constant 5.000000e-01 : f32
    %73 = vector.broadcast %cst_44 : f32 to vector<8x32xf32>
    %74 = arith.mulf %73, %72 : vector<8x32xf32>
    %75 = math.tanh %74 : vector<8x32xf32>
    %cst_45 = arith.constant 1.000000e+00 : f32
    %76 = vector.broadcast %cst_45 : f32 to vector<8x32xf32>
    %77 = arith.addf %75, %76 : vector<8x32xf32>
    %cst_46 = arith.constant 5.000000e-01 : f32
    %78 = vector.broadcast %cst_46 : f32 to vector<8x32xf32>
    %79 = arith.mulf %78, %77 : vector<8x32xf32>
    %80 = vector.extract_strided_slice %71 {offsets = [0, 32], sizes = [8, 32], strides = [1, 1]} : vector<8x128xf32> to vector<8x32xf32>
    %cst_47 = arith.constant 5.000000e-01 : f32
    %81 = vector.broadcast %cst_47 : f32 to vector<8x32xf32>
    %82 = arith.mulf %81, %80 : vector<8x32xf32>
    %83 = math.tanh %82 : vector<8x32xf32>
    %cst_48 = arith.constant 1.000000e+00 : f32
    %84 = vector.broadcast %cst_48 : f32 to vector<8x32xf32>
    %85 = arith.addf %83, %84 : vector<8x32xf32>
    %cst_49 = arith.constant 5.000000e-01 : f32
    %86 = vector.broadcast %cst_49 : f32 to vector<8x32xf32>
    %87 = arith.mulf %86, %85 : vector<8x32xf32>
    %88 = vector.extract_strided_slice %71 {offsets = [0, 64], sizes = [8, 32], strides = [1, 1]} : vector<8x128xf32> to vector<8x32xf32>
    %89 = math.tanh %88 : vector<8x32xf32>
    %90 = vector.extract_strided_slice %71 {offsets = [0, 96], sizes = [8, 32], strides = [1, 1]} : vector<8x128xf32> to vector<8x32xf32>
    %cst_50 = arith.constant 5.000000e-01 : f32
    %91 = vector.broadcast %cst_50 : f32 to vector<8x32xf32>
    %92 = arith.mulf %91, %90 : vector<8x32xf32>
    %93 = math.tanh %92 : vector<8x32xf32>
    %cst_51 = arith.constant 1.000000e+00 : f32
    %94 = vector.broadcast %cst_51 : f32 to vector<8x32xf32>
    %95 = arith.addf %93, %94 : vector<8x32xf32>
    %cst_52 = arith.constant 5.000000e-01 : f32
    %96 = vector.broadcast %cst_52 : f32 to vector<8x32xf32>
    %97 = arith.mulf %96, %95 : vector<8x32xf32>
    %98 = arith.mulf %87, %66 : vector<8x32xf32>
    %99 = arith.mulf %79, %89 : vector<8x32xf32>
    %100 = arith.addf %98, %99 : vector<8x32xf32>
    %101 = math.tanh %100 : vector<8x32xf32>
    %102 = arith.mulf %97, %101 : vector<8x32xf32>
    %c0_53 = arith.constant 0 : index
    %c0_54 = arith.constant 0 : index
    %c0_55 = arith.constant 0 : index
    %103 = vector.load %arg15[%c0_53, %c0_54, %c0_55] : memref<2x8x32xf32, #tpu.memory_space<vmem>>, vector<1x8x32xf32>
    %104 = vector.shape_cast %103 : vector<1x8x32xf32> to vector<8x32xf32>
    %105 = vector.shape_cast %102 : vector<8x32xf32> to vector<1x8x32xf32>
    tpu.vector_store %arg15[%c0_53, %c0_54, %c0_55], %105 {strides = array<i32>} : memref<2x8x32xf32, #tpu.memory_space<vmem>>, vector<1x8x32xf32>,
    %c0_56 = arith.constant 0 : index
    %c0_57 = arith.constant 0 : index
    %c0_58 = arith.constant 0 : index
    %106 = vector.load %arg16[%c0_56, %c0_57, %c0_58] : memref<2x8x32xf32, #tpu.memory_space<vmem>>, vector<1x8x32xf32>
    %107 = vector.shape_cast %106 : vector<1x8x32xf32> to vector<8x32xf32>
    %108 = vector.shape_cast %100 : vector<8x32xf32> to vector<1x8x32xf32>
    tpu.vector_store %arg16[%c0_56, %c0_57, %c0_58], %108 {strides = array<i32>} : memref<2x8x32xf32, #tpu.memory_space<vmem>>, vector<1x8x32xf32>,
    %109 = arith.index_cast %62 : i32 to index
    %c0_59 = arith.constant 0 : index
    %110 = vector.load %arg17[%109, %c0_59] : memref<64x32xf32, #tpu.memory_space<vmem>>, vector<8x32xf32>
    tpu.vector_store %arg17[%109, %c0_59], %102 {strides = array<i32>} : memref<64x32xf32, #tpu.memory_space<vmem>>, vector<8x32xf32>,
    %c2_i32 = arith.constant 2 : i32
    %c8_i32_60 = arith.constant 8 : i32
    %111 = arith.muli %c2_i32, %c8_i32_60 : i32
    %112 = tpu.assume_multiple %111, 8 : i32
    %c0_61 = arith.constant 0 : index
    %c0_62 = arith.constant 0 : index
    %c0_63 = arith.constant 0 : index
    %113 = vector.load %arg15[%c0_61, %c0_62, %c0_63] : memref<2x8x32xf32, #tpu.memory_space<vmem>>, vector<1x8x32xf32>
    %114 = vector.shape_cast %113 : vector<1x8x32xf32> to vector<8x32xf32>
    %c0_64 = arith.constant 0 : index
    %c0_65 = arith.constant 0 : index
    %c0_66 = arith.constant 0 : index
    %115 = vector.load %arg16[%c0_64, %c0_65, %c0_66] : memref<2x8x32xf32, #tpu.memory_space<vmem>>, vector<1x8x32xf32>
    %116 = vector.shape_cast %115 : vector<1x8x32xf32> to vector<8x32xf32>
    %117 = arith.index_cast %112 : i32 to index
    %c0_67 = arith.constant 0 : index
    %118 = vector.load %arg18[%117, %c0_67] : memref<64x128xf32, #tpu.memory_space<vmem>>, vector<8x128xf32>
    %119 = arith.truncf %114 : vector<8x32xf32> to vector<8x32xbf16>
    %cst_68 = arith.constant dense<0.000000e+00> : vector<8x128xf32>
    %120 = tpu.matmul %119, %10, %cst_68 {dimension_numbers = #tpu.dot_dimension_numbers<[1], [0], [0], [1], [0, 0, 1, 1], [], []>} : vector<8x32xbf16>, vector<32x128xbf16>, vector<8x128xf32> -> vector<8x128xf32>
    %121 = arith.addf %118, %120 : vector<8x128xf32>
    %122 = vector.extract_strided_slice %121 {offsets = [0, 0], sizes = [8, 32], strides = [1, 1]} : vector<8x128xf32> to vector<8x32xf32>
    %cst_69 = arith.constant 5.000000e-01 : f32
    %123 = vector.broadcast %cst_69 : f32 to vector<8x32xf32>
    %124 = arith.mulf %123, %122 : vector<8x32xf32>
    %125 = math.tanh %124 : vector<8x32xf32>
    %cst_70 = arith.constant 1.000000e+00 : f32
    %126 = vector.broadcast %cst_70 : f32 to vector<8x32xf32>
    %127 = arith.addf %125, %126 : vector<8x32xf32>
    %cst_71 = arith.constant 5.000000e-01 : f32
    %128 = vector.broadcast %cst_71 : f32 to vector<8x32xf32>
    %129 = arith.mulf %128, %127 : vector<8x32xf32>
    %130 = vector.extract_strided_slice %121 {offsets = [0, 32], sizes = [8, 32], strides = [1, 1]} : vector<8x128xf32> to vector<8x32xf32>
    %cst_72 = arith.constant 5.000000e-01 : f32
    %131 = vector.broadcast %cst_72 : f32 to vector<8x32xf32>
    %132 = arith.mulf %131, %130 : vector<8x32xf32>
    %133 = math.tanh %132 : vector<8x32xf32>
    %cst_73 = arith.constant 1.000000e+00 : f32
    %134 = vector.broadcast %cst_73 : f32 to vector<8x32xf32>
    %135 = arith.addf %133, %134 : vector<8x32xf32>
    %cst_74 = arith.constant 5.000000e-01 : f32
    %136 = vector.broadcast %cst_74 : f32 to vector<8x32xf32>
    %137 = arith.mulf %136, %135 : vector<8x32xf32>
    %138 = vector.extract_strided_slice %121 {offsets = [0, 64], sizes = [8, 32], strides = [1, 1]} : vector<8x128xf32> to vector<8x32xf32>
    %139 = math.tanh %138 : vector<8x32xf32>
    %140 = vector.extract_strided_slice %121 {offsets = [0, 96], sizes = [8, 32], strides = [1, 1]} : vector<8x128xf32> to vector<8x32xf32>
    %cst_75 = arith.constant 5.000000e-01 : f32
    %141 = vector.broadcast %cst_75 : f32 to vector<8x32xf32>
    %142 = arith.mulf %141, %140 : vector<8x32xf32>
    %143 = math.tanh %142 : vector<8x32xf32>
    %cst_76 = arith.constant 1.000000e+00 : f32
    %144 = vector.broadcast %cst_76 : f32 to vector<8x32xf32>
    %145 = arith.addf %143, %144 : vector<8x32xf32>
    %cst_77 = arith.constant 5.000000e-01 : f32
    %146 = vector.broadcast %cst_77 : f32 to vector<8x32xf32>
    %147 = arith.mulf %146, %145 : vector<8x32xf32>
    %148 = arith.mulf %137, %116 : vector<8x32xf32>
    %149 = arith.mulf %129, %139 : vector<8x32xf32>
    %150 = arith.addf %148, %149 : vector<8x32xf32>
    %151 = math.tanh %150 : vector<8x32xf32>
    %152 = arith.mulf %147, %151 : vector<8x32xf32>
    %c0_78 = arith.constant 0 : index
    %c0_79 = arith.constant 0 : index
    %c0_80 = arith.constant 0 : index
    %153 = vector.load %arg15[%c0_78, %c0_79, %c0_80] : memref<2x8x32xf32, #tpu.memory_space<vmem>>, vector<1x8x32xf32>
    %154 = vector.shape_cast %153 : vector<1x8x32xf32> to vector<8x32xf32>
    %155 = vector.shape_cast %152 : vector<8x32xf32> to vector<1x8x32xf32>
    tpu.vector_store %arg15[%c0_78, %c0_79, %c0_80], %155 {strides = array<i32>} : memref<2x8x32xf32, #tpu.memory_space<vmem>>, vector<1x8x32xf32>,
    %c0_81 = arith.constant 0 : index
    %c0_82 = arith.constant 0 : index
    %c0_83 = arith.constant 0 : index
    %156 = vector.load %arg16[%c0_81, %c0_82, %c0_83] : memref<2x8x32xf32, #tpu.memory_space<vmem>>, vector<1x8x32xf32>
    %157 = vector.shape_cast %156 : vector<1x8x32xf32> to vector<8x32xf32>
    %158 = vector.shape_cast %150 : vector<8x32xf32> to vector<1x8x32xf32>
    tpu.vector_store %arg16[%c0_81, %c0_82, %c0_83], %158 {strides = array<i32>} : memref<2x8x32xf32, #tpu.memory_space<vmem>>, vector<1x8x32xf32>,
    %159 = arith.index_cast %112 : i32 to index
    %c0_84 = arith.constant 0 : index
    %160 = vector.load %arg17[%159, %c0_84] : memref<64x32xf32, #tpu.memory_space<vmem>>, vector<8x32xf32>
    tpu.vector_store %arg17[%159, %c0_84], %152 {strides = array<i32>} : memref<64x32xf32, #tpu.memory_space<vmem>>, vector<8x32xf32>,
    %c3_i32 = arith.constant 3 : i32
    %c8_i32_85 = arith.constant 8 : i32
    %161 = arith.muli %c3_i32, %c8_i32_85 : i32
    %162 = tpu.assume_multiple %161, 8 : i32
    %c0_86 = arith.constant 0 : index
    %c0_87 = arith.constant 0 : index
    %c0_88 = arith.constant 0 : index
    %163 = vector.load %arg15[%c0_86, %c0_87, %c0_88] : memref<2x8x32xf32, #tpu.memory_space<vmem>>, vector<1x8x32xf32>
    %164 = vector.shape_cast %163 : vector<1x8x32xf32> to vector<8x32xf32>
    %c0_89 = arith.constant 0 : index
    %c0_90 = arith.constant 0 : index
    %c0_91 = arith.constant 0 : index
    %165 = vector.load %arg16[%c0_89, %c0_90, %c0_91] : memref<2x8x32xf32, #tpu.memory_space<vmem>>, vector<1x8x32xf32>
    %166 = vector.shape_cast %165 : vector<1x8x32xf32> to vector<8x32xf32>
    %167 = arith.index_cast %162 : i32 to index
    %c0_92 = arith.constant 0 : index
    %168 = vector.load %arg18[%167, %c0_92] : memref<64x128xf32, #tpu.memory_space<vmem>>, vector<8x128xf32>
    %169 = arith.truncf %164 : vector<8x32xf32> to vector<8x32xbf16>
    %cst_93 = arith.constant dense<0.000000e+00> : vector<8x128xf32>
    %170 = tpu.matmul %169, %10, %cst_93 {dimension_numbers = #tpu.dot_dimension_numbers<[1], [0], [0], [1], [0, 0, 1, 1], [], []>} : vector<8x32xbf16>, vector<32x128xbf16>, vector<8x128xf32> -> vector<8x128xf32>
    %171 = arith.addf %168, %170 : vector<8x128xf32>
    %172 = vector.extract_strided_slice %171 {offsets = [0, 0], sizes = [8, 32], strides = [1, 1]} : vector<8x128xf32> to vector<8x32xf32>
    %cst_94 = arith.constant 5.000000e-01 : f32
    %173 = vector.broadcast %cst_94 : f32 to vector<8x32xf32>
    %174 = arith.mulf %173, %172 : vector<8x32xf32>
    %175 = math.tanh %174 : vector<8x32xf32>
    %cst_95 = arith.constant 1.000000e+00 : f32
    %176 = vector.broadcast %cst_95 : f32 to vector<8x32xf32>
    %177 = arith.addf %175, %176 : vector<8x32xf32>
    %cst_96 = arith.constant 5.000000e-01 : f32
    %178 = vector.broadcast %cst_96 : f32 to vector<8x32xf32>
    %179 = arith.mulf %178, %177 : vector<8x32xf32>
    %180 = vector.extract_strided_slice %171 {offsets = [0, 32], sizes = [8, 32], strides = [1, 1]} : vector<8x128xf32> to vector<8x32xf32>
    %cst_97 = arith.constant 5.000000e-01 : f32
    %181 = vector.broadcast %cst_97 : f32 to vector<8x32xf32>
    %182 = arith.mulf %181, %180 : vector<8x32xf32>
    %183 = math.tanh %182 : vector<8x32xf32>
    %cst_98 = arith.constant 1.000000e+00 : f32
    %184 = vector.broadcast %cst_98 : f32 to vector<8x32xf32>
    %185 = arith.addf %183, %184 : vector<8x32xf32>
    %cst_99 = arith.constant 5.000000e-01 : f32
    %186 = vector.broadcast %cst_99 : f32 to vector<8x32xf32>
    %187 = arith.mulf %186, %185 : vector<8x32xf32>
    %188 = vector.extract_strided_slice %171 {offsets = [0, 64], sizes = [8, 32], strides = [1, 1]} : vector<8x128xf32> to vector<8x32xf32>
    %189 = math.tanh %188 : vector<8x32xf32>
    %190 = vector.extract_strided_slice %171 {offsets = [0, 96], sizes = [8, 32], strides = [1, 1]} : vector<8x128xf32> to vector<8x32xf32>
    %cst_100 = arith.constant 5.000000e-01 : f32
    %191 = vector.broadcast %cst_100 : f32 to vector<8x32xf32>
    %192 = arith.mulf %191, %190 : vector<8x32xf32>
    %193 = math.tanh %192 : vector<8x32xf32>
    %cst_101 = arith.constant 1.000000e+00 : f32
    %194 = vector.broadcast %cst_101 : f32 to vector<8x32xf32>
    %195 = arith.addf %193, %194 : vector<8x32xf32>
    %cst_102 = arith.constant 5.000000e-01 : f32
    %196 = vector.broadcast %cst_102 : f32 to vector<8x32xf32>
    %197 = arith.mulf %196, %195 : vector<8x32xf32>
    %198 = arith.mulf %187, %166 : vector<8x32xf32>
    %199 = arith.mulf %179, %189 : vector<8x32xf32>
    %200 = arith.addf %198, %199 : vector<8x32xf32>
    %201 = math.tanh %200 : vector<8x32xf32>
    %202 = arith.mulf %197, %201 : vector<8x32xf32>
    %c0_103 = arith.constant 0 : index
    %c0_104 = arith.constant 0 : index
    %c0_105 = arith.constant 0 : index
    %203 = vector.load %arg15[%c0_103, %c0_104, %c0_105] : memref<2x8x32xf32, #tpu.memory_space<vmem>>, vector<1x8x32xf32>
    %204 = vector.shape_cast %203 : vector<1x8x32xf32> to vector<8x32xf32>
    %205 = vector.shape_cast %202 : vector<8x32xf32> to vector<1x8x32xf32>
    tpu.vector_store %arg15[%c0_103, %c0_104, %c0_105], %205 {strides = array<i32>} : memref<2x8x32xf32, #tpu.memory_space<vmem>>, vector<1x8x32xf32>,
    %c0_106 = arith.constant 0 : index
    %c0_107 = arith.constant 0 : index
    %c0_108 = arith.constant 0 : index
    %206 = vector.load %arg16[%c0_106, %c0_107, %c0_108] : memref<2x8x32xf32, #tpu.memory_space<vmem>>, vector<1x8x32xf32>
    %207 = vector.shape_cast %206 : vector<1x8x32xf32> to vector<8x32xf32>
    %208 = vector.shape_cast %200 : vector<8x32xf32> to vector<1x8x32xf32>
    tpu.vector_store %arg16[%c0_106, %c0_107, %c0_108], %208 {strides = array<i32>} : memref<2x8x32xf32, #tpu.memory_space<vmem>>, vector<1x8x32xf32>,
    %209 = arith.index_cast %162 : i32 to index
    %c0_109 = arith.constant 0 : index
    %210 = vector.load %arg17[%209, %c0_109] : memref<64x32xf32, #tpu.memory_space<vmem>>, vector<8x32xf32>
    tpu.vector_store %arg17[%209, %c0_109], %202 {strides = array<i32>} : memref<64x32xf32, #tpu.memory_space<vmem>>, vector<8x32xf32>,
    %c4_i32 = arith.constant 4 : i32
    %c8_i32_110 = arith.constant 8 : i32
    %211 = arith.muli %c4_i32, %c8_i32_110 : i32
    %212 = tpu.assume_multiple %211, 8 : i32
    %c0_111 = arith.constant 0 : index
    %c0_112 = arith.constant 0 : index
    %c0_113 = arith.constant 0 : index
    %213 = vector.load %arg15[%c0_111, %c0_112, %c0_113] : memref<2x8x32xf32, #tpu.memory_space<vmem>>, vector<1x8x32xf32>
    %214 = vector.shape_cast %213 : vector<1x8x32xf32> to vector<8x32xf32>
    %c0_114 = arith.constant 0 : index
    %c0_115 = arith.constant 0 : index
    %c0_116 = arith.constant 0 : index
    %215 = vector.load %arg16[%c0_114, %c0_115, %c0_116] : memref<2x8x32xf32, #tpu.memory_space<vmem>>, vector<1x8x32xf32>
    %216 = vector.shape_cast %215 : vector<1x8x32xf32> to vector<8x32xf32>
    %217 = arith.index_cast %212 : i32 to index
    %c0_117 = arith.constant 0 : index
    %218 = vector.load %arg18[%217, %c0_117] : memref<64x128xf32, #tpu.memory_space<vmem>>, vector<8x128xf32>
    %219 = arith.truncf %214 : vector<8x32xf32> to vector<8x32xbf16>
    %cst_118 = arith.constant dense<0.000000e+00> : vector<8x128xf32>
    %220 = tpu.matmul %219, %10, %cst_118 {dimension_numbers = #tpu.dot_dimension_numbers<[1], [0], [0], [1], [0, 0, 1, 1], [], []>} : vector<8x32xbf16>, vector<32x128xbf16>, vector<8x128xf32> -> vector<8x128xf32>
    %221 = arith.addf %218, %220 : vector<8x128xf32>
    %222 = vector.extract_strided_slice %221 {offsets = [0, 0], sizes = [8, 32], strides = [1, 1]} : vector<8x128xf32> to vector<8x32xf32>
    %cst_119 = arith.constant 5.000000e-01 : f32
    %223 = vector.broadcast %cst_119 : f32 to vector<8x32xf32>
    %224 = arith.mulf %223, %222 : vector<8x32xf32>
    %225 = math.tanh %224 : vector<8x32xf32>
    %cst_120 = arith.constant 1.000000e+00 : f32
    %226 = vector.broadcast %cst_120 : f32 to vector<8x32xf32>
    %227 = arith.addf %225, %226 : vector<8x32xf32>
    %cst_121 = arith.constant 5.000000e-01 : f32
    %228 = vector.broadcast %cst_121 : f32 to vector<8x32xf32>
    %229 = arith.mulf %228, %227 : vector<8x32xf32>
    %230 = vector.extract_strided_slice %221 {offsets = [0, 32], sizes = [8, 32], strides = [1, 1]} : vector<8x128xf32> to vector<8x32xf32>
    %cst_122 = arith.constant 5.000000e-01 : f32
    %231 = vector.broadcast %cst_122 : f32 to vector<8x32xf32>
    %232 = arith.mulf %231, %230 : vector<8x32xf32>
    %233 = math.tanh %232 : vector<8x32xf32>
    %cst_123 = arith.constant 1.000000e+00 : f32
    %234 = vector.broadcast %cst_123 : f32 to vector<8x32xf32>
    %235 = arith.addf %233, %234 : vector<8x32xf32>
    %cst_124 = arith.constant 5.000000e-01 : f32
    %236 = vector.broadcast %cst_124 : f32 to vector<8x32xf32>
    %237 = arith.mulf %236, %235 : vector<8x32xf32>
    %238 = vector.extract_strided_slice %221 {offsets = [0, 64], sizes = [8, 32], strides = [1, 1]} : vector<8x128xf32> to vector<8x32xf32>
    %239 = math.tanh %238 : vector<8x32xf32>
    %240 = vector.extract_strided_slice %221 {offsets = [0, 96], sizes = [8, 32], strides = [1, 1]} : vector<8x128xf32> to vector<8x32xf32>
    %cst_125 = arith.constant 5.000000e-01 : f32
    %241 = vector.broadcast %cst_125 : f32 to vector<8x32xf32>
    %242 = arith.mulf %241, %240 : vector<8x32xf32>
    %243 = math.tanh %242 : vector<8x32xf32>
    %cst_126 = arith.constant 1.000000e+00 : f32
    %244 = vector.broadcast %cst_126 : f32 to vector<8x32xf32>
    %245 = arith.addf %243, %244 : vector<8x32xf32>
    %cst_127 = arith.constant 5.000000e-01 : f32
    %246 = vector.broadcast %cst_127 : f32 to vector<8x32xf32>
    %247 = arith.mulf %246, %245 : vector<8x32xf32>
    %248 = arith.mulf %237, %216 : vector<8x32xf32>
    %249 = arith.mulf %229, %239 : vector<8x32xf32>
    %250 = arith.addf %248, %249 : vector<8x32xf32>
    %251 = math.tanh %250 : vector<8x32xf32>
    %252 = arith.mulf %247, %251 : vector<8x32xf32>
    %c0_128 = arith.constant 0 : index
    %c0_129 = arith.constant 0 : index
    %c0_130 = arith.constant 0 : index
    %253 = vector.load %arg15[%c0_128, %c0_129, %c0_130] : memref<2x8x32xf32, #tpu.memory_space<vmem>>, vector<1x8x32xf32>
    %254 = vector.shape_cast %253 : vector<1x8x32xf32> to vector<8x32xf32>
    %255 = vector.shape_cast %252 : vector<8x32xf32> to vector<1x8x32xf32>
    tpu.vector_store %arg15[%c0_128, %c0_129, %c0_130], %255 {strides = array<i32>} : memref<2x8x32xf32, #tpu.memory_space<vmem>>, vector<1x8x32xf32>,
    %c0_131 = arith.constant 0 : index
    %c0_132 = arith.constant 0 : index
    %c0_133 = arith.constant 0 : index
    %256 = vector.load %arg16[%c0_131, %c0_132, %c0_133] : memref<2x8x32xf32, #tpu.memory_space<vmem>>, vector<1x8x32xf32>
    %257 = vector.shape_cast %256 : vector<1x8x32xf32> to vector<8x32xf32>
    %258 = vector.shape_cast %250 : vector<8x32xf32> to vector<1x8x32xf32>
    tpu.vector_store %arg16[%c0_131, %c0_132, %c0_133], %258 {strides = array<i32>} : memref<2x8x32xf32, #tpu.memory_space<vmem>>, vector<1x8x32xf32>,
    %259 = arith.index_cast %212 : i32 to index
    %c0_134 = arith.constant 0 : index
    %260 = vector.load %arg17[%259, %c0_134] : memref<64x32xf32, #tpu.memory_space<vmem>>, vector<8x32xf32>
    tpu.vector_store %arg17[%259, %c0_134], %252 {strides = array<i32>} : memref<64x32xf32, #tpu.memory_space<vmem>>, vector<8x32xf32>,
    %c5_i32 = arith.constant 5 : i32
    %c8_i32_135 = arith.constant 8 : i32
    %261 = arith.muli %c5_i32, %c8_i32_135 : i32
    %262 = tpu.assume_multiple %261, 8 : i32
    %c0_136 = arith.constant 0 : index
    %c0_137 = arith.constant 0 : index
    %c0_138 = arith.constant 0 : index
    %263 = vector.load %arg15[%c0_136, %c0_137, %c0_138] : memref<2x8x32xf32, #tpu.memory_space<vmem>>, vector<1x8x32xf32>
    %264 = vector.shape_cast %263 : vector<1x8x32xf32> to vector<8x32xf32>
    %c0_139 = arith.constant 0 : index
    %c0_140 = arith.constant 0 : index
    %c0_141 = arith.constant 0 : index
    %265 = vector.load %arg16[%c0_139, %c0_140, %c0_141] : memref<2x8x32xf32, #tpu.memory_space<vmem>>, vector<1x8x32xf32>
    %266 = vector.shape_cast %265 : vector<1x8x32xf32> to vector<8x32xf32>
    %267 = arith.index_cast %262 : i32 to index
    %c0_142 = arith.constant 0 : index
    %268 = vector.load %arg18[%267, %c0_142] : memref<64x128xf32, #tpu.memory_space<vmem>>, vector<8x128xf32>
    %269 = arith.truncf %264 : vector<8x32xf32> to vector<8x32xbf16>
    %cst_143 = arith.constant dense<0.000000e+00> : vector<8x128xf32>
    %270 = tpu.matmul %269, %10, %cst_143 {dimension_numbers = #tpu.dot_dimension_numbers<[1], [0], [0], [1], [0, 0, 1, 1], [], []>} : vector<8x32xbf16>, vector<32x128xbf16>, vector<8x128xf32> -> vector<8x128xf32>
    %271 = arith.addf %268, %270 : vector<8x128xf32>
    %272 = vector.extract_strided_slice %271 {offsets = [0, 0], sizes = [8, 32], strides = [1, 1]} : vector<8x128xf32> to vector<8x32xf32>
    %cst_144 = arith.constant 5.000000e-01 : f32
    %273 = vector.broadcast %cst_144 : f32 to vector<8x32xf32>
    %274 = arith.mulf %273, %272 : vector<8x32xf32>
    %275 = math.tanh %274 : vector<8x32xf32>
    %cst_145 = arith.constant 1.000000e+00 : f32
    %276 = vector.broadcast %cst_145 : f32 to vector<8x32xf32>
    %277 = arith.addf %275, %276 : vector<8x32xf32>
    %cst_146 = arith.constant 5.000000e-01 : f32
    %278 = vector.broadcast %cst_146 : f32 to vector<8x32xf32>
    %279 = arith.mulf %278, %277 : vector<8x32xf32>
    %280 = vector.extract_strided_slice %271 {offsets = [0, 32], sizes = [8, 32], strides = [1, 1]} : vector<8x128xf32> to vector<8x32xf32>
    %cst_147 = arith.constant 5.000000e-01 : f32
    %281 = vector.broadcast %cst_147 : f32 to vector<8x32xf32>
    %282 = arith.mulf %281, %280 : vector<8x32xf32>
    %283 = math.tanh %282 : vector<8x32xf32>
    %cst_148 = arith.constant 1.000000e+00 : f32
    %284 = vector.broadcast %cst_148 : f32 to vector<8x32xf32>
    %285 = arith.addf %283, %284 : vector<8x32xf32>
    %cst_149 = arith.constant 5.000000e-01 : f32
    %286 = vector.broadcast %cst_149 : f32 to vector<8x32xf32>
    %287 = arith.mulf %286, %285 : vector<8x32xf32>
    %288 = vector.extract_strided_slice %271 {offsets = [0, 64], sizes = [8, 32], strides = [1, 1]} : vector<8x128xf32> to vector<8x32xf32>
    %289 = math.tanh %288 : vector<8x32xf32>
    %290 = vector.extract_strided_slice %271 {offsets = [0, 96], sizes = [8, 32], strides = [1, 1]} : vector<8x128xf32> to vector<8x32xf32>
    %cst_150 = arith.constant 5.000000e-01 : f32
    %291 = vector.broadcast %cst_150 : f32 to vector<8x32xf32>
    %292 = arith.mulf %291, %290 : vector<8x32xf32>
    %293 = math.tanh %292 : vector<8x32xf32>
    %cst_151 = arith.constant 1.000000e+00 : f32
    %294 = vector.broadcast %cst_151 : f32 to vector<8x32xf32>
    %295 = arith.addf %293, %294 : vector<8x32xf32>
    %cst_152 = arith.constant 5.000000e-01 : f32
    %296 = vector.broadcast %cst_152 : f32 to vector<8x32xf32>
    %297 = arith.mulf %296, %295 : vector<8x32xf32>
    %298 = arith.mulf %287, %266 : vector<8x32xf32>
    %299 = arith.mulf %279, %289 : vector<8x32xf32>
    %300 = arith.addf %298, %299 : vector<8x32xf32>
    %301 = math.tanh %300 : vector<8x32xf32>
    %302 = arith.mulf %297, %301 : vector<8x32xf32>
    %c0_153 = arith.constant 0 : index
    %c0_154 = arith.constant 0 : index
    %c0_155 = arith.constant 0 : index
    %303 = vector.load %arg15[%c0_153, %c0_154, %c0_155] : memref<2x8x32xf32, #tpu.memory_space<vmem>>, vector<1x8x32xf32>
    %304 = vector.shape_cast %303 : vector<1x8x32xf32> to vector<8x32xf32>
    %305 = vector.shape_cast %302 : vector<8x32xf32> to vector<1x8x32xf32>
    tpu.vector_store %arg15[%c0_153, %c0_154, %c0_155], %305 {strides = array<i32>} : memref<2x8x32xf32, #tpu.memory_space<vmem>>, vector<1x8x32xf32>,
    %c0_156 = arith.constant 0 : index
    %c0_157 = arith.constant 0 : index
    %c0_158 = arith.constant 0 : index
    %306 = vector.load %arg16[%c0_156, %c0_157, %c0_158] : memref<2x8x32xf32, #tpu.memory_space<vmem>>, vector<1x8x32xf32>
    %307 = vector.shape_cast %306 : vector<1x8x32xf32> to vector<8x32xf32>
    %308 = vector.shape_cast %300 : vector<8x32xf32> to vector<1x8x32xf32>
    tpu.vector_store %arg16[%c0_156, %c0_157, %c0_158], %308 {strides = array<i32>} : memref<2x8x32xf32, #tpu.memory_space<vmem>>, vector<1x8x32xf32>,
    %309 = arith.index_cast %262 : i32 to index
    %c0_159 = arith.constant 0 : index
    %310 = vector.load %arg17[%309, %c0_159] : memref<64x32xf32, #tpu.memory_space<vmem>>, vector<8x32xf32>
    tpu.vector_store %arg17[%309, %c0_159], %302 {strides = array<i32>} : memref<64x32xf32, #tpu.memory_space<vmem>>, vector<8x32xf32>,
    %c6_i32 = arith.constant 6 : i32
    %c8_i32_160 = arith.constant 8 : i32
    %311 = arith.muli %c6_i32, %c8_i32_160 : i32
    %312 = tpu.assume_multiple %311, 8 : i32
    %c0_161 = arith.constant 0 : index
    %c0_162 = arith.constant 0 : index
    %c0_163 = arith.constant 0 : index
    %313 = vector.load %arg15[%c0_161, %c0_162, %c0_163] : memref<2x8x32xf32, #tpu.memory_space<vmem>>, vector<1x8x32xf32>
    %314 = vector.shape_cast %313 : vector<1x8x32xf32> to vector<8x32xf32>
    %c0_164 = arith.constant 0 : index
    %c0_165 = arith.constant 0 : index
    %c0_166 = arith.constant 0 : index
    %315 = vector.load %arg16[%c0_164, %c0_165, %c0_166] : memref<2x8x32xf32, #tpu.memory_space<vmem>>, vector<1x8x32xf32>
    %316 = vector.shape_cast %315 : vector<1x8x32xf32> to vector<8x32xf32>
    %317 = arith.index_cast %312 : i32 to index
    %c0_167 = arith.constant 0 : index
    %318 = vector.load %arg18[%317, %c0_167] : memref<64x128xf32, #tpu.memory_space<vmem>>, vector<8x128xf32>
    %319 = arith.truncf %314 : vector<8x32xf32> to vector<8x32xbf16>
    %cst_168 = arith.constant dense<0.000000e+00> : vector<8x128xf32>
    %320 = tpu.matmul %319, %10, %cst_168 {dimension_numbers = #tpu.dot_dimension_numbers<[1], [0], [0], [1], [0, 0, 1, 1], [], []>} : vector<8x32xbf16>, vector<32x128xbf16>, vector<8x128xf32> -> vector<8x128xf32>
    %321 = arith.addf %318, %320 : vector<8x128xf32>
    %322 = vector.extract_strided_slice %321 {offsets = [0, 0], sizes = [8, 32], strides = [1, 1]} : vector<8x128xf32> to vector<8x32xf32>
    %cst_169 = arith.constant 5.000000e-01 : f32
    %323 = vector.broadcast %cst_169 : f32 to vector<8x32xf32>
    %324 = arith.mulf %323, %322 : vector<8x32xf32>
    %325 = math.tanh %324 : vector<8x32xf32>
    %cst_170 = arith.constant 1.000000e+00 : f32
    %326 = vector.broadcast %cst_170 : f32 to vector<8x32xf32>
    %327 = arith.addf %325, %326 : vector<8x32xf32>
    %cst_171 = arith.constant 5.000000e-01 : f32
    %328 = vector.broadcast %cst_171 : f32 to vector<8x32xf32>
    %329 = arith.mulf %328, %327 : vector<8x32xf32>
    %330 = vector.extract_strided_slice %321 {offsets = [0, 32], sizes = [8, 32], strides = [1, 1]} : vector<8x128xf32> to vector<8x32xf32>
    %cst_172 = arith.constant 5.000000e-01 : f32
    %331 = vector.broadcast %cst_172 : f32 to vector<8x32xf32>
    %332 = arith.mulf %331, %330 : vector<8x32xf32>
    %333 = math.tanh %332 : vector<8x32xf32>
    %cst_173 = arith.constant 1.000000e+00 : f32
    %334 = vector.broadcast %cst_173 : f32 to vector<8x32xf32>
    %335 = arith.addf %333, %334 : vector<8x32xf32>
    %cst_174 = arith.constant 5.000000e-01 : f32
    %336 = vector.broadcast %cst_174 : f32 to vector<8x32xf32>
    %337 = arith.mulf %336, %335 : vector<8x32xf32>
    %338 = vector.extract_strided_slice %321 {offsets = [0, 64], sizes = [8, 32], strides = [1, 1]} : vector<8x128xf32> to vector<8x32xf32>
    %339 = math.tanh %338 : vector<8x32xf32>
    %340 = vector.extract_strided_slice %321 {offsets = [0, 96], sizes = [8, 32], strides = [1, 1]} : vector<8x128xf32> to vector<8x32xf32>
    %cst_175 = arith.constant 5.000000e-01 : f32
    %341 = vector.broadcast %cst_175 : f32 to vector<8x32xf32>
    %342 = arith.mulf %341, %340 : vector<8x32xf32>
    %343 = math.tanh %342 : vector<8x32xf32>
    %cst_176 = arith.constant 1.000000e+00 : f32
    %344 = vector.broadcast %cst_176 : f32 to vector<8x32xf32>
    %345 = arith.addf %343, %344 : vector<8x32xf32>
    %cst_177 = arith.constant 5.000000e-01 : f32
    %346 = vector.broadcast %cst_177 : f32 to vector<8x32xf32>
    %347 = arith.mulf %346, %345 : vector<8x32xf32>
    %348 = arith.mulf %337, %316 : vector<8x32xf32>
    %349 = arith.mulf %329, %339 : vector<8x32xf32>
    %350 = arith.addf %348, %349 : vector<8x32xf32>
    %351 = math.tanh %350 : vector<8x32xf32>
    %352 = arith.mulf %347, %351 : vector<8x32xf32>
    %c0_178 = arith.constant 0 : index
    %c0_179 = arith.constant 0 : index
    %c0_180 = arith.constant 0 : index
    %353 = vector.load %arg15[%c0_178, %c0_179, %c0_180] : memref<2x8x32xf32, #tpu.memory_space<vmem>>, vector<1x8x32xf32>
    %354 = vector.shape_cast %353 : vector<1x8x32xf32> to vector<8x32xf32>
    %355 = vector.shape_cast %352 : vector<8x32xf32> to vector<1x8x32xf32>
    tpu.vector_store %arg15[%c0_178, %c0_179, %c0_180], %355 {strides = array<i32>} : memref<2x8x32xf32, #tpu.memory_space<vmem>>, vector<1x8x32xf32>,
    %c0_181 = arith.constant 0 : index
    %c0_182 = arith.constant 0 : index
    %c0_183 = arith.constant 0 : index
    %356 = vector.load %arg16[%c0_181, %c0_182, %c0_183] : memref<2x8x32xf32, #tpu.memory_space<vmem>>, vector<1x8x32xf32>
    %357 = vector.shape_cast %356 : vector<1x8x32xf32> to vector<8x32xf32>
    %358 = vector.shape_cast %350 : vector<8x32xf32> to vector<1x8x32xf32>
    tpu.vector_store %arg16[%c0_181, %c0_182, %c0_183], %358 {strides = array<i32>} : memref<2x8x32xf32, #tpu.memory_space<vmem>>, vector<1x8x32xf32>,
    %359 = arith.index_cast %312 : i32 to index
    %c0_184 = arith.constant 0 : index
    %360 = vector.load %arg17[%359, %c0_184] : memref<64x32xf32, #tpu.memory_space<vmem>>, vector<8x32xf32>
    tpu.vector_store %arg17[%359, %c0_184], %352 {strides = array<i32>} : memref<64x32xf32, #tpu.memory_space<vmem>>, vector<8x32xf32>,
    %c7_i32 = arith.constant 7 : i32
    %c8_i32_185 = arith.constant 8 : i32
    %361 = arith.muli %c7_i32, %c8_i32_185 : i32
    %362 = tpu.assume_multiple %361, 8 : i32
    %c0_186 = arith.constant 0 : index
    %c0_187 = arith.constant 0 : index
    %c0_188 = arith.constant 0 : index
    %363 = vector.load %arg15[%c0_186, %c0_187, %c0_188] : memref<2x8x32xf32, #tpu.memory_space<vmem>>, vector<1x8x32xf32>
    %364 = vector.shape_cast %363 : vector<1x8x32xf32> to vector<8x32xf32>
    %c0_189 = arith.constant 0 : index
    %c0_190 = arith.constant 0 : index
    %c0_191 = arith.constant 0 : index
    %365 = vector.load %arg16[%c0_189, %c0_190, %c0_191] : memref<2x8x32xf32, #tpu.memory_space<vmem>>, vector<1x8x32xf32>
    %366 = vector.shape_cast %365 : vector<1x8x32xf32> to vector<8x32xf32>
    %367 = arith.index_cast %362 : i32 to index
    %c0_192 = arith.constant 0 : index
    %368 = vector.load %arg18[%367, %c0_192] : memref<64x128xf32, #tpu.memory_space<vmem>>, vector<8x128xf32>
    %369 = arith.truncf %364 : vector<8x32xf32> to vector<8x32xbf16>
    %cst_193 = arith.constant dense<0.000000e+00> : vector<8x128xf32>
    %370 = tpu.matmul %369, %10, %cst_193 {dimension_numbers = #tpu.dot_dimension_numbers<[1], [0], [0], [1], [0, 0, 1, 1], [], []>} : vector<8x32xbf16>, vector<32x128xbf16>, vector<8x128xf32> -> vector<8x128xf32>
    %371 = arith.addf %368, %370 : vector<8x128xf32>
    %372 = vector.extract_strided_slice %371 {offsets = [0, 0], sizes = [8, 32], strides = [1, 1]} : vector<8x128xf32> to vector<8x32xf32>
    %cst_194 = arith.constant 5.000000e-01 : f32
    %373 = vector.broadcast %cst_194 : f32 to vector<8x32xf32>
    %374 = arith.mulf %373, %372 : vector<8x32xf32>
    %375 = math.tanh %374 : vector<8x32xf32>
    %cst_195 = arith.constant 1.000000e+00 : f32
    %376 = vector.broadcast %cst_195 : f32 to vector<8x32xf32>
    %377 = arith.addf %375, %376 : vector<8x32xf32>
    %cst_196 = arith.constant 5.000000e-01 : f32
    %378 = vector.broadcast %cst_196 : f32 to vector<8x32xf32>
    %379 = arith.mulf %378, %377 : vector<8x32xf32>
    %380 = vector.extract_strided_slice %371 {offsets = [0, 32], sizes = [8, 32], strides = [1, 1]} : vector<8x128xf32> to vector<8x32xf32>
    %cst_197 = arith.constant 5.000000e-01 : f32
    %381 = vector.broadcast %cst_197 : f32 to vector<8x32xf32>
    %382 = arith.mulf %381, %380 : vector<8x32xf32>
    %383 = math.tanh %382 : vector<8x32xf32>
    %cst_198 = arith.constant 1.000000e+00 : f32
    %384 = vector.broadcast %cst_198 : f32 to vector<8x32xf32>
    %385 = arith.addf %383, %384 : vector<8x32xf32>
    %cst_199 = arith.constant 5.000000e-01 : f32
    %386 = vector.broadcast %cst_199 : f32 to vector<8x32xf32>
    %387 = arith.mulf %386, %385 : vector<8x32xf32>
    %388 = vector.extract_strided_slice %371 {offsets = [0, 64], sizes = [8, 32], strides = [1, 1]} : vector<8x128xf32> to vector<8x32xf32>
    %389 = math.tanh %388 : vector<8x32xf32>
    %390 = vector.extract_strided_slice %371 {offsets = [0, 96], sizes = [8, 32], strides = [1, 1]} : vector<8x128xf32> to vector<8x32xf32>
    %cst_200 = arith.constant 5.000000e-01 : f32
    %391 = vector.broadcast %cst_200 : f32 to vector<8x32xf32>
    %392 = arith.mulf %391, %390 : vector<8x32xf32>
    %393 = math.tanh %392 : vector<8x32xf32>
    %cst_201 = arith.constant 1.000000e+00 : f32
    %394 = vector.broadcast %cst_201 : f32 to vector<8x32xf32>
    %395 = arith.addf %393, %394 : vector<8x32xf32>
    %cst_202 = arith.constant 5.000000e-01 : f32
    %396 = vector.broadcast %cst_202 : f32 to vector<8x32xf32>
    %397 = arith.mulf %396, %395 : vector<8x32xf32>
    %398 = arith.mulf %387, %366 : vector<8x32xf32>
    %399 = arith.mulf %379, %389 : vector<8x32xf32>
    %400 = arith.addf %398, %399 : vector<8x32xf32>
    %401 = math.tanh %400 : vector<8x32xf32>
    %402 = arith.mulf %397, %401 : vector<8x32xf32>
    %c0_203 = arith.constant 0 : index
    %c0_204 = arith.constant 0 : index
    %c0_205 = arith.constant 0 : index
    %403 = vector.load %arg15[%c0_203, %c0_204, %c0_205] : memref<2x8x32xf32, #tpu.memory_space<vmem>>, vector<1x8x32xf32>
    %404 = vector.shape_cast %403 : vector<1x8x32xf32> to vector<8x32xf32>
    %405 = vector.shape_cast %402 : vector<8x32xf32> to vector<1x8x32xf32>
    tpu.vector_store %arg15[%c0_203, %c0_204, %c0_205], %405 {strides = array<i32>} : memref<2x8x32xf32, #tpu.memory_space<vmem>>, vector<1x8x32xf32>,
    %c0_206 = arith.constant 0 : index
    %c0_207 = arith.constant 0 : index
    %c0_208 = arith.constant 0 : index
    %406 = vector.load %arg16[%c0_206, %c0_207, %c0_208] : memref<2x8x32xf32, #tpu.memory_space<vmem>>, vector<1x8x32xf32>
    %407 = vector.shape_cast %406 : vector<1x8x32xf32> to vector<8x32xf32>
    %408 = vector.shape_cast %400 : vector<8x32xf32> to vector<1x8x32xf32>
    tpu.vector_store %arg16[%c0_206, %c0_207, %c0_208], %408 {strides = array<i32>} : memref<2x8x32xf32, #tpu.memory_space<vmem>>, vector<1x8x32xf32>,
    %409 = arith.index_cast %362 : i32 to index
    %c0_209 = arith.constant 0 : index
    %410 = vector.load %arg17[%409, %c0_209] : memref<64x32xf32, #tpu.memory_space<vmem>>, vector<8x32xf32>
    tpu.vector_store %arg17[%409, %c0_209], %402 {strides = array<i32>} : memref<64x32xf32, #tpu.memory_space<vmem>>, vector<8x32xf32>,
    %c8_i32_210 = arith.constant 8 : i32
    %c0_211 = arith.constant 0 : index
    %c0_212 = arith.constant 0 : index
    %411 = vector.load %arg17[%c0_211, %c0_212] : memref<64x32xf32, #tpu.memory_space<vmem>>, vector<64x32xf32>
    %412 = arith.truncf %411 : vector<64x32xf32> to vector<64x32xbf16>
    %c0_213 = arith.constant 0 : index
    %c0_214 = arith.constant 0 : index
    %413 = vector.load %arg3[%c0_213, %c0_214] : memref<32x128xbf16, #tpu.memory_space<vmem>>, vector<32x128xbf16>
    %cst_215 = arith.constant dense<0.000000e+00> : vector<64x128xf32>
    %414 = tpu.matmul %412, %413, %cst_215 {dimension_numbers = #tpu.dot_dimension_numbers<[1], [0], [0], [1], [0, 0, 1, 1], [], []>} : vector<64x32xbf16>, vector<32x128xbf16>, vector<64x128xf32> -> vector<64x128xf32>
    %c0_216 = arith.constant 0 : index
    %c0_217 = arith.constant 0 : index
    %415 = vector.load %arg7[%c0_216, %c0_217] : memref<1x128xf32, #tpu.memory_space<vmem>>, vector<1x128xf32>
    %416 = vector.broadcast %415 : vector<1x128xf32> to vector<64x128xf32>
    %417 = arith.addf %414, %416 : vector<64x128xf32>
    %c0_218 = arith.constant 0 : index
    %c0_219 = arith.constant 0 : index
    %418 = vector.load %arg18[%c0_218, %c0_219] : memref<64x128xf32, #tpu.memory_space<vmem>>, vector<64x128xf32>
    tpu.vector_store %arg18[%c0_218, %c0_219], %417 {strides = array<i32>} : memref<64x128xf32, #tpu.memory_space<vmem>>, vector<64x128xf32>,
    %c0_220 = arith.constant 0 : index
    %c0_221 = arith.constant 0 : index
    %419 = vector.load %arg5[%c0_220, %c0_221] : memref<32x128xbf16, #tpu.memory_space<vmem>>, vector<32x128xbf16>
    %c0_i32_222 = arith.constant 0 : i32
    %c8_i32_223 = arith.constant 8 : i32
    %420 = arith.muli %c0_i32_222, %c8_i32_223 : i32
    %421 = tpu.assume_multiple %420, 8 : i32
    %c1 = arith.constant 1 : index
    %c0_224 = arith.constant 0 : index
    %c0_225 = arith.constant 0 : index
    %422 = vector.load %arg15[%c1, %c0_224, %c0_225] : memref<2x8x32xf32, #tpu.memory_space<vmem>>, vector<1x8x32xf32>
    %423 = vector.shape_cast %422 : vector<1x8x32xf32> to vector<8x32xf32>
    %c1_226 = arith.constant 1 : index
    %c0_227 = arith.constant 0 : index
    %c0_228 = arith.constant 0 : index
    %424 = vector.load %arg16[%c1_226, %c0_227, %c0_228] : memref<2x8x32xf32, #tpu.memory_space<vmem>>, vector<1x8x32xf32>
    %425 = vector.shape_cast %424 : vector<1x8x32xf32> to vector<8x32xf32>
    %426 = arith.index_cast %421 : i32 to index
    %c0_229 = arith.constant 0 : index
    %427 = vector.load %arg18[%426, %c0_229] : memref<64x128xf32, #tpu.memory_space<vmem>>, vector<8x128xf32>
    %428 = arith.truncf %423 : vector<8x32xf32> to vector<8x32xbf16>
    %cst_230 = arith.constant dense<0.000000e+00> : vector<8x128xf32>
    %429 = tpu.matmul %428, %419, %cst_230 {dimension_numbers = #tpu.dot_dimension_numbers<[1], [0], [0], [1], [0, 0, 1, 1], [], []>} : vector<8x32xbf16>, vector<32x128xbf16>, vector<8x128xf32> -> vector<8x128xf32>
    %430 = arith.addf %427, %429 : vector<8x128xf32>
    %431 = vector.extract_strided_slice %430 {offsets = [0, 0], sizes = [8, 32], strides = [1, 1]} : vector<8x128xf32> to vector<8x32xf32>
    %cst_231 = arith.constant 5.000000e-01 : f32
    %432 = vector.broadcast %cst_231 : f32 to vector<8x32xf32>
    %433 = arith.mulf %432, %431 : vector<8x32xf32>
    %434 = math.tanh %433 : vector<8x32xf32>
    %cst_232 = arith.constant 1.000000e+00 : f32
    %435 = vector.broadcast %cst_232 : f32 to vector<8x32xf32>
    %436 = arith.addf %434, %435 : vector<8x32xf32>
    %cst_233 = arith.constant 5.000000e-01 : f32
    %437 = vector.broadcast %cst_233 : f32 to vector<8x32xf32>
    %438 = arith.mulf %437, %436 : vector<8x32xf32>
    %439 = vector.extract_strided_slice %430 {offsets = [0, 32], sizes = [8, 32], strides = [1, 1]} : vector<8x128xf32> to vector<8x32xf32>
    %cst_234 = arith.constant 5.000000e-01 : f32
    %440 = vector.broadcast %cst_234 : f32 to vector<8x32xf32>
    %441 = arith.mulf %440, %439 : vector<8x32xf32>
    %442 = math.tanh %441 : vector<8x32xf32>
    %cst_235 = arith.constant 1.000000e+00 : f32
    %443 = vector.broadcast %cst_235 : f32 to vector<8x32xf32>
    %444 = arith.addf %442, %443 : vector<8x32xf32>
    %cst_236 = arith.constant 5.000000e-01 : f32
    %445 = vector.broadcast %cst_236 : f32 to vector<8x32xf32>
    %446 = arith.mulf %445, %444 : vector<8x32xf32>
    %447 = vector.extract_strided_slice %430 {offsets = [0, 64], sizes = [8, 32], strides = [1, 1]} : vector<8x128xf32> to vector<8x32xf32>
    %448 = math.tanh %447 : vector<8x32xf32>
    %449 = vector.extract_strided_slice %430 {offsets = [0, 96], sizes = [8, 32], strides = [1, 1]} : vector<8x128xf32> to vector<8x32xf32>
    %cst_237 = arith.constant 5.000000e-01 : f32
    %450 = vector.broadcast %cst_237 : f32 to vector<8x32xf32>
    %451 = arith.mulf %450, %449 : vector<8x32xf32>
    %452 = math.tanh %451 : vector<8x32xf32>
    %cst_238 = arith.constant 1.000000e+00 : f32
    %453 = vector.broadcast %cst_238 : f32 to vector<8x32xf32>
    %454 = arith.addf %452, %453 : vector<8x32xf32>
    %cst_239 = arith.constant 5.000000e-01 : f32
    %455 = vector.broadcast %cst_239 : f32 to vector<8x32xf32>
    %456 = arith.mulf %455, %454 : vector<8x32xf32>
    %457 = arith.mulf %446, %425 : vector<8x32xf32>
    %458 = arith.mulf %438, %448 : vector<8x32xf32>
    %459 = arith.addf %457, %458 : vector<8x32xf32>
    %460 = math.tanh %459 : vector<8x32xf32>
    %461 = arith.mulf %456, %460 : vector<8x32xf32>
    %c1_240 = arith.constant 1 : index
    %c0_241 = arith.constant 0 : index
    %c0_242 = arith.constant 0 : index
    %462 = vector.load %arg15[%c1_240, %c0_241, %c0_242] : memref<2x8x32xf32, #tpu.memory_space<vmem>>, vector<1x8x32xf32>
    %463 = vector.shape_cast %462 : vector<1x8x32xf32> to vector<8x32xf32>
    %464 = vector.shape_cast %461 : vector<8x32xf32> to vector<1x8x32xf32>
    tpu.vector_store %arg15[%c1_240, %c0_241, %c0_242], %464 {strides = array<i32>} : memref<2x8x32xf32, #tpu.memory_space<vmem>>, vector<1x8x32xf32>,
    %c1_243 = arith.constant 1 : index
    %c0_244 = arith.constant 0 : index
    %c0_245 = arith.constant 0 : index
    %465 = vector.load %arg16[%c1_243, %c0_244, %c0_245] : memref<2x8x32xf32, #tpu.memory_space<vmem>>, vector<1x8x32xf32>
    %466 = vector.shape_cast %465 : vector<1x8x32xf32> to vector<8x32xf32>
    %467 = vector.shape_cast %459 : vector<8x32xf32> to vector<1x8x32xf32>
    tpu.vector_store %arg16[%c1_243, %c0_244, %c0_245], %467 {strides = array<i32>} : memref<2x8x32xf32, #tpu.memory_space<vmem>>, vector<1x8x32xf32>,
    %468 = arith.index_cast %421 : i32 to index
    %c0_246 = arith.constant 0 : index
    %469 = vector.load %arg17[%468, %c0_246] : memref<64x32xf32, #tpu.memory_space<vmem>>, vector<8x32xf32>
    tpu.vector_store %arg17[%468, %c0_246], %461 {strides = array<i32>} : memref<64x32xf32, #tpu.memory_space<vmem>>, vector<8x32xf32>,
    %c1_i32_247 = arith.constant 1 : i32
    %c8_i32_248 = arith.constant 8 : i32
    %470 = arith.muli %c1_i32_247, %c8_i32_248 : i32
    %471 = tpu.assume_multiple %470, 8 : i32
    %c1_249 = arith.constant 1 : index
    %c0_250 = arith.constant 0 : index
    %c0_251 = arith.constant 0 : index
    %472 = vector.load %arg15[%c1_249, %c0_250, %c0_251] : memref<2x8x32xf32, #tpu.memory_space<vmem>>, vector<1x8x32xf32>
    %473 = vector.shape_cast %472 : vector<1x8x32xf32> to vector<8x32xf32>
    %c1_252 = arith.constant 1 : index
    %c0_253 = arith.constant 0 : index
    %c0_254 = arith.constant 0 : index
    %474 = vector.load %arg16[%c1_252, %c0_253, %c0_254] : memref<2x8x32xf32, #tpu.memory_space<vmem>>, vector<1x8x32xf32>
    %475 = vector.shape_cast %474 : vector<1x8x32xf32> to vector<8x32xf32>
    %476 = arith.index_cast %471 : i32 to index
    %c0_255 = arith.constant 0 : index
    %477 = vector.load %arg18[%476, %c0_255] : memref<64x128xf32, #tpu.memory_space<vmem>>, vector<8x128xf32>
    %478 = arith.truncf %473 : vector<8x32xf32> to vector<8x32xbf16>
    %cst_256 = arith.constant dense<0.000000e+00> : vector<8x128xf32>
    %479 = tpu.matmul %478, %419, %cst_256 {dimension_numbers = #tpu.dot_dimension_numbers<[1], [0], [0], [1], [0, 0, 1, 1], [], []>} : vector<8x32xbf16>, vector<32x128xbf16>, vector<8x128xf32> -> vector<8x128xf32>
    %480 = arith.addf %477, %479 : vector<8x128xf32>
    %481 = vector.extract_strided_slice %480 {offsets = [0, 0], sizes = [8, 32], strides = [1, 1]} : vector<8x128xf32> to vector<8x32xf32>
    %cst_257 = arith.constant 5.000000e-01 : f32
    %482 = vector.broadcast %cst_257 : f32 to vector<8x32xf32>
    %483 = arith.mulf %482, %481 : vector<8x32xf32>
    %484 = math.tanh %483 : vector<8x32xf32>
    %cst_258 = arith.constant 1.000000e+00 : f32
    %485 = vector.broadcast %cst_258 : f32 to vector<8x32xf32>
    %486 = arith.addf %484, %485 : vector<8x32xf32>
    %cst_259 = arith.constant 5.000000e-01 : f32
    %487 = vector.broadcast %cst_259 : f32 to vector<8x32xf32>
    %488 = arith.mulf %487, %486 : vector<8x32xf32>
    %489 = vector.extract_strided_slice %480 {offsets = [0, 32], sizes = [8, 32], strides = [1, 1]} : vector<8x128xf32> to vector<8x32xf32>
    %cst_260 = arith.constant 5.000000e-01 : f32
    %490 = vector.broadcast %cst_260 : f32 to vector<8x32xf32>
    %491 = arith.mulf %490, %489 : vector<8x32xf32>
    %492 = math.tanh %491 : vector<8x32xf32>
    %cst_261 = arith.constant 1.000000e+00 : f32
    %493 = vector.broadcast %cst_261 : f32 to vector<8x32xf32>
    %494 = arith.addf %492, %493 : vector<8x32xf32>
    %cst_262 = arith.constant 5.000000e-01 : f32
    %495 = vector.broadcast %cst_262 : f32 to vector<8x32xf32>
    %496 = arith.mulf %495, %494 : vector<8x32xf32>
    %497 = vector.extract_strided_slice %480 {offsets = [0, 64], sizes = [8, 32], strides = [1, 1]} : vector<8x128xf32> to vector<8x32xf32>
    %498 = math.tanh %497 : vector<8x32xf32>
    %499 = vector.extract_strided_slice %480 {offsets = [0, 96], sizes = [8, 32], strides = [1, 1]} : vector<8x128xf32> to vector<8x32xf32>
    %cst_263 = arith.constant 5.000000e-01 : f32
    %500 = vector.broadcast %cst_263 : f32 to vector<8x32xf32>
    %501 = arith.mulf %500, %499 : vector<8x32xf32>
    %502 = math.tanh %501 : vector<8x32xf32>
    %cst_264 = arith.constant 1.000000e+00 : f32
    %503 = vector.broadcast %cst_264 : f32 to vector<8x32xf32>
    %504 = arith.addf %502, %503 : vector<8x32xf32>
    %cst_265 = arith.constant 5.000000e-01 : f32
    %505 = vector.broadcast %cst_265 : f32 to vector<8x32xf32>
    %506 = arith.mulf %505, %504 : vector<8x32xf32>
    %507 = arith.mulf %496, %475 : vector<8x32xf32>
    %508 = arith.mulf %488, %498 : vector<8x32xf32>
    %509 = arith.addf %507, %508 : vector<8x32xf32>
    %510 = math.tanh %509 : vector<8x32xf32>
    %511 = arith.mulf %506, %510 : vector<8x32xf32>
    %c1_266 = arith.constant 1 : index
    %c0_267 = arith.constant 0 : index
    %c0_268 = arith.constant 0 : index
    %512 = vector.load %arg15[%c1_266, %c0_267, %c0_268] : memref<2x8x32xf32, #tpu.memory_space<vmem>>, vector<1x8x32xf32>
    %513 = vector.shape_cast %512 : vector<1x8x32xf32> to vector<8x32xf32>
    %514 = vector.shape_cast %511 : vector<8x32xf32> to vector<1x8x32xf32>
    tpu.vector_store %arg15[%c1_266, %c0_267, %c0_268], %514 {strides = array<i32>} : memref<2x8x32xf32, #tpu.memory_space<vmem>>, vector<1x8x32xf32>,
    %c1_269 = arith.constant 1 : index
    %c0_270 = arith.constant 0 : index
    %c0_271 = arith.constant 0 : index
    %515 = vector.load %arg16[%c1_269, %c0_270, %c0_271] : memref<2x8x32xf32, #tpu.memory_space<vmem>>, vector<1x8x32xf32>
    %516 = vector.shape_cast %515 : vector<1x8x32xf32> to vector<8x32xf32>
    %517 = vector.shape_cast %509 : vector<8x32xf32> to vector<1x8x32xf32>
    tpu.vector_store %arg16[%c1_269, %c0_270, %c0_271], %517 {strides = array<i32>} : memref<2x8x32xf32, #tpu.memory_space<vmem>>, vector<1x8x32xf32>,
    %518 = arith.index_cast %471 : i32 to index
    %c0_272 = arith.constant 0 : index
    %519 = vector.load %arg17[%518, %c0_272] : memref<64x32xf32, #tpu.memory_space<vmem>>, vector<8x32xf32>
    tpu.vector_store %arg17[%518, %c0_272], %511 {strides = array<i32>} : memref<64x32xf32, #tpu.memory_space<vmem>>, vector<8x32xf32>,
    %c2_i32_273 = arith.constant 2 : i32
    %c8_i32_274 = arith.constant 8 : i32
    %520 = arith.muli %c2_i32_273, %c8_i32_274 : i32
    %521 = tpu.assume_multiple %520, 8 : i32
    %c1_275 = arith.constant 1 : index
    %c0_276 = arith.constant 0 : index
    %c0_277 = arith.constant 0 : index
    %522 = vector.load %arg15[%c1_275, %c0_276, %c0_277] : memref<2x8x32xf32, #tpu.memory_space<vmem>>, vector<1x8x32xf32>
    %523 = vector.shape_cast %522 : vector<1x8x32xf32> to vector<8x32xf32>
    %c1_278 = arith.constant 1 : index
    %c0_279 = arith.constant 0 : index
    %c0_280 = arith.constant 0 : index
    %524 = vector.load %arg16[%c1_278, %c0_279, %c0_280] : memref<2x8x32xf32, #tpu.memory_space<vmem>>, vector<1x8x32xf32>
    %525 = vector.shape_cast %524 : vector<1x8x32xf32> to vector<8x32xf32>
    %526 = arith.index_cast %521 : i32 to index
    %c0_281 = arith.constant 0 : index
    %527 = vector.load %arg18[%526, %c0_281] : memref<64x128xf32, #tpu.memory_space<vmem>>, vector<8x128xf32>
    %528 = arith.truncf %523 : vector<8x32xf32> to vector<8x32xbf16>
    %cst_282 = arith.constant dense<0.000000e+00> : vector<8x128xf32>
    %529 = tpu.matmul %528, %419, %cst_282 {dimension_numbers = #tpu.dot_dimension_numbers<[1], [0], [0], [1], [0, 0, 1, 1], [], []>} : vector<8x32xbf16>, vector<32x128xbf16>, vector<8x128xf32> -> vector<8x128xf32>
    %530 = arith.addf %527, %529 : vector<8x128xf32>
    %531 = vector.extract_strided_slice %530 {offsets = [0, 0], sizes = [8, 32], strides = [1, 1]} : vector<8x128xf32> to vector<8x32xf32>
    %cst_283 = arith.constant 5.000000e-01 : f32
    %532 = vector.broadcast %cst_283 : f32 to vector<8x32xf32>
    %533 = arith.mulf %532, %531 : vector<8x32xf32>
    %534 = math.tanh %533 : vector<8x32xf32>
    %cst_284 = arith.constant 1.000000e+00 : f32
    %535 = vector.broadcast %cst_284 : f32 to vector<8x32xf32>
    %536 = arith.addf %534, %535 : vector<8x32xf32>
    %cst_285 = arith.constant 5.000000e-01 : f32
    %537 = vector.broadcast %cst_285 : f32 to vector<8x32xf32>
    %538 = arith.mulf %537, %536 : vector<8x32xf32>
    %539 = vector.extract_strided_slice %530 {offsets = [0, 32], sizes = [8, 32], strides = [1, 1]} : vector<8x128xf32> to vector<8x32xf32>
    %cst_286 = arith.constant 5.000000e-01 : f32
    %540 = vector.broadcast %cst_286 : f32 to vector<8x32xf32>
    %541 = arith.mulf %540, %539 : vector<8x32xf32>
    %542 = math.tanh %541 : vector<8x32xf32>
    %cst_287 = arith.constant 1.000000e+00 : f32
    %543 = vector.broadcast %cst_287 : f32 to vector<8x32xf32>
    %544 = arith.addf %542, %543 : vector<8x32xf32>
    %cst_288 = arith.constant 5.000000e-01 : f32
    %545 = vector.broadcast %cst_288 : f32 to vector<8x32xf32>
    %546 = arith.mulf %545, %544 : vector<8x32xf32>
    %547 = vector.extract_strided_slice %530 {offsets = [0, 64], sizes = [8, 32], strides = [1, 1]} : vector<8x128xf32> to vector<8x32xf32>
    %548 = math.tanh %547 : vector<8x32xf32>
    %549 = vector.extract_strided_slice %530 {offsets = [0, 96], sizes = [8, 32], strides = [1, 1]} : vector<8x128xf32> to vector<8x32xf32>
    %cst_289 = arith.constant 5.000000e-01 : f32
    %550 = vector.broadcast %cst_289 : f32 to vector<8x32xf32>
    %551 = arith.mulf %550, %549 : vector<8x32xf32>
    %552 = math.tanh %551 : vector<8x32xf32>
    %cst_290 = arith.constant 1.000000e+00 : f32
    %553 = vector.broadcast %cst_290 : f32 to vector<8x32xf32>
    %554 = arith.addf %552, %553 : vector<8x32xf32>
    %cst_291 = arith.constant 5.000000e-01 : f32
    %555 = vector.broadcast %cst_291 : f32 to vector<8x32xf32>
    %556 = arith.mulf %555, %554 : vector<8x32xf32>
    %557 = arith.mulf %546, %525 : vector<8x32xf32>
    %558 = arith.mulf %538, %548 : vector<8x32xf32>
    %559 = arith.addf %557, %558 : vector<8x32xf32>
    %560 = math.tanh %559 : vector<8x32xf32>
    %561 = arith.mulf %556, %560 : vector<8x32xf32>
    %c1_292 = arith.constant 1 : index
    %c0_293 = arith.constant 0 : index
    %c0_294 = arith.constant 0 : index
    %562 = vector.load %arg15[%c1_292, %c0_293, %c0_294] : memref<2x8x32xf32, #tpu.memory_space<vmem>>, vector<1x8x32xf32>
    %563 = vector.shape_cast %562 : vector<1x8x32xf32> to vector<8x32xf32>
    %564 = vector.shape_cast %561 : vector<8x32xf32> to vector<1x8x32xf32>
    tpu.vector_store %arg15[%c1_292, %c0_293, %c0_294], %564 {strides = array<i32>} : memref<2x8x32xf32, #tpu.memory_space<vmem>>, vector<1x8x32xf32>,
    %c1_295 = arith.constant 1 : index
    %c0_296 = arith.constant 0 : index
    %c0_297 = arith.constant 0 : index
    %565 = vector.load %arg16[%c1_295, %c0_296, %c0_297] : memref<2x8x32xf32, #tpu.memory_space<vmem>>, vector<1x8x32xf32>
    %566 = vector.shape_cast %565 : vector<1x8x32xf32> to vector<8x32xf32>
    %567 = vector.shape_cast %559 : vector<8x32xf32> to vector<1x8x32xf32>
    tpu.vector_store %arg16[%c1_295, %c0_296, %c0_297], %567 {strides = array<i32>} : memref<2x8x32xf32, #tpu.memory_space<vmem>>, vector<1x8x32xf32>,
    %568 = arith.index_cast %521 : i32 to index
    %c0_298 = arith.constant 0 : index
    %569 = vector.load %arg17[%568, %c0_298] : memref<64x32xf32, #tpu.memory_space<vmem>>, vector<8x32xf32>
    tpu.vector_store %arg17[%568, %c0_298], %561 {strides = array<i32>} : memref<64x32xf32, #tpu.memory_space<vmem>>, vector<8x32xf32>,
    %c3_i32_299 = arith.constant 3 : i32
    %c8_i32_300 = arith.constant 8 : i32
    %570 = arith.muli %c3_i32_299, %c8_i32_300 : i32
    %571 = tpu.assume_multiple %570, 8 : i32
    %c1_301 = arith.constant 1 : index
    %c0_302 = arith.constant 0 : index
    %c0_303 = arith.constant 0 : index
    %572 = vector.load %arg15[%c1_301, %c0_302, %c0_303] : memref<2x8x32xf32, #tpu.memory_space<vmem>>, vector<1x8x32xf32>
    %573 = vector.shape_cast %572 : vector<1x8x32xf32> to vector<8x32xf32>
    %c1_304 = arith.constant 1 : index
    %c0_305 = arith.constant 0 : index
    %c0_306 = arith.constant 0 : index
    %574 = vector.load %arg16[%c1_304, %c0_305, %c0_306] : memref<2x8x32xf32, #tpu.memory_space<vmem>>, vector<1x8x32xf32>
    %575 = vector.shape_cast %574 : vector<1x8x32xf32> to vector<8x32xf32>
    %576 = arith.index_cast %571 : i32 to index
    %c0_307 = arith.constant 0 : index
    %577 = vector.load %arg18[%576, %c0_307] : memref<64x128xf32, #tpu.memory_space<vmem>>, vector<8x128xf32>
    %578 = arith.truncf %573 : vector<8x32xf32> to vector<8x32xbf16>
    %cst_308 = arith.constant dense<0.000000e+00> : vector<8x128xf32>
    %579 = tpu.matmul %578, %419, %cst_308 {dimension_numbers = #tpu.dot_dimension_numbers<[1], [0], [0], [1], [0, 0, 1, 1], [], []>} : vector<8x32xbf16>, vector<32x128xbf16>, vector<8x128xf32> -> vector<8x128xf32>
    %580 = arith.addf %577, %579 : vector<8x128xf32>
    %581 = vector.extract_strided_slice %580 {offsets = [0, 0], sizes = [8, 32], strides = [1, 1]} : vector<8x128xf32> to vector<8x32xf32>
    %cst_309 = arith.constant 5.000000e-01 : f32
    %582 = vector.broadcast %cst_309 : f32 to vector<8x32xf32>
    %583 = arith.mulf %582, %581 : vector<8x32xf32>
    %584 = math.tanh %583 : vector<8x32xf32>
    %cst_310 = arith.constant 1.000000e+00 : f32
    %585 = vector.broadcast %cst_310 : f32 to vector<8x32xf32>
    %586 = arith.addf %584, %585 : vector<8x32xf32>
    %cst_311 = arith.constant 5.000000e-01 : f32
    %587 = vector.broadcast %cst_311 : f32 to vector<8x32xf32>
    %588 = arith.mulf %587, %586 : vector<8x32xf32>
    %589 = vector.extract_strided_slice %580 {offsets = [0, 32], sizes = [8, 32], strides = [1, 1]} : vector<8x128xf32> to vector<8x32xf32>
    %cst_312 = arith.constant 5.000000e-01 : f32
    %590 = vector.broadcast %cst_312 : f32 to vector<8x32xf32>
    %591 = arith.mulf %590, %589 : vector<8x32xf32>
    %592 = math.tanh %591 : vector<8x32xf32>
    %cst_313 = arith.constant 1.000000e+00 : f32
    %593 = vector.broadcast %cst_313 : f32 to vector<8x32xf32>
    %594 = arith.addf %592, %593 : vector<8x32xf32>
    %cst_314 = arith.constant 5.000000e-01 : f32
    %595 = vector.broadcast %cst_314 : f32 to vector<8x32xf32>
    %596 = arith.mulf %595, %594 : vector<8x32xf32>
    %597 = vector.extract_strided_slice %580 {offsets = [0, 64], sizes = [8, 32], strides = [1, 1]} : vector<8x128xf32> to vector<8x32xf32>
    %598 = math.tanh %597 : vector<8x32xf32>
    %599 = vector.extract_strided_slice %580 {offsets = [0, 96], sizes = [8, 32], strides = [1, 1]} : vector<8x128xf32> to vector<8x32xf32>
    %cst_315 = arith.constant 5.000000e-01 : f32
    %600 = vector.broadcast %cst_315 : f32 to vector<8x32xf32>
    %601 = arith.mulf %600, %599 : vector<8x32xf32>
    %602 = math.tanh %601 : vector<8x32xf32>
    %cst_316 = arith.constant 1.000000e+00 : f32
    %603 = vector.broadcast %cst_316 : f32 to vector<8x32xf32>
    %604 = arith.addf %602, %603 : vector<8x32xf32>
    %cst_317 = arith.constant 5.000000e-01 : f32
    %605 = vector.broadcast %cst_317 : f32 to vector<8x32xf32>
    %606 = arith.mulf %605, %604 : vector<8x32xf32>
    %607 = arith.mulf %596, %575 : vector<8x32xf32>
    %608 = arith.mulf %588, %598 : vector<8x32xf32>
    %609 = arith.addf %607, %608 : vector<8x32xf32>
    %610 = math.tanh %609 : vector<8x32xf32>
    %611 = arith.mulf %606, %610 : vector<8x32xf32>
    %c1_318 = arith.constant 1 : index
    %c0_319 = arith.constant 0 : index
    %c0_320 = arith.constant 0 : index
    %612 = vector.load %arg15[%c1_318, %c0_319, %c0_320] : memref<2x8x32xf32, #tpu.memory_space<vmem>>, vector<1x8x32xf32>
    %613 = vector.shape_cast %612 : vector<1x8x32xf32> to vector<8x32xf32>
    %614 = vector.shape_cast %611 : vector<8x32xf32> to vector<1x8x32xf32>
    tpu.vector_store %arg15[%c1_318, %c0_319, %c0_320], %614 {strides = array<i32>} : memref<2x8x32xf32, #tpu.memory_space<vmem>>, vector<1x8x32xf32>,
    %c1_321 = arith.constant 1 : index
    %c0_322 = arith.constant 0 : index
    %c0_323 = arith.constant 0 : index
    %615 = vector.load %arg16[%c1_321, %c0_322, %c0_323] : memref<2x8x32xf32, #tpu.memory_space<vmem>>, vector<1x8x32xf32>
    %616 = vector.shape_cast %615 : vector<1x8x32xf32> to vector<8x32xf32>
    %617 = vector.shape_cast %609 : vector<8x32xf32> to vector<1x8x32xf32>
    tpu.vector_store %arg16[%c1_321, %c0_322, %c0_323], %617 {strides = array<i32>} : memref<2x8x32xf32, #tpu.memory_space<vmem>>, vector<1x8x32xf32>,
    %618 = arith.index_cast %571 : i32 to index
    %c0_324 = arith.constant 0 : index
    %619 = vector.load %arg17[%618, %c0_324] : memref<64x32xf32, #tpu.memory_space<vmem>>, vector<8x32xf32>
    tpu.vector_store %arg17[%618, %c0_324], %611 {strides = array<i32>} : memref<64x32xf32, #tpu.memory_space<vmem>>, vector<8x32xf32>,
    %c4_i32_325 = arith.constant 4 : i32
    %c8_i32_326 = arith.constant 8 : i32
    %620 = arith.muli %c4_i32_325, %c8_i32_326 : i32
    %621 = tpu.assume_multiple %620, 8 : i32
    %c1_327 = arith.constant 1 : index
    %c0_328 = arith.constant 0 : index
    %c0_329 = arith.constant 0 : index
    %622 = vector.load %arg15[%c1_327, %c0_328, %c0_329] : memref<2x8x32xf32, #tpu.memory_space<vmem>>, vector<1x8x32xf32>
    %623 = vector.shape_cast %622 : vector<1x8x32xf32> to vector<8x32xf32>
    %c1_330 = arith.constant 1 : index
    %c0_331 = arith.constant 0 : index
    %c0_332 = arith.constant 0 : index
    %624 = vector.load %arg16[%c1_330, %c0_331, %c0_332] : memref<2x8x32xf32, #tpu.memory_space<vmem>>, vector<1x8x32xf32>
    %625 = vector.shape_cast %624 : vector<1x8x32xf32> to vector<8x32xf32>
    %626 = arith.index_cast %621 : i32 to index
    %c0_333 = arith.constant 0 : index
    %627 = vector.load %arg18[%626, %c0_333] : memref<64x128xf32, #tpu.memory_space<vmem>>, vector<8x128xf32>
    %628 = arith.truncf %623 : vector<8x32xf32> to vector<8x32xbf16>
    %cst_334 = arith.constant dense<0.000000e+00> : vector<8x128xf32>
    %629 = tpu.matmul %628, %419, %cst_334 {dimension_numbers = #tpu.dot_dimension_numbers<[1], [0], [0], [1], [0, 0, 1, 1], [], []>} : vector<8x32xbf16>, vector<32x128xbf16>, vector<8x128xf32> -> vector<8x128xf32>
    %630 = arith.addf %627, %629 : vector<8x128xf32>
    %631 = vector.extract_strided_slice %630 {offsets = [0, 0], sizes = [8, 32], strides = [1, 1]} : vector<8x128xf32> to vector<8x32xf32>
    %cst_335 = arith.constant 5.000000e-01 : f32
    %632 = vector.broadcast %cst_335 : f32 to vector<8x32xf32>
    %633 = arith.mulf %632, %631 : vector<8x32xf32>
    %634 = math.tanh %633 : vector<8x32xf32>
    %cst_336 = arith.constant 1.000000e+00 : f32
    %635 = vector.broadcast %cst_336 : f32 to vector<8x32xf32>
    %636 = arith.addf %634, %635 : vector<8x32xf32>
    %cst_337 = arith.constant 5.000000e-01 : f32
    %637 = vector.broadcast %cst_337 : f32 to vector<8x32xf32>
    %638 = arith.mulf %637, %636 : vector<8x32xf32>
    %639 = vector.extract_strided_slice %630 {offsets = [0, 32], sizes = [8, 32], strides = [1, 1]} : vector<8x128xf32> to vector<8x32xf32>
    %cst_338 = arith.constant 5.000000e-01 : f32
    %640 = vector.broadcast %cst_338 : f32 to vector<8x32xf32>
    %641 = arith.mulf %640, %639 : vector<8x32xf32>
    %642 = math.tanh %641 : vector<8x32xf32>
    %cst_339 = arith.constant 1.000000e+00 : f32
    %643 = vector.broadcast %cst_339 : f32 to vector<8x32xf32>
    %644 = arith.addf %642, %643 : vector<8x32xf32>
    %cst_340 = arith.constant 5.000000e-01 : f32
    %645 = vector.broadcast %cst_340 : f32 to vector<8x32xf32>
    %646 = arith.mulf %645, %644 : vector<8x32xf32>
    %647 = vector.extract_strided_slice %630 {offsets = [0, 64], sizes = [8, 32], strides = [1, 1]} : vector<8x128xf32> to vector<8x32xf32>
    %648 = math.tanh %647 : vector<8x32xf32>
    %649 = vector.extract_strided_slice %630 {offsets = [0, 96], sizes = [8, 32], strides = [1, 1]} : vector<8x128xf32> to vector<8x32xf32>
    %cst_341 = arith.constant 5.000000e-01 : f32
    %650 = vector.broadcast %cst_341 : f32 to vector<8x32xf32>
    %651 = arith.mulf %650, %649 : vector<8x32xf32>
    %652 = math.tanh %651 : vector<8x32xf32>
    %cst_342 = arith.constant 1.000000e+00 : f32
    %653 = vector.broadcast %cst_342 : f32 to vector<8x32xf32>
    %654 = arith.addf %652, %653 : vector<8x32xf32>
    %cst_343 = arith.constant 5.000000e-01 : f32
    %655 = vector.broadcast %cst_343 : f32 to vector<8x32xf32>
    %656 = arith.mulf %655, %654 : vector<8x32xf32>
    %657 = arith.mulf %646, %625 : vector<8x32xf32>
    %658 = arith.mulf %638, %648 : vector<8x32xf32>
    %659 = arith.addf %657, %658 : vector<8x32xf32>
    %660 = math.tanh %659 : vector<8x32xf32>
    %661 = arith.mulf %656, %660 : vector<8x32xf32>
    %c1_344 = arith.constant 1 : index
    %c0_345 = arith.constant 0 : index
    %c0_346 = arith.constant 0 : index
    %662 = vector.load %arg15[%c1_344, %c0_345, %c0_346] : memref<2x8x32xf32, #tpu.memory_space<vmem>>, vector<1x8x32xf32>
    %663 = vector.shape_cast %662 : vector<1x8x32xf32> to vector<8x32xf32>
    %664 = vector.shape_cast %661 : vector<8x32xf32> to vector<1x8x32xf32>
    tpu.vector_store %arg15[%c1_344, %c0_345, %c0_346], %664 {strides = array<i32>} : memref<2x8x32xf32, #tpu.memory_space<vmem>>, vector<1x8x32xf32>,
    %c1_347 = arith.constant 1 : index
    %c0_348 = arith.constant 0 : index
    %c0_349 = arith.constant 0 : index
    %665 = vector.load %arg16[%c1_347, %c0_348, %c0_349] : memref<2x8x32xf32, #tpu.memory_space<vmem>>, vector<1x8x32xf32>
    %666 = vector.shape_cast %665 : vector<1x8x32xf32> to vector<8x32xf32>
    %667 = vector.shape_cast %659 : vector<8x32xf32> to vector<1x8x32xf32>
    tpu.vector_store %arg16[%c1_347, %c0_348, %c0_349], %667 {strides = array<i32>} : memref<2x8x32xf32, #tpu.memory_space<vmem>>, vector<1x8x32xf32>,
    %668 = arith.index_cast %621 : i32 to index
    %c0_350 = arith.constant 0 : index
    %669 = vector.load %arg17[%668, %c0_350] : memref<64x32xf32, #tpu.memory_space<vmem>>, vector<8x32xf32>
    tpu.vector_store %arg17[%668, %c0_350], %661 {strides = array<i32>} : memref<64x32xf32, #tpu.memory_space<vmem>>, vector<8x32xf32>,
    %c5_i32_351 = arith.constant 5 : i32
    %c8_i32_352 = arith.constant 8 : i32
    %670 = arith.muli %c5_i32_351, %c8_i32_352 : i32
    %671 = tpu.assume_multiple %670, 8 : i32
    %c1_353 = arith.constant 1 : index
    %c0_354 = arith.constant 0 : index
    %c0_355 = arith.constant 0 : index
    %672 = vector.load %arg15[%c1_353, %c0_354, %c0_355] : memref<2x8x32xf32, #tpu.memory_space<vmem>>, vector<1x8x32xf32>
    %673 = vector.shape_cast %672 : vector<1x8x32xf32> to vector<8x32xf32>
    %c1_356 = arith.constant 1 : index
    %c0_357 = arith.constant 0 : index
    %c0_358 = arith.constant 0 : index
    %674 = vector.load %arg16[%c1_356, %c0_357, %c0_358] : memref<2x8x32xf32, #tpu.memory_space<vmem>>, vector<1x8x32xf32>
    %675 = vector.shape_cast %674 : vector<1x8x32xf32> to vector<8x32xf32>
    %676 = arith.index_cast %671 : i32 to index
    %c0_359 = arith.constant 0 : index
    %677 = vector.load %arg18[%676, %c0_359] : memref<64x128xf32, #tpu.memory_space<vmem>>, vector<8x128xf32>
    %678 = arith.truncf %673 : vector<8x32xf32> to vector<8x32xbf16>
    %cst_360 = arith.constant dense<0.000000e+00> : vector<8x128xf32>
    %679 = tpu.matmul %678, %419, %cst_360 {dimension_numbers = #tpu.dot_dimension_numbers<[1], [0], [0], [1], [0, 0, 1, 1], [], []>} : vector<8x32xbf16>, vector<32x128xbf16>, vector<8x128xf32> -> vector<8x128xf32>
    %680 = arith.addf %677, %679 : vector<8x128xf32>
    %681 = vector.extract_strided_slice %680 {offsets = [0, 0], sizes = [8, 32], strides = [1, 1]} : vector<8x128xf32> to vector<8x32xf32>
    %cst_361 = arith.constant 5.000000e-01 : f32
    %682 = vector.broadcast %cst_361 : f32 to vector<8x32xf32>
    %683 = arith.mulf %682, %681 : vector<8x32xf32>
    %684 = math.tanh %683 : vector<8x32xf32>
    %cst_362 = arith.constant 1.000000e+00 : f32
    %685 = vector.broadcast %cst_362 : f32 to vector<8x32xf32>
    %686 = arith.addf %684, %685 : vector<8x32xf32>
    %cst_363 = arith.constant 5.000000e-01 : f32
    %687 = vector.broadcast %cst_363 : f32 to vector<8x32xf32>
    %688 = arith.mulf %687, %686 : vector<8x32xf32>
    %689 = vector.extract_strided_slice %680 {offsets = [0, 32], sizes = [8, 32], strides = [1, 1]} : vector<8x128xf32> to vector<8x32xf32>
    %cst_364 = arith.constant 5.000000e-01 : f32
    %690 = vector.broadcast %cst_364 : f32 to vector<8x32xf32>
    %691 = arith.mulf %690, %689 : vector<8x32xf32>
    %692 = math.tanh %691 : vector<8x32xf32>
    %cst_365 = arith.constant 1.000000e+00 : f32
    %693 = vector.broadcast %cst_365 : f32 to vector<8x32xf32>
    %694 = arith.addf %692, %693 : vector<8x32xf32>
    %cst_366 = arith.constant 5.000000e-01 : f32
    %695 = vector.broadcast %cst_366 : f32 to vector<8x32xf32>
    %696 = arith.mulf %695, %694 : vector<8x32xf32>
    %697 = vector.extract_strided_slice %680 {offsets = [0, 64], sizes = [8, 32], strides = [1, 1]} : vector<8x128xf32> to vector<8x32xf32>
    %698 = math.tanh %697 : vector<8x32xf32>
    %699 = vector.extract_strided_slice %680 {offsets = [0, 96], sizes = [8, 32], strides = [1, 1]} : vector<8x128xf32> to vector<8x32xf32>
    %cst_367 = arith.constant 5.000000e-01 : f32
    %700 = vector.broadcast %cst_367 : f32 to vector<8x32xf32>
    %701 = arith.mulf %700, %699 : vector<8x32xf32>
    %702 = math.tanh %701 : vector<8x32xf32>
    %cst_368 = arith.constant 1.000000e+00 : f32
    %703 = vector.broadcast %cst_368 : f32 to vector<8x32xf32>
    %704 = arith.addf %702, %703 : vector<8x32xf32>
    %cst_369 = arith.constant 5.000000e-01 : f32
    %705 = vector.broadcast %cst_369 : f32 to vector<8x32xf32>
    %706 = arith.mulf %705, %704 : vector<8x32xf32>
    %707 = arith.mulf %696, %675 : vector<8x32xf32>
    %708 = arith.mulf %688, %698 : vector<8x32xf32>
    %709 = arith.addf %707, %708 : vector<8x32xf32>
    %710 = math.tanh %709 : vector<8x32xf32>
    %711 = arith.mulf %706, %710 : vector<8x32xf32>
    %c1_370 = arith.constant 1 : index
    %c0_371 = arith.constant 0 : index
    %c0_372 = arith.constant 0 : index
    %712 = vector.load %arg15[%c1_370, %c0_371, %c0_372] : memref<2x8x32xf32, #tpu.memory_space<vmem>>, vector<1x8x32xf32>
    %713 = vector.shape_cast %712 : vector<1x8x32xf32> to vector<8x32xf32>
    %714 = vector.shape_cast %711 : vector<8x32xf32> to vector<1x8x32xf32>
    tpu.vector_store %arg15[%c1_370, %c0_371, %c0_372], %714 {strides = array<i32>} : memref<2x8x32xf32, #tpu.memory_space<vmem>>, vector<1x8x32xf32>,
    %c1_373 = arith.constant 1 : index
    %c0_374 = arith.constant 0 : index
    %c0_375 = arith.constant 0 : index
    %715 = vector.load %arg16[%c1_373, %c0_374, %c0_375] : memref<2x8x32xf32, #tpu.memory_space<vmem>>, vector<1x8x32xf32>
    %716 = vector.shape_cast %715 : vector<1x8x32xf32> to vector<8x32xf32>
    %717 = vector.shape_cast %709 : vector<8x32xf32> to vector<1x8x32xf32>
    tpu.vector_store %arg16[%c1_373, %c0_374, %c0_375], %717 {strides = array<i32>} : memref<2x8x32xf32, #tpu.memory_space<vmem>>, vector<1x8x32xf32>,
    %718 = arith.index_cast %671 : i32 to index
    %c0_376 = arith.constant 0 : index
    %719 = vector.load %arg17[%718, %c0_376] : memref<64x32xf32, #tpu.memory_space<vmem>>, vector<8x32xf32>
    tpu.vector_store %arg17[%718, %c0_376], %711 {strides = array<i32>} : memref<64x32xf32, #tpu.memory_space<vmem>>, vector<8x32xf32>,
    %c6_i32_377 = arith.constant 6 : i32
    %c8_i32_378 = arith.constant 8 : i32
    %720 = arith.muli %c6_i32_377, %c8_i32_378 : i32
    %721 = tpu.assume_multiple %720, 8 : i32
    %c1_379 = arith.constant 1 : index
    %c0_380 = arith.constant 0 : index
    %c0_381 = arith.constant 0 : index
    %722 = vector.load %arg15[%c1_379, %c0_380, %c0_381] : memref<2x8x32xf32, #tpu.memory_space<vmem>>, vector<1x8x32xf32>
    %723 = vector.shape_cast %722 : vector<1x8x32xf32> to vector<8x32xf32>
    %c1_382 = arith.constant 1 : index
    %c0_383 = arith.constant 0 : index
    %c0_384 = arith.constant 0 : index
    %724 = vector.load %arg16[%c1_382, %c0_383, %c0_384] : memref<2x8x32xf32, #tpu.memory_space<vmem>>, vector<1x8x32xf32>
    %725 = vector.shape_cast %724 : vector<1x8x32xf32> to vector<8x32xf32>
    %726 = arith.index_cast %721 : i32 to index
    %c0_385 = arith.constant 0 : index
    %727 = vector.load %arg18[%726, %c0_385] : memref<64x128xf32, #tpu.memory_space<vmem>>, vector<8x128xf32>
    %728 = arith.truncf %723 : vector<8x32xf32> to vector<8x32xbf16>
    %cst_386 = arith.constant dense<0.000000e+00> : vector<8x128xf32>
    %729 = tpu.matmul %728, %419, %cst_386 {dimension_numbers = #tpu.dot_dimension_numbers<[1], [0], [0], [1], [0, 0, 1, 1], [], []>} : vector<8x32xbf16>, vector<32x128xbf16>, vector<8x128xf32> -> vector<8x128xf32>
    %730 = arith.addf %727, %729 : vector<8x128xf32>
    %731 = vector.extract_strided_slice %730 {offsets = [0, 0], sizes = [8, 32], strides = [1, 1]} : vector<8x128xf32> to vector<8x32xf32>
    %cst_387 = arith.constant 5.000000e-01 : f32
    %732 = vector.broadcast %cst_387 : f32 to vector<8x32xf32>
    %733 = arith.mulf %732, %731 : vector<8x32xf32>
    %734 = math.tanh %733 : vector<8x32xf32>
    %cst_388 = arith.constant 1.000000e+00 : f32
    %735 = vector.broadcast %cst_388 : f32 to vector<8x32xf32>
    %736 = arith.addf %734, %735 : vector<8x32xf32>
    %cst_389 = arith.constant 5.000000e-01 : f32
    %737 = vector.broadcast %cst_389 : f32 to vector<8x32xf32>
    %738 = arith.mulf %737, %736 : vector<8x32xf32>
    %739 = vector.extract_strided_slice %730 {offsets = [0, 32], sizes = [8, 32], strides = [1, 1]} : vector<8x128xf32> to vector<8x32xf32>
    %cst_390 = arith.constant 5.000000e-01 : f32
    %740 = vector.broadcast %cst_390 : f32 to vector<8x32xf32>
    %741 = arith.mulf %740, %739 : vector<8x32xf32>
    %742 = math.tanh %741 : vector<8x32xf32>
    %cst_391 = arith.constant 1.000000e+00 : f32
    %743 = vector.broadcast %cst_391 : f32 to vector<8x32xf32>
    %744 = arith.addf %742, %743 : vector<8x32xf32>
    %cst_392 = arith.constant 5.000000e-01 : f32
    %745 = vector.broadcast %cst_392 : f32 to vector<8x32xf32>
    %746 = arith.mulf %745, %744 : vector<8x32xf32>
    %747 = vector.extract_strided_slice %730 {offsets = [0, 64], sizes = [8, 32], strides = [1, 1]} : vector<8x128xf32> to vector<8x32xf32>
    %748 = math.tanh %747 : vector<8x32xf32>
    %749 = vector.extract_strided_slice %730 {offsets = [0, 96], sizes = [8, 32], strides = [1, 1]} : vector<8x128xf32> to vector<8x32xf32>
    %cst_393 = arith.constant 5.000000e-01 : f32
    %750 = vector.broadcast %cst_393 : f32 to vector<8x32xf32>
    %751 = arith.mulf %750, %749 : vector<8x32xf32>
    %752 = math.tanh %751 : vector<8x32xf32>
    %cst_394 = arith.constant 1.000000e+00 : f32
    %753 = vector.broadcast %cst_394 : f32 to vector<8x32xf32>
    %754 = arith.addf %752, %753 : vector<8x32xf32>
    %cst_395 = arith.constant 5.000000e-01 : f32
    %755 = vector.broadcast %cst_395 : f32 to vector<8x32xf32>
    %756 = arith.mulf %755, %754 : vector<8x32xf32>
    %757 = arith.mulf %746, %725 : vector<8x32xf32>
    %758 = arith.mulf %738, %748 : vector<8x32xf32>
    %759 = arith.addf %757, %758 : vector<8x32xf32>
    %760 = math.tanh %759 : vector<8x32xf32>
    %761 = arith.mulf %756, %760 : vector<8x32xf32>
    %c1_396 = arith.constant 1 : index
    %c0_397 = arith.constant 0 : index
    %c0_398 = arith.constant 0 : index
    %762 = vector.load %arg15[%c1_396, %c0_397, %c0_398] : memref<2x8x32xf32, #tpu.memory_space<vmem>>, vector<1x8x32xf32>
    %763 = vector.shape_cast %762 : vector<1x8x32xf32> to vector<8x32xf32>
    %764 = vector.shape_cast %761 : vector<8x32xf32> to vector<1x8x32xf32>
    tpu.vector_store %arg15[%c1_396, %c0_397, %c0_398], %764 {strides = array<i32>} : memref<2x8x32xf32, #tpu.memory_space<vmem>>, vector<1x8x32xf32>,
    %c1_399 = arith.constant 1 : index
    %c0_400 = arith.constant 0 : index
    %c0_401 = arith.constant 0 : index
    %765 = vector.load %arg16[%c1_399, %c0_400, %c0_401] : memref<2x8x32xf32, #tpu.memory_space<vmem>>, vector<1x8x32xf32>
    %766 = vector.shape_cast %765 : vector<1x8x32xf32> to vector<8x32xf32>
    %767 = vector.shape_cast %759 : vector<8x32xf32> to vector<1x8x32xf32>
    tpu.vector_store %arg16[%c1_399, %c0_400, %c0_401], %767 {strides = array<i32>} : memref<2x8x32xf32, #tpu.memory_space<vmem>>, vector<1x8x32xf32>,
    %768 = arith.index_cast %721 : i32 to index
    %c0_402 = arith.constant 0 : index
    %769 = vector.load %arg17[%768, %c0_402] : memref<64x32xf32, #tpu.memory_space<vmem>>, vector<8x32xf32>
    tpu.vector_store %arg17[%768, %c0_402], %761 {strides = array<i32>} : memref<64x32xf32, #tpu.memory_space<vmem>>, vector<8x32xf32>,
    %c7_i32_403 = arith.constant 7 : i32
    %c8_i32_404 = arith.constant 8 : i32
    %770 = arith.muli %c7_i32_403, %c8_i32_404 : i32
    %771 = tpu.assume_multiple %770, 8 : i32
    %c1_405 = arith.constant 1 : index
    %c0_406 = arith.constant 0 : index
    %c0_407 = arith.constant 0 : index
    %772 = vector.load %arg15[%c1_405, %c0_406, %c0_407] : memref<2x8x32xf32, #tpu.memory_space<vmem>>, vector<1x8x32xf32>
    %773 = vector.shape_cast %772 : vector<1x8x32xf32> to vector<8x32xf32>
    %c1_408 = arith.constant 1 : index
    %c0_409 = arith.constant 0 : index
    %c0_410 = arith.constant 0 : index
    %774 = vector.load %arg16[%c1_408, %c0_409, %c0_410] : memref<2x8x32xf32, #tpu.memory_space<vmem>>, vector<1x8x32xf32>
    %775 = vector.shape_cast %774 : vector<1x8x32xf32> to vector<8x32xf32>
    %776 = arith.index_cast %771 : i32 to index
    %c0_411 = arith.constant 0 : index
    %777 = vector.load %arg18[%776, %c0_411] : memref<64x128xf32, #tpu.memory_space<vmem>>, vector<8x128xf32>
    %778 = arith.truncf %773 : vector<8x32xf32> to vector<8x32xbf16>
    %cst_412 = arith.constant dense<0.000000e+00> : vector<8x128xf32>
    %779 = tpu.matmul %778, %419, %cst_412 {dimension_numbers = #tpu.dot_dimension_numbers<[1], [0], [0], [1], [0, 0, 1, 1], [], []>} : vector<8x32xbf16>, vector<32x128xbf16>, vector<8x128xf32> -> vector<8x128xf32>
    %780 = arith.addf %777, %779 : vector<8x128xf32>
    %781 = vector.extract_strided_slice %780 {offsets = [0, 0], sizes = [8, 32], strides = [1, 1]} : vector<8x128xf32> to vector<8x32xf32>
    %cst_413 = arith.constant 5.000000e-01 : f32
    %782 = vector.broadcast %cst_413 : f32 to vector<8x32xf32>
    %783 = arith.mulf %782, %781 : vector<8x32xf32>
    %784 = math.tanh %783 : vector<8x32xf32>
    %cst_414 = arith.constant 1.000000e+00 : f32
    %785 = vector.broadcast %cst_414 : f32 to vector<8x32xf32>
    %786 = arith.addf %784, %785 : vector<8x32xf32>
    %cst_415 = arith.constant 5.000000e-01 : f32
    %787 = vector.broadcast %cst_415 : f32 to vector<8x32xf32>
    %788 = arith.mulf %787, %786 : vector<8x32xf32>
    %789 = vector.extract_strided_slice %780 {offsets = [0, 32], sizes = [8, 32], strides = [1, 1]} : vector<8x128xf32> to vector<8x32xf32>
    %cst_416 = arith.constant 5.000000e-01 : f32
    %790 = vector.broadcast %cst_416 : f32 to vector<8x32xf32>
    %791 = arith.mulf %790, %789 : vector<8x32xf32>
    %792 = math.tanh %791 : vector<8x32xf32>
    %cst_417 = arith.constant 1.000000e+00 : f32
    %793 = vector.broadcast %cst_417 : f32 to vector<8x32xf32>
    %794 = arith.addf %792, %793 : vector<8x32xf32>
    %cst_418 = arith.constant 5.000000e-01 : f32
    %795 = vector.broadcast %cst_418 : f32 to vector<8x32xf32>
    %796 = arith.mulf %795, %794 : vector<8x32xf32>
    %797 = vector.extract_strided_slice %780 {offsets = [0, 64], sizes = [8, 32], strides = [1, 1]} : vector<8x128xf32> to vector<8x32xf32>
    %798 = math.tanh %797 : vector<8x32xf32>
    %799 = vector.extract_strided_slice %780 {offsets = [0, 96], sizes = [8, 32], strides = [1, 1]} : vector<8x128xf32> to vector<8x32xf32>
    %cst_419 = arith.constant 5.000000e-01 : f32
    %800 = vector.broadcast %cst_419 : f32 to vector<8x32xf32>
    %801 = arith.mulf %800, %799 : vector<8x32xf32>
    %802 = math.tanh %801 : vector<8x32xf32>
    %cst_420 = arith.constant 1.000000e+00 : f32
    %803 = vector.broadcast %cst_420 : f32 to vector<8x32xf32>
    %804 = arith.addf %802, %803 : vector<8x32xf32>
    %cst_421 = arith.constant 5.000000e-01 : f32
    %805 = vector.broadcast %cst_421 : f32 to vector<8x32xf32>
    %806 = arith.mulf %805, %804 : vector<8x32xf32>
    %807 = arith.mulf %796, %775 : vector<8x32xf32>
    %808 = arith.mulf %788, %798 : vector<8x32xf32>
    %809 = arith.addf %807, %808 : vector<8x32xf32>
    %810 = math.tanh %809 : vector<8x32xf32>
    %811 = arith.mulf %806, %810 : vector<8x32xf32>
    %c1_422 = arith.constant 1 : index
    %c0_423 = arith.constant 0 : index
    %c0_424 = arith.constant 0 : index
    %812 = vector.load %arg15[%c1_422, %c0_423, %c0_424] : memref<2x8x32xf32, #tpu.memory_space<vmem>>, vector<1x8x32xf32>
    %813 = vector.shape_cast %812 : vector<1x8x32xf32> to vector<8x32xf32>
    %814 = vector.shape_cast %811 : vector<8x32xf32> to vector<1x8x32xf32>
    tpu.vector_store %arg15[%c1_422, %c0_423, %c0_424], %814 {strides = array<i32>} : memref<2x8x32xf32, #tpu.memory_space<vmem>>, vector<1x8x32xf32>,
    %c1_425 = arith.constant 1 : index
    %c0_426 = arith.constant 0 : index
    %c0_427 = arith.constant 0 : index
    %815 = vector.load %arg16[%c1_425, %c0_426, %c0_427] : memref<2x8x32xf32, #tpu.memory_space<vmem>>, vector<1x8x32xf32>
    %816 = vector.shape_cast %815 : vector<1x8x32xf32> to vector<8x32xf32>
    %817 = vector.shape_cast %809 : vector<8x32xf32> to vector<1x8x32xf32>
    tpu.vector_store %arg16[%c1_425, %c0_426, %c0_427], %817 {strides = array<i32>} : memref<2x8x32xf32, #tpu.memory_space<vmem>>, vector<1x8x32xf32>,
    %818 = arith.index_cast %771 : i32 to index
    %c0_428 = arith.constant 0 : index
    %819 = vector.load %arg17[%818, %c0_428] : memref<64x32xf32, #tpu.memory_space<vmem>>, vector<8x32xf32>
    tpu.vector_store %arg17[%818, %c0_428], %811 {strides = array<i32>} : memref<64x32xf32, #tpu.memory_space<vmem>>, vector<8x32xf32>,
    %c8_i32_429 = arith.constant 8 : i32
    %c0_430 = arith.constant 0 : index
    %c0_431 = arith.constant 0 : index
    %820 = vector.load %arg17[%c0_430, %c0_431] : memref<64x32xf32, #tpu.memory_space<vmem>>, vector<64x32xf32>
    %821 = arith.truncf %820 : vector<64x32xf32> to vector<64x32xbf16>
    %c0_432 = arith.constant 0 : index
    %c0_433 = arith.constant 0 : index
    %822 = vector.load %arg10[%c0_432, %c0_433] : memref<32x128xbf16, #tpu.memory_space<vmem>>, vector<32x128xbf16>
    %cst_434 = arith.constant dense<0.000000e+00> : vector<64x128xf32>
    %823 = tpu.matmul %821, %822, %cst_434 {dimension_numbers = #tpu.dot_dimension_numbers<[1], [0], [0], [1], [0, 0, 1, 1], [], []>} : vector<64x32xbf16>, vector<32x128xbf16>, vector<64x128xf32> -> vector<64x128xf32>
    %c0_435 = arith.constant 0 : index
    %c0_436 = arith.constant 0 : index
    %824 = vector.load %arg11[%c0_435, %c0_436] : memref<1x128xf32, #tpu.memory_space<vmem>>, vector<1x128xf32>
    %825 = vector.broadcast %824 : vector<1x128xf32> to vector<64x128xf32>
    %826 = arith.addf %823, %825 : vector<64x128xf32>
    %c0_437 = arith.constant 0 : index
    %c0_438 = arith.constant 0 : index
    %827 = vector.load %arg12[%c0_437, %c0_438] : memref<64x128xf32, #tpu.memory_space<vmem>>, vector<64x128xf32>
    tpu.vector_store %arg12[%c0_437, %c0_438], %826 {strides = array<i32>} : memref<64x128xf32, #tpu.memory_space<vmem>>, vector<64x128xf32>,
    %c0_439 = arith.constant 0 : index
    %c0_440 = arith.constant 0 : index
    %c0_441 = arith.constant 0 : index
    %828 = vector.load %arg15[%c0_439, %c0_440, %c0_441] : memref<2x8x32xf32, #tpu.memory_space<vmem>>, vector<2x8x32xf32>
    %c0_442 = arith.constant 0 : index
    %c0_443 = arith.constant 0 : index
    %c0_444 = arith.constant 0 : index
    %829 = vector.load %arg13[%c0_442, %c0_443, %c0_444] : memref<2x8x32xf32, #tpu.memory_space<vmem>>, vector<2x8x32xf32>
    tpu.vector_store %arg13[%c0_442, %c0_443, %c0_444], %828 {strides = array<i32>} : memref<2x8x32xf32, #tpu.memory_space<vmem>>, vector<2x8x32xf32>,
    %c0_445 = arith.constant 0 : index
    %c0_446 = arith.constant 0 : index
    %c0_447 = arith.constant 0 : index
    %830 = vector.load %arg16[%c0_445, %c0_446, %c0_447] : memref<2x8x32xf32, #tpu.memory_space<vmem>>, vector<2x8x32xf32>
    %c0_448 = arith.constant 0 : index
    %c0_449 = arith.constant 0 : index
    %c0_450 = arith.constant 0 : index
    %831 = vector.load %arg14[%c0_448, %c0_449, %c0_450] : memref<2x8x32xf32, #tpu.memory_space<vmem>>, vector<2x8x32xf32>
    tpu.vector_store %arg14[%c0_448, %c0_449, %c0_450], %830 {strides = array<i32>} : memref<2x8x32xf32, #tpu.memory_space<vmem>>, vector<2x8x32xf32>,
    return
  }
  func.func @transform_0(%arg0: i32) -> (i32, i32) {
    %c0_i32 = arith.constant 0 : i32
    %c0_i32_0 = arith.constant 0 : i32
    return %arg0, %c0_i32 : i32, i32
  }
  func.func @transform_1(%arg0: i32) -> (i32, i32) {
    %c0_i32 = arith.constant 0 : i32
    %c0_i32_0 = arith.constant 0 : i32
    %c0_i32_1 = arith.constant 0 : i32
    return %c0_i32, %c0_i32_0 : i32, i32
  }
  func.func @transform_2(%arg0: i32) -> (i32, i32) {
    %c0_i32 = arith.constant 0 : i32
    %c0_i32_0 = arith.constant 0 : i32
    %c0_i32_1 = arith.constant 0 : i32
    return %c0_i32, %c0_i32_0 : i32, i32
  }
  func.func @transform_3(%arg0: i32) -> (i32, i32) {
    %c0_i32 = arith.constant 0 : i32
    %c0_i32_0 = arith.constant 0 : i32
    %c0_i32_1 = arith.constant 0 : i32
    return %c0_i32, %c0_i32_0 : i32, i32
  }
  func.func @transform_4(%arg0: i32) -> (i32, i32) {
    %c0_i32 = arith.constant 0 : i32
    %c0_i32_0 = arith.constant 0 : i32
    %c0_i32_1 = arith.constant 0 : i32
    return %c0_i32, %c0_i32_0 : i32, i32
  }
  func.func @transform_5(%arg0: i32) -> (i32, i32) {
    %c0_i32 = arith.constant 0 : i32
    %c0_i32_0 = arith.constant 0 : i32
    %c0_i32_1 = arith.constant 0 : i32
    return %c0_i32, %c0_i32_0 : i32, i32
  }
  func.func @transform_6(%arg0: i32) -> (i32, i32) {
    %c0_i32 = arith.constant 0 : i32
    %c0_i32_0 = arith.constant 0 : i32
    %c0_i32_1 = arith.constant 0 : i32
    return %c0_i32, %c0_i32_0 : i32, i32
  }
  func.func @transform_7(%arg0: i32) -> (i32, i32, i32) {
    %c0_i32 = arith.constant 0 : i32
    %c0_i32_0 = arith.constant 0 : i32
    %c0_i32_1 = arith.constant 0 : i32
    %c0_i32_2 = arith.constant 0 : i32
    return %c0_i32, %c0_i32_0, %c0_i32_1 : i32, i32, i32
  }
  func.func @transform_8(%arg0: i32) -> (i32, i32, i32) {
    %c0_i32 = arith.constant 0 : i32
    %c0_i32_0 = arith.constant 0 : i32
    %c0_i32_1 = arith.constant 0 : i32
    %c0_i32_2 = arith.constant 0 : i32
    return %c0_i32, %c0_i32_0, %c0_i32_1 : i32, i32, i32
  }
  func.func @transform_9(%arg0: i32) -> (i32, i32) {
    %c0_i32 = arith.constant 0 : i32
    %c0_i32_0 = arith.constant 0 : i32
    %c0_i32_1 = arith.constant 0 : i32
    return %c0_i32, %c0_i32_0 : i32, i32
  }
  func.func @transform_10(%arg0: i32) -> (i32, i32) {
    %c0_i32 = arith.constant 0 : i32
    %c0_i32_0 = arith.constant 0 : i32
    %c0_i32_1 = arith.constant 0 : i32
    return %c0_i32, %c0_i32_0 : i32, i32
  }
  func.func @transform_11(%arg0: i32) -> (i32, i32) {
    %c0_i32 = arith.constant 0 : i32
    %c0_i32_0 = arith.constant 0 : i32
    return %arg0, %c0_i32 : i32, i32
  }
  func.func @transform_12(%arg0: i32) -> (i32, i32, i32) {
    %c0_i32 = arith.constant 0 : i32
    %c0_i32_0 = arith.constant 0 : i32
    %c0_i32_1 = arith.constant 0 : i32
    %c0_i32_2 = arith.constant 0 : i32
    return %c0_i32, %c0_i32_0, %c0_i32_1 : i32, i32, i32
  }
  func.func @transform_13(%arg0: i32) -> (i32, i32, i32) {
    %c0_i32 = arith.constant 0 : i32
    %c0_i32_0 = arith.constant 0 : i32
    %c0_i32_1 = arith.constant 0 : i32
    %c0_i32_2 = arith.constant 0 : i32
    return %c0_i32, %c0_i32_0, %c0_i32_1 : i32, i32, i32
  }
}

</mosaic_0001>

<bundles_post_ra>
// kernel: tpu_custom_call.1
= control target key start
LH: loop header
LB: loop body
LE: loop exit
PB: predicated region body
PF: predicated region fallthrough
CT: control target
= control target key end

     0   :  { %19 = vsyncpa [#allocation7], 0  ;;  %s2322_s0 = inlined_call_operand.vmem [shape: bf16[64,16], index: 0, kind: input, shape index: {}]   ;;  %s2323_s1 = inlined_call_operand.hbm [shape: bf16[16,128], index: 1, kind: input, shape index: {}]   ;;  %s2324_s2 = inlined_call_operand.vmem [shape: bf16[32,128], index: 2, kind: input, shape index: {}]   ;;  %s2325_s3 = inlined_call_operand.vmem [shape: bf16[32,128], index: 3, kind: input, shape index: {}]   ;;  %s2326_s4 = inlined_call_operand.hbm [shape: bf16[32,128], index: 4, kind: input, shape index: {}]   ;;  %s2327_s5 = inlined_call_operand.hbm [shape: f32[1,128], index: 5, kind: input, shape index: {}]   ;;  %s2328_s6 = inlined_call_operand.hbm [shape: f32[1,128], index: 6, kind: input, shape index: {}]   ;;  %s2329_s7 = inlined_call_operand.hbm [shape: f32[2,8,32], index: 7, kind: input, shape index: {}]   ;;  %s2330_s8 = inlined_call_operand.hbm [shape: f32[2,8,32], index: 8, kind: input, shape index: {}]   ;;  %s2331_s9 = inlined_call_operand.vmem [shape: bf16[32,128], index: 9, kind: input, shape index: {}]   ;;  %s2332_s10 = inlined_call_operand.vmem [shape: f32[1,128], index: 10, kind: input, shape index: {}]   ;;  %s2333_s11 = inlined_call_operand.hbm [shape: f32[64,128], index: 11, kind: output, shape index: {0}]   ;;  %s2334_s12 = inlined_call_operand.hbm [shape: f32[2,8,32], index: 12, kind: output, shape index: {1}]   ;;  %s2335_s13 = inlined_call_operand.hbm [shape: f32[2,8,32], index: 13, kind: output, shape index: {2}]  }
   0x1   :  { %20 = vsyncpa [#allocation10], 0 }
   0x2   :  { %21 = vsyncpa [#allocation13], 0 }
   0x3   :  { %22 = vsyncpa [#allocation16], 0 }
   0x4   :  { %23 = vsyncpa [#allocation8], 0 }
   0x5   :  { %24 = vsyncpa [#allocation19], 0  ;;  %s48_s27 = sshll.u32 %s2326_s4, 4  ;;  %s1879_s28 = smov [#allocation9]   ;;  %s49_s27 = int_to_ptr.hbm [resolvable:$true] %s48_s27 }
   0x6   :  { %s50_s29 = sshll.u32 %s1879_s28, 4  ;;  %s73_s15 = sshll.u32 %s2328_s6, 4  ;;  %s51_s29 = int_to_ptr.vmem [resolvable:$true] %s50_s29  ;;  %s74_s15 = int_to_ptr.hbm [resolvable:$true] %s73_s15 }
   0x7   :  { %s1880_s16 = smov 64   ;;  %s1881_s17 = smov 4  }
   0x8   :  { %56 = dma.hbm_to_vmem [thread:$0]  %s49_s27, 256, %s51_s29, [#allocation10], %s1880_s16, %s1880_s16, %s1881_s17  }
   0x9   :  { %s1882_s18 = smov [#allocation12]   ;;  %s31_s4 = sshll.u32 %s2323_s1, 4  ;;  %s32_s4 = int_to_ptr.hbm [resolvable:$true] %s31_s4 }
   0xa   :  { %s75_s19 = sshll.u32 %s1882_s18, 4  ;;  %s62_s24 = sshll.u32 %s2327_s5, 4  ;;  %s76_s19 = int_to_ptr.vmem [resolvable:$true] %s75_s19  ;;  %s63_s24 = int_to_ptr.hbm [resolvable:$true] %s62_s24 }
   0xb   :  { %78 = dma.hbm_to_vmem [thread:$0]  %s74_s15, 16, %s76_s19, [#allocation13]  }
   0xc   :  { %s1883_s6 = smov [#allocation6]   ;;  %s1884_s26 = smov [#allocation11]  }
   0xd   :  { %s33_s25 = sshll.u32 %s1883_s6, 4  ;;  %s64_s27 = sshll.u32 %s1884_s26, 4  ;;  %s34_s25 = int_to_ptr.vmem [resolvable:$true] %s33_s25  ;;  %s65_s27 = int_to_ptr.vmem [resolvable:$true] %s64_s27 }
   0xe   :  { %39 = dma.hbm_to_vmem [thread:$0]  %s32_s4, 128, %s34_s25, [#allocation7], %s1880_s16, %s1880_s16, %s1881_s17  }
   0xf   :  { %s83_s1 = sshll.u32 %s2329_s7, 4  ;;  %s1885_s30 = smov [#allocation14]   ;;  %s84_s1 = int_to_ptr.hbm [resolvable:$true] %s83_s1 }
  0x10   :  { %67 = dma.hbm_to_vmem [thread:$0]  %s63_s24, 16, %s65_s27, [#allocation10]  }
  0x11   :  { %s85_s14 = sshll.u32 %s1885_s30, 4  ;;  %s96_s18 = sshll.u32 %s2330_s8, 4  ;;  %s86_s14 = int_to_ptr.vmem [resolvable:$true] %s85_s14  ;;  %s97_s18 = int_to_ptr.hbm [resolvable:$true] %s96_s18 }
  0x12   :  { %s1886_s19 = smov 128   ;;  %s1887_s20 = smov 8  }
  0x13   :  { %91 = dma.hbm_to_vmem [thread:$0]  %s84_s1, 256, %s86_s14, [#allocation13], %s1886_s19, %s1886_s19, %s1887_s20  }
  0x14   :  { %s1888_s17 = smov [#allocation15]  }
  0x15   :  { %s98_s21 = sshll.u32 %s1888_s17, 4  ;;  %s99_s21 = int_to_ptr.vmem [resolvable:$true] %s98_s21 }
  0x16   :  { %104 = dma.hbm_to_vmem [thread:$0]  %s97_s18, 256, %s99_s21, [#allocation16], %s1886_s19, %s1886_s19, %s1887_s20  }
  0x17   :  { %1867 = dma.done.wait [#allocation7], 128  }
  0x18   :  { %1868 = vsyncadd [#allocation7], 4294967168 }
  0x19   :  { %1869 = dma.done.wait [#allocation10], 272  }
  0x1a   :  { %1870 = vsyncadd [#allocation10], 4294967024 }
  0x1b   :  { %1871 = dma.done.wait [#allocation13], 272  }
  0x1c   :  { %1872 = vsyncadd [#allocation13], 4294967024 }
  0x1d   :  { %1873 = dma.done.wait [#allocation16], 256  }
  0x1e   :  { %1874 = vsyncadd [#allocation16], 4294967040  ;;  %vm140_vm0 = vcmask 261120   ;;  %v1525_v0 = vld [vmem:[#allocation6] sm:$0xff]  ;;  %v1995_v1 = vld [vmem:[%s2325_s3 + $0x8] sm:$0xff]  ;;  %vm187_vm1 = vcmask 130048  }
  0x1f   :  { %v1522_v2 = vld [vmem:[%s2322_s0 + $0x8] sm:$0xff]  ;;  %v1521_v3 = vld [vmem:[%s2322_s0] sm:$0xff]  ;;  %1534 = vmatpush.bf16.msra.mxu1 %v1525_v0  ;;  %207 = vmatpush.bf16.msra.mxu0 %v1525_v0  ;;  %v2027_v11 = vld [vmem:[#allocation11] ss:$0 sm:$0xff]  ;;  %s1890_s28 = smov 96   ;;  %s1403_s4 = sshll.u32 %s2334_s12, 4  ;;  %s1404_s4 = int_to_ptr.hbm [resolvable:$true] %s1403_s4 }
  0x20   :  { %v138_v4 = vld [vmem:[#allocation14] sm:$0xff]  ;;  %1535 = vmatpush.bf16.msra.mxu2 %v1525_v0  ;;  %1536 = vmatpush.bf16.msra.mxu3 %v1525_v0  ;;  %v143_v8 = vld [vmem:[#allocation15] sm:$0xff]  ;;  %s1892_s22 = smov [#allocation20]   ;;  %s1416_s25 = sshll.u32 %s2335_s13, 4  ;;  %s1417_s25 = int_to_ptr.hbm [resolvable:$true] %s1416_s25 }
  0x21   :  { %141 = vst.msk [vmem:[#allocation2] sm:$0xff] %vm140_vm0, %v138_v4  ;;  %v2008_v5 = vld [vmem:[%s2325_s3] sm:$0xff]  ;;  %s1889_s3 = smov 32   ;;  %v1523_v30 = vld [vmem:[%s2322_s0 + $0x10] sm:$0xff]  ;;  %v1524_v58 = vld [vmem:[%s2322_s0 + $0x18] sm:$0xff]  ;;  %s1414_s23 = sshll.u32 %s1892_s22, 4  ;;  %s1415_s23 = int_to_ptr.vmem [resolvable:$true] %s1414_s23 }
  0x22   :  { %1462 = vmatmul.msk.bf16.vlgmr.msra.gmra.mxu1 %vm187_vm1, %v1522_v2  ;;  %1461 = vmatmul.msk.bf16.vlgmr.msra.gmra.mxu0 %vm187_vm1, %v1521_v3  ;;  %145 = vst.msk [vmem:[#allocation3] sm:$0xff] %vm140_vm0, %v143_v8  ;;  %s1893_s12 = smov [#allocation17]  }
  0x23   :  { %267 = vmatpush.bf16.msrb.mxu1 %v1995_v1  ;;  %1463 = vmatmul.msk.bf16.vlgmr.msra.gmra.mxu2 %vm187_vm1, %v1523_v30 }
  0x24   :  { %326 = vmatpush.bf16.msrb.mxu2 %v1995_v1  ;;  %386 = vmatpush.bf16.msrb.mxu3 %v1995_v1 }
  0x25   :  { %1464 = vmatmul.msk.bf16.vlgmr.msra.gmra.mxu3 %vm187_vm1, %v1524_v58 }
  0x27   :  { %268 = vmatpush.bf16.msrb.mxu1 %v2008_v5 }
  0x28   :  { %327 = vmatpush.bf16.msrb.mxu2 %v2008_v5  ;;  %387 = vmatpush.bf16.msrb.mxu3 %v2008_v5  ;;  %v241_v6 = vld [vmem:[#allocation2] sm:$0xff] }
  0x29   :  { %v244_v7 = vpack.c.bf16 %v241_v6, %v241_v6  ;;  %v242_v18 = vld [vmem:[#allocation3] sm:$0xff] }
  0x2b   :  { %446 = vmatpush.bf16.msra.mxu1 %v1995_v1 }
  0x2c   :  { %506 = vmatpush.bf16.msra.mxu2 %v1995_v1  ;;  %566 = vmatpush.bf16.msra.mxu3 %v1995_v1 }
  0x2f   :  { %447 = vmatpush.bf16.msra.mxu1 %v2008_v5 }
  0x30   :  { %507 = vmatpush.bf16.msra.mxu2 %v2008_v5  ;;  %567 = vmatpush.bf16.msra.mxu3 %v2008_v5 }
  0x32   :  { %1473 = vmatmul.msk.bf16.vlgmr.msrb.gmra.mxu1 %vm140_vm0, %v244_v7 }
  0x33   :  { %626 = vmatpush.bf16.msrb.mxu1 %v1995_v1 }
  0x37   :  { %627 = vmatpush.bf16.msrb.mxu1 %v2008_v5 }
  0x9f   :  { %v2023_v9 = vpop.f32.mrf.mxu1  ;;  %v209_v12 = vpop.f32.mrf.mxu0 }
  0xa0   :  { %v210_v13 = vadd.f32 %v2027_v11, %v209_v12  ;;  %v215_v3 = vadd.f32 %v2027_v11, %v2023_v9 }
  0xa6   :  { %v2049_v38 = vpop.f32.mrf.mxu2 }
  0xa7   :  { %v2025_v10 = vpop.f32.mrf.mxu1  ;;  %v211_v40 = vpop.f32.mrf.mxu0 }
  0xa8   :  { %v212_v41 = vadd.f32 %v2027_v11, %v211_v40  ;;  %v2070_v2 = vpop.f32.mrf.mxu3 }
  0xae   :  { %v2051_v39 = vpop.f32.mrf.mxu2 }
  0xaf   :  { %v270_v14 = vpop.f32.mrf.mxu1 }
  0xb0   :  { %v274_v15 = vadd.f32 %v270_v14, %v210_v13 }
  0xb2   :  { %1555 = vtanh.f32 %v274_v15  ;;  %v275_v19 = vmul.f32 0.5, %v274_v15 }
  0xb4   :  { %1557 = vtanh.f32 %v275_v19 }
  0xb7   :  { %v272_v16 = vpop.f32.mrf.mxu1 }
  0xb8   :  { %v1556_v17 = vpop.eup %1555 }
  0xb9   :  { %286 = vrot.lane.b32.xlu0 %v1556_v17, %s1880_s16 }
  0xba   :  { %v1558_v20 = vpop.eup %1557 }
  0xbb   :  { %v277_v21 = vadd.f32 1.0, %v1558_v20 }
  0xbd   :  { %v278_v22 = vmul.f32 0.5, %v277_v21 }
  0xc1   :  { %281 = vrot.lane.b32.xlu0 %v242_v18, %s1889_s3 }
 0x12b   :  { %v287_v23 = vpop.permute.xlu0 %286 }
 0x12c   :  { %v289_v24 = vmul.f32 %v287_v23, %v278_v22 }
 0x12e   :  { %291 = vrot.lane.b32.xlu1 %v289_v24, %s1889_s3 }
 0x133   :  { %v282_v25 = vpop.permute.xlu0 %281 }
 0x134   :  { %v284_v26 = vmul.f32 %v282_v25, %v278_v22 }
 0x1a0   :  { %v292_v27 = vpop.permute.xlu1 %291 }
 0x1a1   :  { %v294_v28 = vadd.f32 %v292_v27, %v284_v26 }
 0x1a3   :  { %1559 = vtanh.f32 %v294_v28 }
 0x1a9   :  { %v1560_v29 = vpop.eup %1559 }
 0x1aa   :  { %297 = vrot.lane.b32.xlu1 %v1560_v29, %s1880_s16 }
 0x21c   :  { %v298_v31 = vpop.permute.xlu1 %297 }
 0x21d   :  { %v300_v32 = vmul.f32 %v298_v31, %v278_v22 }
 0x21f   :  { %302 = vrot.lane.b32.xlu2 %v300_v32, %s1889_s3 }
 0x227   :  { %307 = vrot.lane.b32.xlu2 %v294_v28, %s1890_s28  ;;  %v217_v28 = vadd.f32 %v2027_v11, %v2025_v10 }
 0x279   :  { %v303_v33 = vpop.permute.xlu2 %302 }
 0x27a   :  { %305 = vst.msk [vmem:[#allocation2] sm:$0xff] %vm140_vm0, %v303_v33 }
 0x27b   :  { %311 = vst.msk [vmem:[#allocation4] sm:$0xff] %vm140_vm0, %v303_v33 }
 0x281   :  { %v308_v34 = vpop.permute.xlu2 %307  ;;  %v312_v35 = vld [vmem:[#allocation2] sm:$0xff] }
 0x282   :  { %310 = vst.msk [vmem:[#allocation3] sm:$0xff] %vm140_vm0, %v308_v34  ;;  %v316_v36 = vpack.c.bf16 %v312_v35, %v312_v35 }
 0x284   :  { %1474 = vmatmul.msk.bf16.vlgmr.msrb.gmra.mxu2 %vm140_vm0, %v316_v36 }
 0x285   :  { %686 = vmatpush.bf16.msrb.mxu2 %v1995_v1  ;;  %v2072_v1 = vpop.f32.mrf.mxu3 }
 0x289   :  { %v313_v37 = vld [vmem:[#allocation3] sm:$0xff]  ;;  %687 = vmatpush.bf16.msrb.mxu2 %v2008_v5 }
 0x28a   :  { %340 = vrot.lane.b32.xlu1 %v313_v37, %s1889_s3 }
 0x2fc   :  { %v341_v52 = vpop.permute.xlu1 %340 }
 0x307   :  { %v329_v42 = vpop.f32.mrf.mxu2 }
 0x308   :  { %v333_v43 = vadd.f32 %v329_v42, %v212_v41 }
 0x30a   :  { %1561 = vtanh.f32 %v333_v43  ;;  %v334_v46 = vmul.f32 0.5, %v333_v43 }
 0x30c   :  { %1563 = vtanh.f32 %v334_v46 }
 0x30f   :  { %v331_v44 = vpop.f32.mrf.mxu2 }
 0x310   :  { %v1562_v45 = vpop.eup %1561 }
 0x311   :  { %345 = vrot.lane.b32.xlu0 %v1562_v45, %s1880_s16 }
 0x312   :  { %v1564_v47 = vpop.eup %1563 }
 0x313   :  { %v336_v48 = vadd.f32 1.0, %v1564_v47 }
 0x315   :  { %v337_v49 = vmul.f32 0.5, %v336_v48 }
 0x317   :  { %v343_v53 = vmul.f32 %v341_v52, %v337_v49  ;;  %v220_v52 = vadd.f32 %v2027_v11, %v2049_v38 }
 0x383   :  { %v346_v50 = vpop.permute.xlu0 %345 }
 0x384   :  { %v348_v51 = vmul.f32 %v346_v50, %v337_v49 }
 0x386   :  { %350 = vrot.lane.b32.xlu2 %v348_v51, %s1889_s3 }
 0x3e0   :  { %v351_v54 = vpop.permute.xlu2 %350 }
 0x3e1   :  { %v353_v55 = vadd.f32 %v351_v54, %v343_v53 }
 0x3e3   :  { %1565 = vtanh.f32 %v353_v55  ;;  %366 = vrot.lane.b32.xlu2 %v353_v55, %s1890_s28 }
 0x3e9   :  { %v1566_v56 = vpop.eup %1565 }
 0x3ea   :  { %356 = vrot.lane.b32.xlu0 %v1566_v56, %s1880_s16 }
 0x43d   :  { %v367_v57 = vpop.permute.xlu2 %366 }
 0x43e   :  { %369 = vst.msk [vmem:[#allocation3] sm:$0xff] %vm140_vm0, %v367_v57 }
 0x445   :  { %v373_v61 = vld [vmem:[#allocation3] sm:$0xff] }
 0x45c   :  { %v357_v59 = vpop.permute.xlu0 %356 }
 0x45d   :  { %v359_v60 = vmul.f32 %v357_v59, %v337_v49 }
 0x45f   :  { %361 = vrot.lane.b32.xlu1 %v359_v60, %s1889_s3 }
 0x467   :  { %400 = vrot.lane.b32.xlu1 %v373_v61, %s1889_s3 }
 0x4d1   :  { %v362_v62 = vpop.permute.xlu1 %361 }
 0x4d2   :  { %364 = vst.msk [vmem:[#allocation2] sm:$0xff] %vm140_vm0, %v362_v62 }
 0x4d3   :  { %371 = vst.msk [vmem:[#allocation4 + $0x8] sm:$0xff] %vm140_vm0, %v362_v62 }
 0x4d9   :  { %v372_v63 = vld [vmem:[#allocation2] sm:$0xff]  ;;  %v401_v17 = vpop.permute.xlu1 %400 }
 0x4da   :  { %v376_v0 = vpack.c.bf16 %v372_v63, %v372_v63 }
 0x4dc   :  { %1475 = vmatmul.msk.bf16.vlgmr.msrb.gmra.mxu3 %vm140_vm0, %v376_v0 }
 0x55f   :  { %v389_v4 = vpop.f32.mrf.mxu3 }
 0x560   :  { %v393_v5 = vadd.f32 %v389_v4, %v215_v3 }
 0x562   :  { %1567 = vtanh.f32 %v393_v5  ;;  %v394_v8 = vmul.f32 0.5, %v393_v5 }
 0x564   :  { %1569 = vtanh.f32 %v394_v8 }
 0x567   :  { %v391_v6 = vpop.f32.mrf.mxu3 }
 0x568   :  { %v1568_v7 = vpop.eup %1567 }
 0x569   :  { %405 = vrot.lane.b32.xlu0 %v1568_v7, %s1880_s16 }
 0x56a   :  { %v1570_v12 = vpop.eup %1569 }
 0x56b   :  { %v396_v13 = vadd.f32 1.0, %v1570_v12  ;;  %v1529_v12 = vld [vmem:[%s2324_s2 + $0x8] sm:$0xff] }
 0x56c   :  { %782 = vmatpush.bf16.msrb.mxu3 %v1529_v12 }
 0x56d   :  { %v397_v14 = vmul.f32 0.5, %v396_v13  ;;  %v1528_v13 = vld [vmem:[%s2324_s2] sm:$0xff] }
 0x56f   :  { %v403_v18 = vmul.f32 %v401_v17, %v397_v14  ;;  %v733_v17 = vld [vmem:[#allocation4 + $0x8] sm:$0xff] }
 0x570   :  { %783 = vmatpush.bf16.msrb.mxu3 %v1528_v13 }
 0x5db   :  { %v406_v15 = vpop.permute.xlu0 %405 }
 0x5dc   :  { %v408_v16 = vmul.f32 %v406_v15, %v397_v14 }
 0x5de   :  { %410 = vrot.lane.b32.xlu2 %v408_v16, %s1889_s3 }
 0x638   :  { %v411_v19 = vpop.permute.xlu2 %410 }
 0x639   :  { %v413_v9 = vadd.f32 %v411_v19, %v403_v18  ;;  %v732_v18 = vld [vmem:[#allocation4] sm:$0xff] }
 0x63a   :  { %v740_v19 = vpack.c.bf16 %v733_v17, %v732_v18 }
 0x63b   :  { %1571 = vtanh.f32 %v413_v9  ;;  %426 = vrot.lane.b32.xlu2 %v413_v9, %s1890_s28 }
 0x641   :  { %v1572_v20 = vpop.eup %1571 }
 0x642   :  { %416 = vrot.lane.b32.xlu0 %v1572_v20, %s1880_s16 }
 0x695   :  { %v427_v21 = vpop.permute.xlu2 %426 }
 0x696   :  { %429 = vst.msk [vmem:[#allocation3] sm:$0xff] %vm140_vm0, %v427_v21 }
 0x69d   :  { %v433_v24 = vld [vmem:[#allocation3] sm:$0xff] }
 0x6b4   :  { %v417_v22 = vpop.permute.xlu0 %416 }
 0x6b5   :  { %v419_v23 = vmul.f32 %v417_v22, %v397_v14  ;;  %v222_v22 = vadd.f32 %v2027_v11, %v2051_v39 }
 0x6b7   :  { %421 = vrot.lane.b32.xlu1 %v419_v23, %s1889_s3 }
 0x6bf   :  { %460 = vrot.lane.b32.xlu1 %v433_v24, %s1889_s3 }
 0x729   :  { %v422_v25 = vpop.permute.xlu1 %421 }
 0x72a   :  { %424 = vst.msk [vmem:[#allocation2] sm:$0xff] %vm140_vm0, %v422_v25 }
 0x72b   :  { %431 = vst.msk [vmem:[#allocation4 + $0x10] sm:$0xff] %vm140_vm0, %v422_v25 }
 0x731   :  { %v432_v26 = vld [vmem:[#allocation2] sm:$0xff]  ;;  %v461_v41 = vpop.permute.xlu1 %460 }
 0x732   :  { %v436_v27 = vpack.c.bf16 %v432_v26, %v432_v26  ;;  %v734_v20 = vld [vmem:[#allocation4 + $0x10] sm:$0xff] }
 0x734   :  { %1476 = vmatmul.msk.bf16.vlgmr.msra.gmra.mxu1 %vm140_vm0, %v436_v27 }
 0x7b1   :  { %v449_v29 = vpop.f32.mrf.mxu1 }
 0x7b2   :  { %v453_v30 = vadd.f32 %v449_v29, %v217_v28 }
 0x7b4   :  { %1573 = vtanh.f32 %v453_v30  ;;  %v454_v33 = vmul.f32 0.5, %v453_v30 }
 0x7b6   :  { %1575 = vtanh.f32 %v454_v33 }
 0x7b9   :  { %v451_v31 = vpop.f32.mrf.mxu1 }
 0x7ba   :  { %v1574_v32 = vpop.eup %1573 }
 0x7bb   :  { %465 = vrot.lane.b32.xlu0 %v1574_v32, %s1880_s16 }
 0x7bc   :  { %v1576_v34 = vpop.eup %1575 }
 0x7bd   :  { %v456_v35 = vadd.f32 1.0, %v1576_v34 }
 0x7bf   :  { %v457_v36 = vmul.f32 0.5, %v456_v35 }
 0x7c1   :  { %v463_v42 = vmul.f32 %v461_v41, %v457_v36 }
 0x82d   :  { %v466_v37 = vpop.permute.xlu0 %465 }
 0x82e   :  { %v468_v40 = vmul.f32 %v466_v37, %v457_v36 }
 0x830   :  { %470 = vrot.lane.b32.xlu2 %v468_v40, %s1889_s3 }
 0x88a   :  { %v471_v43 = vpop.permute.xlu2 %470 }
 0x88b   :  { %v473_v10 = vadd.f32 %v471_v43, %v463_v42  ;;  %v2127_v43 = vld [vmem:[#allocation9 + $0x8] sm:$0xff] }
 0x88c   :  { %844 = vmatpush.bf16.msra.mxu1 %v2127_v43  ;;  %960 = vmatpush.bf16.msrb.mxu0 %v2127_v43 }
 0x88d   :  { %1577 = vtanh.f32 %v473_v10  ;;  %486 = vrot.lane.b32.xlu2 %v473_v10, %s1890_s28  ;;  %v139_v10 = vld [vmem:[#allocation14 + $0x8] sm:$0xff] }
 0x88e   :  { %142 = vst.msk [vmem:[#allocation2 + $0x8] sm:$0xff] %vm140_vm0, %v139_v10 }
 0x893   :  { %v1578_v44 = vpop.eup %1577 }
 0x894   :  { %476 = vrot.lane.b32.xlu0 %v1578_v44, %s1880_s16  ;;  %v2131_v44 = vld [vmem:[#allocation9] sm:$0xff] }
 0x895   :  { %845 = vmatpush.bf16.msra.mxu1 %v2131_v44  ;;  %961 = vmatpush.bf16.msrb.mxu0 %v2131_v44 }
 0x899   :  { %1134 = vmatpush.bf16.msra.mxu0 %v2127_v43 }
 0x89d   :  { %1135 = vmatpush.bf16.msra.mxu0 %v2131_v44 }
 0x8e7   :  { %v487_v45 = vpop.permute.xlu2 %486 }
 0x8e8   :  { %489 = vst.msk [vmem:[#allocation3] sm:$0xff] %vm140_vm0, %v487_v45 }
 0x8ef   :  { %v493_v48 = vld [vmem:[#allocation3] sm:$0xff] }
 0x906   :  { %v477_v46 = vpop.permute.xlu0 %476 }
 0x907   :  { %v479_v47 = vmul.f32 %v477_v46, %v457_v36 }
 0x909   :  { %481 = vrot.lane.b32.xlu1 %v479_v47, %s1889_s3 }
 0x911   :  { %520 = vrot.lane.b32.xlu1 %v493_v48, %s1889_s3 }
 0x97b   :  { %v482_v49 = vpop.permute.xlu1 %481 }
 0x97c   :  { %484 = vst.msk [vmem:[#allocation2] sm:$0xff] %vm140_vm0, %v482_v49 }
 0x97d   :  { %491 = vst.msk [vmem:[#allocation4 + $0x18] sm:$0xff] %vm140_vm0, %v482_v49 }
 0x983   :  { %v492_v50 = vld [vmem:[#allocation2] sm:$0xff]  ;;  %v521_v63 = vpop.permute.xlu1 %520 }
 0x984   :  { %v496_v51 = vpack.c.bf16 %v492_v50, %v492_v50  ;;  %v735_v9 = vld [vmem:[#allocation4 + $0x18] sm:$0xff] }
 0x985   :  { %v741_v21 = vpack.c.bf16 %v735_v9, %v734_v20 }
 0x986   :  { %1477 = vmatmul.msk.bf16.vlgmr.msra.gmra.mxu2 %vm140_vm0, %v496_v51  ;;  %v818_v51 = vld [vmem:[#allocation2 + $0x8] sm:$0xff] }
 0x987   :  { %902 = vmatpush.bf16.msra.mxu2 %v2127_v43 }
 0x98b   :  { %903 = vmatpush.bf16.msra.mxu2 %v2131_v44 }
 0xa09   :  { %v509_v53 = vpop.f32.mrf.mxu2 }
 0xa0a   :  { %v513_v54 = vadd.f32 %v509_v53, %v220_v52  ;;  %v822_v52 = vpack.c.bf16 %v818_v51, %v818_v51  ;;  %v144_v53 = vld [vmem:[#allocation15 + $0x8] sm:$0xff] }
 0xa0b   :  { %146 = vst.msk [vmem:[#allocation3 + $0x8] sm:$0xff] %vm140_vm0, %v144_v53 }
 0xa0c   :  { %1579 = vtanh.f32 %v513_v54  ;;  %v514_v57 = vmul.f32 0.5, %v513_v54  ;;  %v225_v54 = vadd.f32 %v2027_v11, %v2070_v2 }
 0xa0e   :  { %1581 = vtanh.f32 %v514_v57 }
 0xa11   :  { %v511_v55 = vpop.f32.mrf.mxu2 }
 0xa12   :  { %v1580_v56 = vpop.eup %1579  ;;  %v820_v2 = vld [vmem:[#allocation3 + $0x8] sm:$0xff] }
 0xa13   :  { %525 = vrot.lane.b32.xlu0 %v1580_v56, %s1880_s16 }
 0xa14   :  { %v1582_v58 = vpop.eup %1581 }
 0xa15   :  { %v516_v59 = vadd.f32 1.0, %v1582_v58 }
 0xa17   :  { %v517_v60 = vmul.f32 0.5, %v516_v59  ;;  %v2153_v59 = vld [vmem:[#allocation12] ss:$0 sm:$0xff] }
 0xa19   :  { %v523_v0 = vmul.f32 %v521_v63, %v517_v60 }
 0xa85   :  { %v526_v61 = vpop.permute.xlu0 %525 }
 0xa86   :  { %v528_v62 = vmul.f32 %v526_v61, %v517_v60 }
 0xa88   :  { %530 = vrot.lane.b32.xlu2 %v528_v62, %s1889_s3 }
 0xae2   :  { %v531_v3 = vpop.permute.xlu2 %530 }
 0xae3   :  { %v533_v38 = vadd.f32 %v531_v3, %v523_v0 }
 0xae5   :  { %1583 = vtanh.f32 %v533_v38  ;;  %546 = vrot.lane.b32.xlu2 %v533_v38, %s1890_s28 }
 0xaeb   :  { %v1584_v4 = vpop.eup %1583 }
 0xaec   :  { %536 = vrot.lane.b32.xlu0 %v1584_v4, %s1880_s16 }
 0xb3f   :  { %v547_v5 = vpop.permute.xlu2 %546 }
 0xb40   :  { %549 = vst.msk [vmem:[#allocation3] sm:$0xff] %vm140_vm0, %v547_v5 }
 0xb47   :  { %v553_v8 = vld [vmem:[#allocation3] sm:$0xff] }
 0xb5e   :  { %v537_v6 = vpop.permute.xlu0 %536 }
 0xb5f   :  { %v539_v7 = vmul.f32 %v537_v6, %v517_v60 }
 0xb61   :  { %541 = vrot.lane.b32.xlu1 %v539_v7, %s1889_s3 }
 0xb69   :  { %580 = vrot.lane.b32.xlu1 %v553_v8, %s1889_s3 }
 0xbd3   :  { %v542_v14 = vpop.permute.xlu1 %541 }
 0xbd4   :  { %544 = vst.msk [vmem:[#allocation2] sm:$0xff] %vm140_vm0, %v542_v14 }
 0xbd5   :  { %551 = vst.msk [vmem:[#allocation4 + $0x20] sm:$0xff] %vm140_vm0, %v542_v14 }
 0xbdb   :  { %v552_v15 = vld [vmem:[#allocation2] sm:$0xff]  ;;  %v581_v33 = vpop.permute.xlu1 %580 }
 0xbdc   :  { %v556_v16 = vpack.c.bf16 %v552_v15, %v552_v15  ;;  %v736_v48 = vld [vmem:[#allocation4 + $0x20] sm:$0xff] }
 0xbde   :  { %1478 = vmatmul.msk.bf16.vlgmr.msra.gmra.mxu3 %vm140_vm0, %v556_v16 }
 0xbee   :  { %1489 = vmatmul.msk.bf16.vlgmr.msrb.gmra.mxu3 %vm140_vm0, %v740_v19 }
 0xbfe   :  { %1490 = vmatmul.msk.bf16.gmra.mxu3 %vm140_vm0, %v741_v21 }
 0xc61   :  { %v569_v23 = vpop.f32.mrf.mxu3 }
 0xc62   :  { %v573_v24 = vadd.f32 %v569_v23, %v222_v22 }
 0xc64   :  { %1585 = vtanh.f32 %v573_v24  ;;  %v574_v27 = vmul.f32 0.5, %v573_v24 }
 0xc66   :  { %1587 = vtanh.f32 %v574_v27 }
 0xc69   :  { %v571_v25 = vpop.f32.mrf.mxu3 }
 0xc6a   :  { %v1586_v26 = vpop.eup %1585 }
 0xc6b   :  { %585 = vrot.lane.b32.xlu0 %v1586_v26, %s1880_s16 }
 0xc6c   :  { %v1588_v28 = vpop.eup %1587 }
 0xc6d   :  { %v576_v29 = vadd.f32 1.0, %v1588_v28 }
 0xc6f   :  { %v577_v30 = vmul.f32 0.5, %v576_v29 }
 0xc71   :  { %v583_v34 = vmul.f32 %v581_v33, %v577_v30  ;;  %v785_v60 = vpop.f32.mrf.mxu3 }
 0xc72   :  { %v786_v61 = vadd.f32 %v2153_v59, %v785_v60 }
 0xcdd   :  { %v586_v31 = vpop.permute.xlu0 %585 }
 0xcde   :  { %v588_v32 = vmul.f32 %v586_v31, %v577_v30 }
 0xce0   :  { %590 = vrot.lane.b32.xlu2 %v588_v32, %s1889_s3 }
 0xd3a   :  { %v591_v35 = vpop.permute.xlu2 %590 }
 0xd3b   :  { %v593_v39 = vadd.f32 %v591_v35, %v583_v34 }
 0xd3d   :  { %1589 = vtanh.f32 %v593_v39  ;;  %606 = vrot.lane.b32.xlu2 %v593_v39, %s1890_s28 }
 0xd43   :  { %v1590_v36 = vpop.eup %1589 }
 0xd44   :  { %596 = vrot.lane.b32.xlu0 %v1590_v36, %s1880_s16 }
 0xd97   :  { %v607_v37 = vpop.permute.xlu2 %606 }
 0xd98   :  { %609 = vst.msk [vmem:[#allocation3] sm:$0xff] %vm140_vm0, %v607_v37 }
 0xd9f   :  { %v613_v40 = vld [vmem:[#allocation3] sm:$0xff] }
 0xda0   :  { %640 = vrot.lane.b32.xlu2 %v613_v40, %s1889_s3 }
 0xdb6   :  { %v597_v41 = vpop.permute.xlu0 %596 }
 0xdb7   :  { %v599_v42 = vmul.f32 %v597_v41, %v577_v30 }
 0xdb9   :  { %601 = vrot.lane.b32.xlu1 %v599_v42, %s1889_s3  ;;  %v787_v42 = vpop.f32.mrf.mxu3 }
 0xdba   :  { %v788_v10 = vadd.f32 %v2153_v59, %v787_v42 }
 0xdfa   :  { %v641_v18 = vpop.permute.xlu2 %640 }
 0xe2b   :  { %v602_v45 = vpop.permute.xlu1 %601 }
 0xe2c   :  { %604 = vst.msk [vmem:[#allocation2] sm:$0xff] %vm140_vm0, %v602_v45 }
 0xe2d   :  { %611 = vst.msk [vmem:[#allocation4 + $0x28] sm:$0xff] %vm140_vm0, %v602_v45 }
 0xe33   :  { %v612_v46 = vld [vmem:[#allocation2] sm:$0xff] }
 0xe34   :  { %v616_v47 = vpack.c.bf16 %v612_v46, %v612_v46  ;;  %v737_v49 = vld [vmem:[#allocation4 + $0x28] sm:$0xff] }
 0xe35   :  { %v742_v50 = vpack.c.bf16 %v737_v49, %v736_v48 }
 0xe36   :  { %1479 = vmatmul.msk.bf16.vlgmr.msrb.gmra.mxu1 %vm140_vm0, %v616_v47 }
 0xe37   :  { %1491 = vmatmul.msk.bf16.gmra.mxu3 %vm140_vm0, %v742_v50  ;;  %1018 = vmatpush.bf16.msrb.mxu1 %v2127_v43 }
 0xe3b   :  { %1019 = vmatpush.bf16.msrb.mxu1 %v2131_v44 }
 0xe46   :  { %1501 = vmatmul.msk.bf16.vlgmr.msra.gmra.mxu1 %vm140_vm0, %v822_v52 }
 0xe47   :  { %1192 = vmatpush.bf16.msra.mxu1 %v2127_v43 }
 0xe4b   :  { %1193 = vmatpush.bf16.msra.mxu1 %v2131_v44 }
 0xeb3   :  { %v629_v55 = vpop.f32.mrf.mxu1 }
 0xeb4   :  { %v633_v56 = vadd.f32 %v629_v55, %v225_v54 }
 0xeb6   :  { %1591 = vtanh.f32 %v633_v56  ;;  %v634_v38 = vmul.f32 0.5, %v633_v56 }
 0xebb   :  { %v631_v57 = vpop.f32.mrf.mxu1 }
 0xebc   :  { %v1592_v58 = vpop.eup %1591 }
 0xebd   :  { %645 = vrot.lane.b32.xlu0 %v1592_v58, %s1880_s16 }
 0xec3   :  { %v847_v62 = vpop.f32.mrf.mxu1 }
 0xec4   :  { %v851_v63 = vadd.f32 %v847_v62, %v786_v61 }
 0xec6   :  { %1593 = vtanh.f32 %v851_v63  ;;  %v852_v6 = vmul.f32 0.5, %v851_v63 }
 0xec7   :  { %1595 = vtanh.f32 %v634_v38 }
 0xec8   :  { %1597 = vtanh.f32 %v852_v6 }
 0xecb   :  { %v849_v0 = vpop.f32.mrf.mxu1 }
 0xecc   :  { %v1594_v3 = vpop.eup %1593 }
 0xecd   :  { %863 = vrot.lane.b32.xlu1 %v1594_v3, %s1880_s16  ;;  %v1596_v4 = vpop.eup %1595 }
 0xece   :  { %v636_v5 = vadd.f32 1.0, %v1596_v4  ;;  %v1598_v13 = vpop.eup %1597 }
 0xecf   :  { %v854_v14 = vadd.f32 1.0, %v1598_v13 }
 0xed0   :  { %v637_v7 = vmul.f32 0.5, %v636_v5 }
 0xed1   :  { %v855_v15 = vmul.f32 0.5, %v854_v14 }
 0xed2   :  { %v643_v22 = vmul.f32 %v641_v18, %v637_v7 }
 0xed5   :  { %858 = vrot.lane.b32.xlu1 %v820_v2, %s1889_s3  ;;  %v790_v2 = vpop.f32.mrf.mxu3 }
 0xed6   :  { %v791_v38 = vadd.f32 %v2153_v59, %v790_v2 }
 0xf2f   :  { %v646_v8 = vpop.permute.xlu0 %645 }
 0xf30   :  { %v648_v12 = vmul.f32 %v646_v8, %v637_v7 }
 0xf32   :  { %650 = vrot.lane.b32.xlu0 %v648_v12, %s1889_s3 }
 0xf3f   :  { %v864_v16 = vpop.permute.xlu1 %863 }
 0xf40   :  { %v866_v17 = vmul.f32 %v864_v16, %v855_v15 }
 0xf42   :  { %868 = vrot.lane.b32.xlu2 %v866_v17, %s1889_s3 }
 0xf47   :  { %v859_v19 = vpop.permute.xlu1 %858 }
 0xf48   :  { %v861_v9 = vmul.f32 %v859_v19, %v855_v15 }
 0xf9c   :  { %v869_v20 = vpop.permute.xlu2 %868 }
 0xf9d   :  { %v871_v21 = vadd.f32 %v869_v20, %v861_v9 }
 0xf9f   :  { %1599 = vtanh.f32 %v871_v21 }
 0xfa4   :  { %v651_v23 = vpop.permute.xlu0 %650 }
 0xfa5   :  { %v1600_v24 = vpop.eup %1599  ;;  %v2160_v25 = vadd.f32 %v651_v23, %v643_v22 }
 0xfa6   :  { %874 = vrot.lane.b32.xlu1 %v1600_v24, %s1880_s16 }
 0xfa7   :  { %1601 = vtanh.f32 %v2160_v25 }
 0xfad   :  { %v1602_v26 = vpop.eup %1601 }
 0xfae   :  { %656 = vrot.lane.b32.xlu0 %v1602_v26, %s1880_s16  ;;  %884 = vrot.lane.b32.xlu1 %v871_v21, %s1890_s28 }
0x1018   :  { %v875_v27 = vpop.permute.xlu1 %874 }
0x1019   :  { %v877_v28 = vmul.f32 %v875_v27, %v855_v15 }
0x101b   :  { %879 = vrot.lane.b32.xlu0 %v877_v28, %s1889_s3 }
0x1020   :  { %v657_v29 = vpop.permute.xlu0 %656  ;;  %v885_v30 = vpop.permute.xlu1 %884 }
0x1021   :  { %v659_v31 = vmul.f32 %v657_v29, %v637_v7  ;;  %887 = vst.msk [vmem:[#allocation3 + $0x8] sm:$0xff] %vm140_vm0, %v885_v30  ;;  %v792_v29 = vpop.f32.mrf.mxu3 }
0x1022   :  { %v793_v30 = vadd.f32 %v2153_v59, %v792_v29 }
0x1023   :  { %661 = vrot.lane.b32.xlu2 %v659_v31, %s1889_s3 }
0x1028   :  { %v890_v32 = vld [vmem:[#allocation3 + $0x8] sm:$0xff] }
0x1029   :  { %916 = vrot.lane.b32.xlu0 %v890_v32, %s1889_s3 }
0x107d   :  { %v662_v33 = vpop.permute.xlu2 %661 }
0x107e   :  { %664 = vst.msk [vmem:[#allocation2] sm:$0xff] %vm140_vm0, %v662_v33 }
0x107f   :  { %671 = vst.msk [vmem:[#allocation4 + $0x30] sm:$0xff] %vm140_vm0, %v662_v33 }
0x1085   :  { %v672_v34 = vld [vmem:[#allocation2] sm:$0xff] }
0x1086   :  { %v676_v35 = vpack.c.bf16 %v672_v34, %v672_v34 }
0x1088   :  { %1480 = vmatmul.msk.bf16.vlgmr.msrb.gmra.mxu2 %vm140_vm0, %v676_v35 }
0x1089   :  { %1076 = vmatpush.bf16.msrb.mxu2 %v2127_v43 }
0x108d   :  { %v880_v39 = vpop.permute.xlu0 %879  ;;  %1077 = vmatpush.bf16.msrb.mxu2 %v2131_v44 }
0x108e   :  { %882 = vst.msk [vmem:[#allocation2 + $0x8] sm:$0xff] %vm140_vm0, %v880_v39 }
0x108f   :  { %888 = vst.msk [vmem:[#allocation4] sm:$0xff] %vm140_vm0, %v880_v39 }
0x1095   :  { %v889_v36 = vld [vmem:[#allocation2 + $0x8] sm:$0xff] }
0x1096   :  { %v892_v37 = vpack.c.bf16 %v889_v36, %v889_v36 }
0x1098   :  { %1502 = vmatmul.msk.bf16.vlgmr.msra.gmra.mxu2 %vm140_vm0, %v892_v37 }
0x1099   :  { %1250 = vmatpush.bf16.msra.mxu2 %v2127_v43 }
0x109b   :  { %v917_v53 = vpop.permute.xlu0 %916 }
0x109d   :  { %1251 = vmatpush.bf16.msra.mxu2 %v2131_v44 }
0x110b   :  { %v2180_v40 = vpop.f32.mrf.mxu2 }
0x1113   :  { %v691_v41 = vpop.f32.mrf.mxu2 }
0x111b   :  { %v905_v45 = vpop.f32.mrf.mxu2 }
0x111c   :  { %v909_v46 = vadd.f32 %v905_v45, %v788_v10 }
0x111e   :  { %1603 = vtanh.f32 %v909_v46  ;;  %v910_v49 = vmul.f32 0.5, %v909_v46 }
0x1120   :  { %1605 = vtanh.f32 %v910_v49 }
0x1123   :  { %v907_v47 = vpop.f32.mrf.mxu2 }
0x1124   :  { %v1604_v48 = vpop.eup %1603 }
0x1125   :  { %921 = vrot.lane.b32.xlu2 %v1604_v48, %s1880_s16 }
0x1126   :  { %v1606_v50 = vpop.eup %1605 }
0x1127   :  { %v912_v51 = vadd.f32 1.0, %v1606_v50 }
0x1129   :  { %v913_v43 = vmul.f32 0.5, %v912_v51 }
0x112b   :  { %v919_v54 = vmul.f32 %v917_v53, %v913_v43 }
0x117f   :  { %v922_v52 = vpop.permute.xlu2 %921 }
0x1180   :  { %v924_v44 = vmul.f32 %v922_v52, %v913_v43 }
0x1182   :  { %926 = vrot.lane.b32.xlu1 %v924_v44, %s1889_s3 }
0x11f4   :  { %v927_v55 = vpop.permute.xlu1 %926 }
0x11f5   :  { %v929_v56 = vadd.f32 %v927_v55, %v919_v54  ;;  %v795_v54 = vpop.f32.mrf.mxu3 }
0x11f6   :  { %v796_v55 = vadd.f32 %v2153_v59, %v795_v54 }
0x11f7   :  { %1607 = vtanh.f32 %v929_v56  ;;  %942 = vrot.lane.b32.xlu1 %v929_v56, %s1890_s28 }
0x11fd   :  { %v1608_v57 = vpop.eup %1607 }
0x11fe   :  { %932 = vrot.lane.b32.xlu2 %v1608_v57, %s1880_s16 }
0x1258   :  { %v933_v58 = vpop.permute.xlu2 %932 }
0x1259   :  { %v935_v60 = vmul.f32 %v933_v58, %v913_v43 }
0x125b   :  { %937 = vrot.lane.b32.xlu0 %v935_v60, %s1889_s3 }
0x1269   :  { %v943_v61 = vpop.permute.xlu1 %942 }
0x126a   :  { %945 = vst.msk [vmem:[#allocation3 + $0x8] sm:$0xff] %vm140_vm0, %v943_v61 }
0x1271   :  { %v948_v62 = vld [vmem:[#allocation3 + $0x8] sm:$0xff] }
0x1272   :  { %974 = vrot.lane.b32.xlu0 %v948_v62, %s1889_s3 }
0x12cd   :  { %v938_v63 = vpop.permute.xlu0 %937 }
0x12ce   :  { %940 = vst.msk [vmem:[#allocation2 + $0x8] sm:$0xff] %vm140_vm0, %v938_v63 }
0x12cf   :  { %946 = vst.msk [vmem:[#allocation4 + $0x8] sm:$0xff] %vm140_vm0, %v938_v63 }
0x12d5   :  { %v947_v0 = vld [vmem:[#allocation2 + $0x8] sm:$0xff] }
0x12d6   :  { %v950_v3 = vpack.c.bf16 %v947_v0, %v947_v0 }
0x12d8   :  { %1503 = vmatmul.msk.bf16.vlgmr.msrb.gmra.mxu0 %vm140_vm0, %v950_v3 }
0x12e4   :  { %v975_v17 = vpop.permute.xlu0 %974 }
0x1355   :  { %v963_v4 = vpop.f32.mrf.mxu0 }
0x1356   :  { %v967_v5 = vadd.f32 %v963_v4, %v791_v38 }
0x1358   :  { %1609 = vtanh.f32 %v967_v5  ;;  %v968_v8 = vmul.f32 0.5, %v967_v5 }
0x135a   :  { %1611 = vtanh.f32 %v968_v8 }
0x135d   :  { %v965_v6 = vpop.f32.mrf.mxu0 }
0x135e   :  { %v1610_v7 = vpop.eup %1609 }
0x135f   :  { %979 = vrot.lane.b32.xlu2 %v1610_v7, %s1880_s16  ;;  %v227_v7 = vadd.f32 %v2027_v11, %v2072_v1 }
0x1360   :  { %v1612_v12 = vpop.eup %1611 }
0x1361   :  { %v970_v13 = vadd.f32 1.0, %v1612_v12  ;;  %v693_v8 = vadd.f32 %v2180_v40, %v227_v7 }
0x1363   :  { %v971_v14 = vmul.f32 0.5, %v970_v13 }
0x1365   :  { %v977_v18 = vmul.f32 %v975_v17, %v971_v14 }
0x13b9   :  { %v980_v15 = vpop.permute.xlu2 %979 }
0x13ba   :  { %v982_v16 = vmul.f32 %v980_v15, %v971_v14  ;;  %v694_v15 = vmul.f32 0.5, %v693_v8 }
0x13bc   :  { %984 = vrot.lane.b32.xlu1 %v982_v16, %s1889_s3 }
0x142e   :  { %v985_v19 = vpop.permute.xlu1 %984 }
0x142f   :  { %v987_v9 = vadd.f32 %v985_v19, %v977_v18 }
0x1431   :  { %1613 = vtanh.f32 %v987_v9  ;;  %1000 = vrot.lane.b32.xlu1 %v987_v9, %s1890_s28  ;;  %v1533_v9 = vld [vmem:[%s2331_s9 + $0x8] sm:$0xff] }
0x1432   :  { %1345 = vmatpush.bf16.msrb.mxu0 %v1533_v9 }
0x1437   :  { %v1614_v20 = vpop.eup %1613 }
0x1438   :  { %990 = vrot.lane.b32.xlu2 %v1614_v20, %s1880_s16  ;;  %v1532_v20 = vld [vmem:[%s2331_s9] sm:$0xff] }
0x1439   :  { %1346 = vmatpush.bf16.msrb.mxu0 %v1532_v20 }
0x1492   :  { %v991_v21 = vpop.permute.xlu2 %990 }
0x1493   :  { %v993_v22 = vmul.f32 %v991_v21, %v971_v14 }
0x1495   :  { %995 = vrot.lane.b32.xlu0 %v993_v22, %s1889_s3 }
0x14a3   :  { %v1001_v23 = vpop.permute.xlu1 %1000 }
0x14a4   :  { %1003 = vst.msk [vmem:[#allocation3 + $0x8] sm:$0xff] %vm140_vm0, %v1001_v23 }
0x14ab   :  { %v1006_v24 = vld [vmem:[#allocation3 + $0x8] sm:$0xff] }
0x14ac   :  { %1032 = vrot.lane.b32.xlu0 %v1006_v24, %s1889_s3 }
0x1507   :  { %v996_v26 = vpop.permute.xlu0 %995 }
0x1508   :  { %998 = vst.msk [vmem:[#allocation2 + $0x8] sm:$0xff] %vm140_vm0, %v996_v26 }
0x1509   :  { %1004 = vst.msk [vmem:[#allocation4 + $0x10] sm:$0xff] %vm140_vm0, %v996_v26 }
0x150f   :  { %v1005_v27 = vld [vmem:[#allocation2 + $0x8] sm:$0xff] }
0x1510   :  { %v1008_v28 = vpack.c.bf16 %v1005_v27, %v1005_v27 }
0x1512   :  { %1504 = vmatmul.msk.bf16.vlgmr.msrb.gmra.mxu1 %vm140_vm0, %v1008_v28 }
0x151e   :  { %v1033_v10 = vpop.permute.xlu0 %1032 }
0x158f   :  { %v1021_v31 = vpop.f32.mrf.mxu1 }
0x1590   :  { %v1025_v32 = vadd.f32 %v1021_v31, %v793_v30  ;;  %v1296_v30 = vld [vmem:[#allocation4 + $0x8] sm:$0xff]  ;;  %v1295_v31 = vld [vmem:[#allocation4] sm:$0xff] }
0x1592   :  { %1615 = vtanh.f32 %v1025_v32  ;;  %v1026_v35 = vmul.f32 0.5, %v1025_v32 }
0x1594   :  { %1617 = vtanh.f32 %v1026_v35  ;;  %v1297_v35 = vld [vmem:[#allocation4 + $0x10] sm:$0xff] }
0x1597   :  { %v1023_v33 = vpop.f32.mrf.mxu1 }
0x1598   :  { %v1616_v34 = vpop.eup %1615  ;;  %v1303_v33 = vpack.c.bf16 %v1296_v30, %v1295_v31 }
0x1599   :  { %1037 = vrot.lane.b32.xlu2 %v1616_v34, %s1880_s16 }
0x159a   :  { %v1618_v39 = vpop.eup %1617 }
0x159b   :  { %v1028_v36 = vadd.f32 1.0, %v1618_v39 }
0x159d   :  { %v1029_v37 = vmul.f32 0.5, %v1028_v36  ;;  %v797_v36 = vpop.f32.mrf.mxu3 }
0x159f   :  { %v1035_v45 = vmul.f32 %v1033_v10, %v1029_v37 }
0x15f3   :  { %v1038_v41 = vpop.permute.xlu2 %1037 }
0x15f4   :  { %v1040_v42 = vmul.f32 %v1038_v41, %v1029_v37 }
0x15f6   :  { %1042 = vrot.lane.b32.xlu1 %v1040_v42, %s1889_s3 }
0x1668   :  { %v1043_v46 = vpop.permute.xlu1 %1042 }
0x1669   :  { %v1045_v47 = vadd.f32 %v1043_v46, %v1035_v45  ;;  %v2251_v46 = vld [vmem:[%s2332_s10] ss:$0 sm:$0xff]  ;;  %s1891_s10 = smov [#allocation18]  }
0x166b   :  { %1619 = vtanh.f32 %v1045_v47  ;;  %1058 = vrot.lane.b32.xlu1 %v1045_v47, %s1890_s28 }
0x1671   :  { %v1620_v48 = vpop.eup %1619 }
0x1672   :  { %1048 = vrot.lane.b32.xlu2 %v1620_v48, %s1880_s16 }
0x16cc   :  { %v1049_v49 = vpop.permute.xlu2 %1048 }
0x16cd   :  { %v1051_v50 = vmul.f32 %v1049_v49, %v1029_v37  ;;  %v798_v37 = vadd.f32 %v2153_v59, %v797_v36 }
0x16cf   :  { %1053 = vrot.lane.b32.xlu0 %v1051_v50, %s1889_s3 }
0x16dd   :  { %v1059_v51 = vpop.permute.xlu1 %1058 }
0x16de   :  { %1061 = vst.msk [vmem:[#allocation3 + $0x8] sm:$0xff] %vm140_vm0, %v1059_v51 }
0x16e5   :  { %v1064_v43 = vld [vmem:[#allocation3 + $0x8] sm:$0xff] }
0x16e6   :  { %1090 = vrot.lane.b32.xlu0 %v1064_v43, %s1889_s3 }
0x1741   :  { %v1054_v52 = vpop.permute.xlu0 %1053 }
0x1742   :  { %1056 = vst.msk [vmem:[#allocation2 + $0x8] sm:$0xff] %vm140_vm0, %v1054_v52 }
0x1743   :  { %1062 = vst.msk [vmem:[#allocation4 + $0x18] sm:$0xff] %vm140_vm0, %v1054_v52 }
0x1749   :  { %v1063_v44 = vld [vmem:[#allocation2 + $0x8] sm:$0xff] }
0x174a   :  { %v1066_v53 = vpack.c.bf16 %v1063_v44, %v1063_v44  ;;  %v1298_v34 = vld [vmem:[#allocation4 + $0x18] sm:$0xff] }
0x174b   :  { %v1304_v39 = vpack.c.bf16 %v1298_v34, %v1297_v35 }
0x174c   :  { %1505 = vmatmul.msk.bf16.vlgmr.msrb.gmra.mxu2 %vm140_vm0, %v1066_v53 }
0x1758   :  { %v1091_v38 = vpop.permute.xlu0 %1090 }
0x17cf   :  { %v1079_v56 = vpop.f32.mrf.mxu2 }
0x17d0   :  { %v1083_v57 = vadd.f32 %v1079_v56, %v796_v55 }
0x17d2   :  { %1621 = vtanh.f32 %v1083_v57  ;;  %v1084_v61 = vmul.f32 0.5, %v1083_v57 }
0x17d4   :  { %1623 = vtanh.f32 %v1084_v61 }
0x17d7   :  { %v1081_v58 = vpop.f32.mrf.mxu2 }
0x17d8   :  { %v1622_v60 = vpop.eup %1621 }
0x17d9   :  { %1095 = vrot.lane.b32.xlu2 %v1622_v60, %s1880_s16 }
0x17da   :  { %v1624_v62 = vpop.eup %1623 }
0x17db   :  { %v1086_v63 = vadd.f32 1.0, %v1624_v62 }
0x17dd   :  { %v1087_v0 = vmul.f32 0.5, %v1086_v63 }
0x17df   :  { %v1093_v4 = vmul.f32 %v1091_v38, %v1087_v0 }
0x1833   :  { %v1096_v3 = vpop.permute.xlu2 %1095 }
0x1834   :  { %v1098_v2 = vmul.f32 %v1096_v3, %v1087_v0 }
0x1836   :  { %1100 = vrot.lane.b32.xlu1 %v1098_v2, %s1889_s3 }
0x183e   :  { %666 = vrot.lane.b32.xlu1 %v2160_v25, %s1890_s28 }
0x18a8   :  { %v1101_v5 = vpop.permute.xlu1 %1100 }
0x18a9   :  { %v1103_v6 = vadd.f32 %v1101_v5, %v1093_v4 }
0x18ab   :  { %1625 = vtanh.f32 %v1103_v6 }
0x18ac   :  { %1627 = vtanh.f32 %v693_v8 }
0x18ad   :  { %1629 = vtanh.f32 %v694_v15 }
0x18b0   :  { %v667_v12 = vpop.permute.xlu1 %666 }
0x18b1   :  { %v1626_v13 = vpop.eup %1625  ;;  %669 = vst.msk [vmem:[#allocation3] sm:$0xff] %vm140_vm0, %v667_v12 }
0x18b2   :  { %1106 = vrot.lane.b32.xlu2 %v1626_v13, %s1880_s16  ;;  %v1628_v14 = vpop.eup %1627 }
0x18b3   :  { %v1630_v11 = vpop.eup %1629 }
0x18b4   :  { %v696_v1 = vadd.f32 1.0, %v1630_v11 }
0x18b6   :  { %v697_v18 = vmul.f32 0.5, %v696_v1 }
0x18b8   :  { %v673_v25 = vld [vmem:[#allocation3] sm:$0xff] }
0x18ba   :  { %705 = vrot.lane.b32.xlu2 %v1628_v14, %s1880_s16 }
0x18c2   :  { %700 = vrot.lane.b32.xlu2 %v673_v25, %s1889_s3 }
0x190c   :  { %v1107_v16 = vpop.permute.xlu2 %1106 }
0x190d   :  { %v1109_v17 = vmul.f32 %v1107_v16, %v1087_v0 }
0x190f   :  { %1111 = vrot.lane.b32.xlu0 %v1109_v17, %s1889_s3 }
0x1914   :  { %v706_v40 = vpop.permute.xlu2 %705 }
0x1915   :  { %v708_v19 = vmul.f32 %v706_v40, %v697_v18 }
0x1917   :  { %1116 = vrot.lane.b32.xlu0 %v1103_v6, %s1890_s28  ;;  %v738_v6 = vld [vmem:[#allocation4 + $0x30] sm:$0xff] }
0x191c   :  { %v701_v26 = vpop.permute.xlu2 %700 }
0x191d   :  { %v703_v27 = vmul.f32 %v701_v26, %v697_v18 }
0x191f   :  { %710 = vrot.lane.b32.xlu0 %v708_v19, %s1889_s3 }
0x1981   :  { %v1112_v21 = vpop.permute.xlu0 %1111 }
0x1982   :  { %1114 = vst.msk [vmem:[#allocation2 + $0x8] sm:$0xff] %vm140_vm0, %v1112_v21 }
0x1983   :  { %1120 = vst.msk [vmem:[#allocation4 + $0x20] sm:$0xff] %vm140_vm0, %v1112_v21 }
0x1989   :  { %v1117_v22 = vpop.permute.xlu0 %1116  ;;  %v1121_v23 = vld [vmem:[#allocation2 + $0x8] sm:$0xff] }
0x198a   :  { %1119 = vst.msk [vmem:[#allocation3 + $0x8] sm:$0xff] %vm140_vm0, %v1117_v22  ;;  %v1124_v24 = vpack.c.bf16 %v1121_v23, %v1121_v23  ;;  %v1299_v11 = vld [vmem:[#allocation4 + $0x20] sm:$0xff] }
0x198c   :  { %1506 = vmatmul.msk.bf16.vlgmr.msra.gmra.mxu0 %vm140_vm0, %v1124_v24 }
0x1991   :  { %v711_v28 = vpop.permute.xlu0 %710  ;;  %v1122_v49 = vld [vmem:[#allocation3 + $0x8] sm:$0xff] }
0x1992   :  { %v2240_v29 = vadd.f32 %v711_v28, %v703_v27 }
0x1994   :  { %1631 = vtanh.f32 %v2240_v29 }
0x199a   :  { %v1632_v32 = vpop.eup %1631 }
0x199b   :  { %716 = vrot.lane.b32.xlu0 %v1632_v32, %s1880_s16 }
0x199c   :  { %1517 = vmatmul.msk.bf16.vlgmr.msrb.gmra.mxu0 %vm140_vm0, %v1303_v33 }
0x19ac   :  { %1518 = vmatmul.msk.bf16.gmra.mxu0 %vm140_vm0, %v1304_v39 }
0x1a09   :  { %v1137_v41 = vpop.f32.mrf.mxu0 }
0x1a0a   :  { %v1141_v42 = vadd.f32 %v1137_v41, %v798_v37 }
0x1a0c   :  { %1633 = vtanh.f32 %v1141_v42  ;;  %v1142_v54 = vmul.f32 0.5, %v1141_v42 }
0x1a0d   :  { %v717_v61 = vpop.permute.xlu0 %716 }
0x1a0e   :  { %1635 = vtanh.f32 %v1142_v54  ;;  %v719_v62 = vmul.f32 %v717_v61, %v697_v18 }
0x1a11   :  { %v1139_v10 = vpop.f32.mrf.mxu0 }
0x1a12   :  { %v1634_v45 = vpop.eup %1633 }
0x1a13   :  { %1153 = vrot.lane.b32.xlu1 %v1634_v45, %s1880_s16 }
0x1a14   :  { %v1636_v55 = vpop.eup %1635 }
0x1a15   :  { %v1144_v56 = vadd.f32 1.0, %v1636_v55 }
0x1a17   :  { %v1145_v57 = vmul.f32 0.5, %v1144_v56 }
0x1a19   :  { %v1348_v47 = vpop.f32.mrf.mxu0 }
0x1a1a   :  { %v1349_v48 = vadd.f32 %v2251_v46, %v1348_v47 }
0x1a1b   :  { %1148 = vrot.lane.b32.xlu1 %v1122_v49, %s1889_s3 }
0x1a1c   :  { %1368 = vst [vmem:[#allocation17] sm:$0xff] %v1349_v48 }
0x1a21   :  { %v1350_v50 = vpop.f32.mrf.mxu0 }
0x1a22   :  { %v1351_v51 = vadd.f32 %v2251_v46, %v1350_v50 }
0x1a24   :  { %1369 = vst [vmem:[#allocation17 + $0x8] sm:$0xff] %v1351_v51 }
0x1a29   :  { %v1353_v43 = vpop.f32.mrf.mxu0 }
0x1a2a   :  { %v1354_v52 = vadd.f32 %v2251_v46, %v1353_v43 }
0x1a2c   :  { %1370 = vst [vmem:[#allocation17 + $0x10] sm:$0xff] %v1354_v52 }
0x1a31   :  { %v1355_v44 = vpop.f32.mrf.mxu0 }
0x1a32   :  { %v1356_v53 = vadd.f32 %v2251_v46, %v1355_v44 }
0x1a34   :  { %1371 = vst [vmem:[#allocation17 + $0x18] sm:$0xff] %v1356_v53 }
0x1a85   :  { %v1154_v58 = vpop.permute.xlu1 %1153 }
0x1a86   :  { %v1156_v60 = vmul.f32 %v1154_v58, %v1145_v57 }
0x1a88   :  { %1158 = vrot.lane.b32.xlu2 %v1156_v60, %s1889_s3 }
0x1a8d   :  { %v1149_v63 = vpop.permute.xlu1 %1148 }
0x1a8e   :  { %v1151_v0 = vmul.f32 %v1149_v63, %v1145_v57 }
0x1a90   :  { %721 = vrot.lane.b32.xlu2 %v719_v62, %s1889_s3 }
0x1ae2   :  { %v1159_v3 = vpop.permute.xlu2 %1158 }
0x1ae3   :  { %v1161_v2 = vadd.f32 %v1159_v3, %v1151_v0 }
0x1ae5   :  { %1637 = vtanh.f32 %v1161_v2 }
0x1aea   :  { %v722_v38 = vpop.permute.xlu2 %721 }
0x1aeb   :  { %v1638_v4 = vpop.eup %1637  ;;  %724 = vst.msk [vmem:[#allocation2] sm:$0xff] %vm140_vm0, %v722_v38 }
0x1aec   :  { %731 = vst.msk [vmem:[#allocation4 + $0x38] sm:$0xff] %vm140_vm0, %v722_v38  ;;  %1164 = vrot.lane.b32.xlu1 %v1638_v4, %s1880_s16 }
0x1af2   :  { %v1376_v5 = vld [vmem:[#allocation2] sm:$0xff] }
0x1af3   :  { %v739_v7 = vld [vmem:[#allocation4 + $0x38] sm:$0xff]  ;;  %1378 = vst.msk [vmem:[#allocation18] sm:$0xff] %vm140_vm0, %v1376_v5 }
0x1af4   :  { %1174 = vrot.lane.b32.xlu1 %v1161_v2, %s1890_s28  ;;  %v743_v8 = vpack.c.bf16 %v739_v7, %v738_v6 }
0x1af6   :  { %1492 = vmatmul.msk.bf16.gmra.mxu3 %vm140_vm0, %v743_v8 }
0x1b5e   :  { %v1165_v12 = vpop.permute.xlu1 %1164 }
0x1b5f   :  { %v1167_v13 = vmul.f32 %v1165_v12, %v1145_v57 }
0x1b61   :  { %1169 = vrot.lane.b32.xlu0 %v1167_v13, %s1889_s3 }
0x1b66   :  { %v1175_v14 = vpop.permute.xlu1 %1174 }
0x1b67   :  { %1177 = vst.msk [vmem:[#allocation3 + $0x8] sm:$0xff] %vm140_vm0, %v1175_v14 }
0x1b6e   :  { %v1180_v25 = vld [vmem:[#allocation3 + $0x8] sm:$0xff] }
0x1b6f   :  { %1206 = vrot.lane.b32.xlu0 %v1180_v25, %s1889_s3 }
0x1b79   :  { %v800_v18 = vpop.f32.mrf.mxu3 }
0x1b7a   :  { %v801_v19 = vadd.f32 %v2153_v59, %v800_v18 }
0x1b81   :  { %v802_v51 = vpop.f32.mrf.mxu3 }
0x1b82   :  { %v803_v43 = vadd.f32 %v2153_v59, %v802_v51 }
0x1bd3   :  { %v1170_v15 = vpop.permute.xlu0 %1169 }
0x1bd4   :  { %1172 = vst.msk [vmem:[#allocation2 + $0x8] sm:$0xff] %vm140_vm0, %v1170_v15 }
0x1bd5   :  { %1178 = vst.msk [vmem:[#allocation4 + $0x28] sm:$0xff] %vm140_vm0, %v1170_v15 }
0x1bdb   :  { %v1179_v16 = vld [vmem:[#allocation2 + $0x8] sm:$0xff] }
0x1bdc   :  { %v1182_v17 = vpack.c.bf16 %v1179_v16, %v1179_v16  ;;  %v1300_v1 = vld [vmem:[#allocation4 + $0x28] sm:$0xff] }
0x1bdd   :  { %v1305_v40 = vpack.c.bf16 %v1300_v1, %v1299_v11 }
0x1bde   :  { %1507 = vmatmul.msk.bf16.vlgmr.msra.gmra.mxu1 %vm140_vm0, %v1182_v17 }
0x1bdf   :  { %1519 = vmatmul.msk.bf16.gmra.mxu0 %vm140_vm0, %v1305_v40 }
0x1be1   :  { %v1207_v35 = vpop.permute.xlu0 %1206 }
0x1c5b   :  { %v1195_v9 = vpop.f32.mrf.mxu1 }
0x1c5c   :  { %v1199_v20 = vadd.f32 %v1195_v9, %v801_v19  ;;  %v1358_v21 = vpop.f32.mrf.mxu0 }
0x1c5d   :  { %v1359_v22 = vadd.f32 %v2251_v46, %v1358_v21 }
0x1c5e   :  { %1639 = vtanh.f32 %v1199_v20  ;;  %v1200_v28 = vmul.f32 0.5, %v1199_v20 }
0x1c5f   :  { %1372 = vst [vmem:[#allocation17 + $0x20] sm:$0xff] %v1359_v22 }
0x1c60   :  { %1641 = vtanh.f32 %v1200_v28 }
0x1c63   :  { %v1197_v23 = vpop.f32.mrf.mxu1 }
0x1c64   :  { %v1640_v24 = vpop.eup %1639  ;;  %v1360_v26 = vpop.f32.mrf.mxu0 }
0x1c65   :  { %v1361_v27 = vadd.f32 %v2251_v46, %v1360_v26  ;;  %1211 = vrot.lane.b32.xlu2 %v1640_v24, %s1880_s16 }
0x1c66   :  { %v1642_v30 = vpop.eup %1641 }
0x1c67   :  { %1373 = vst [vmem:[#allocation17 + $0x28] sm:$0xff] %v1361_v27  ;;  %v1202_v31 = vadd.f32 1.0, %v1642_v30 }
0x1c69   :  { %v1203_v32 = vmul.f32 0.5, %v1202_v31 }
0x1c6b   :  { %v1209_v39 = vmul.f32 %v1207_v35, %v1203_v32 }
0x1cbf   :  { %v1212_v33 = vpop.permute.xlu2 %1211 }
0x1cc0   :  { %v1214_v34 = vmul.f32 %v1212_v33, %v1203_v32 }
0x1cc2   :  { %1216 = vrot.lane.b32.xlu1 %v1214_v34, %s1889_s3 }
0x1d34   :  { %v1217_v36 = vpop.permute.xlu1 %1216 }
0x1d35   :  { %v1219_v37 = vadd.f32 %v1217_v36, %v1209_v39 }
0x1d37   :  { %1643 = vtanh.f32 %v1219_v37  ;;  %1232 = vrot.lane.b32.xlu1 %v1219_v37, %s1890_s28 }
0x1d3d   :  { %v1644_v41 = vpop.eup %1643 }
0x1d3e   :  { %1222 = vrot.lane.b32.xlu2 %v1644_v41, %s1880_s16 }
0x1d98   :  { %v1223_v42 = vpop.permute.xlu2 %1222 }
0x1d99   :  { %v1225_v10 = vmul.f32 %v1223_v42, %v1203_v32 }
0x1d9b   :  { %1227 = vrot.lane.b32.xlu0 %v1225_v10, %s1889_s3 }
0x1da9   :  { %v1233_v45 = vpop.permute.xlu1 %1232 }
0x1daa   :  { %1235 = vst.msk [vmem:[#allocation3 + $0x8] sm:$0xff] %vm140_vm0, %v1233_v45 }
0x1db1   :  { %v1238_v47 = vld [vmem:[#allocation3 + $0x8] sm:$0xff] }
0x1db2   :  { %1264 = vrot.lane.b32.xlu0 %v1238_v47, %s1889_s3 }
0x1e0d   :  { %v1228_v48 = vpop.permute.xlu0 %1227 }
0x1e0e   :  { %1230 = vst.msk [vmem:[#allocation2 + $0x8] sm:$0xff] %vm140_vm0, %v1228_v48 }
0x1e0f   :  { %1236 = vst.msk [vmem:[#allocation4 + $0x30] sm:$0xff] %vm140_vm0, %v1228_v48 }
0x1e15   :  { %v1237_v49 = vld [vmem:[#allocation2 + $0x8] sm:$0xff] }
0x1e16   :  { %v1240_v50 = vpack.c.bf16 %v1237_v49, %v1237_v49  ;;  %v1301_v12 = vld [vmem:[#allocation4 + $0x30] sm:$0xff] }
0x1e18   :  { %1508 = vmatmul.msk.bf16.vlgmr.msra.gmra.mxu2 %vm140_vm0, %v1240_v50 }
0x1e24   :  { %v1265_v59 = vpop.permute.xlu0 %1264 }
0x1e9b   :  { %v1253_v52 = vpop.f32.mrf.mxu2 }
0x1e9c   :  { %v1257_v44 = vadd.f32 %v1253_v52, %v803_v43 }
0x1e9e   :  { %1645 = vtanh.f32 %v1257_v44  ;;  %v1258_v55 = vmul.f32 0.5, %v1257_v44 }
0x1ea0   :  { %1647 = vtanh.f32 %v1258_v55 }
0x1ea3   :  { %v1255_v53 = vpop.f32.mrf.mxu2 }
0x1ea4   :  { %v1646_v54 = vpop.eup %1645 }
0x1ea5   :  { %1269 = vrot.lane.b32.xlu2 %v1646_v54, %s1880_s16 }
0x1ea6   :  { %v1648_v56 = vpop.eup %1647 }
0x1ea7   :  { %v1260_v57 = vadd.f32 1.0, %v1648_v56 }
0x1ea9   :  { %v1261_v58 = vmul.f32 0.5, %v1260_v57 }
0x1eab   :  { %v1267_v62 = vmul.f32 %v1265_v59, %v1261_v58 }
0x1eff   :  { %v1270_v60 = vpop.permute.xlu2 %1269 }
0x1f00   :  { %v1272_v61 = vmul.f32 %v1270_v60, %v1261_v58 }
0x1f02   :  { %1274 = vrot.lane.b32.xlu1 %v1272_v61, %s1889_s3 }
0x1f0a   :  { %726 = vrot.lane.b32.xlu1 %v2240_v29, %s1890_s28 }
0x1f74   :  { %v1275_v63 = vpop.permute.xlu1 %1274 }
0x1f75   :  { %v1277_v0 = vadd.f32 %v1275_v63, %v1267_v62 }
0x1f77   :  { %1649 = vtanh.f32 %v1277_v0 }
0x1f7c   :  { %v727_v3 = vpop.permute.xlu1 %726 }
0x1f7d   :  { %v1650_v2 = vpop.eup %1649  ;;  %729 = vst.msk [vmem:[#allocation3] sm:$0xff] %vm140_vm0, %v727_v3 }
0x1f7e   :  { %1280 = vrot.lane.b32.xlu2 %v1650_v2, %s1880_s16  ;;  %s1401_s16 = sshll.u32 %s1891_s10, 4  ;;  %s1402_s16 = int_to_ptr.vmem [resolvable:$true] %s1401_s16 }
0x1f84   :  { %v1380_v38 = vld [vmem:[#allocation3] sm:$0xff] }
0x1f85   :  { %1382 = vst.msk [vmem:[#allocation20] sm:$0xff] %vm140_vm0, %v1380_v38 }
0x1f86   :  { %1290 = vrot.lane.b32.xlu2 %v1277_v0, %s1890_s28  ;;  %s1390_s28 = sshll.u32 %s2333_s11, 4  ;;  %s1391_s28 = int_to_ptr.hbm [resolvable:$true] %s1390_s28 }
0x1fd8   :  { %v1281_v4 = vpop.permute.xlu2 %1280 }
0x1fd9   :  { %v1283_v5 = vmul.f32 %v1281_v4, %v1261_v58 }
0x1fdb   :  { %1285 = vrot.lane.b32.xlu0 %v1283_v5, %s1889_s3  ;;  %s1388_s3 = sshll.u32 %s1893_s12, 4  ;;  %s1389_s3 = int_to_ptr.vmem [resolvable:$true] %s1388_s3 }
0x1fe0   :  { %v1291_v29 = vpop.permute.xlu2 %1290 }
0x1fe1   :  { %1293 = vst.msk [vmem:[#allocation3 + $0x8] sm:$0xff] %vm140_vm0, %v1291_v29 }
0x1fe8   :  { %v1381_v6 = vld [vmem:[#allocation3 + $0x8] sm:$0xff] }
0x1fe9   :  { %1383 = vst.msk [vmem:[#allocation20 + $0x8] sm:$0xff] %vm140_vm0, %v1381_v6 }
0x204d   :  { %v1286_v7 = vpop.permute.xlu0 %1285 }
0x204e   :  { %1288 = vst.msk [vmem:[#allocation2 + $0x8] sm:$0xff] %vm140_vm0, %v1286_v7 }
0x204f   :  { %1294 = vst.msk [vmem:[#allocation4 + $0x38] sm:$0xff] %vm140_vm0, %v1286_v7 }
0x2055   :  { %v1377_v8 = vld [vmem:[#allocation2 + $0x8] sm:$0xff] }
0x2056   :  { %v1302_v13 = vld [vmem:[#allocation4 + $0x38] sm:$0xff]  ;;  %1379 = vst.msk [vmem:[#allocation18 + $0x8] sm:$0xff] %vm140_vm0, %v1377_v8 }
0x2057   :  { %v1306_v14 = vpack.c.bf16 %v1302_v13, %v1301_v12  ;;  %1409 = dma.vmem_to_hbm [thread:$0]  %s1402_s16, 256, %s1404_s4, [#allocation19], %s1886_s19, %s1886_s19, %s1887_s20  }
0x2058   :  { %1422 = dma.vmem_to_hbm [thread:$0]  %s1415_s23, 256, %s1417_s25, [#allocation19], %s1886_s19, %s1886_s19, %s1887_s20  }
0x2059   :  { %1520 = vmatmul.msk.bf16.gmra.mxu0 %vm140_vm0, %v1306_v14 }
0x20d6   :  { %v1363_v25 = vpop.f32.mrf.mxu0 }
0x20d7   :  { %v1364_v15 = vadd.f32 %v2251_v46, %v1363_v25 }
0x20d9   :  { %1374 = vst [vmem:[#allocation17 + $0x30] sm:$0xff] %v1364_v15 }
0x20de   :  { %v1365_v16 = vpop.f32.mrf.mxu0 }
0x20df   :  { %v1366_v17 = vadd.f32 %v2251_v46, %v1365_v16 }
0x20e1   :  { %1375 = vst [vmem:[#allocation17 + $0x38] sm:$0xff] %v1366_v17 }
0x20e2   :  { %1396 = dma.vmem_to_hbm [thread:$0]  %s1389_s3, 1024, %s1391_s28, [#allocation8], %s1886_s19, %s1886_s19, %s1887_s20  }
0x20e3   :  { %1875 = dma.done.wait [#allocation8], 1024  }
0x20e4   :  { %1876 = vsyncadd [#allocation8], 4294966272 }
0x20e5   :  { %1877 = dma.done.wait [#allocation19], 512  }
0x20e6   :  { %1878 = vsyncadd [#allocation19], 4294966784 }
0x20e7   :  { %1435 = vsyncpa [#allocation7], 1 }
0x20e8   :  { %1436 = vsyncpa [#allocation10], 1 }
0x20e9   :  { %1437 = vsyncpa [#allocation13], 1 }
0x20ea   :  { %1438 = vsyncpa [#allocation16], 1 }
0x20eb   :  { %1439 = vsyncpa [#allocation8], 1 }
0x20ec   :  { %1440 = vsyncpa [#allocation19], 1 }

</bundles_post_ra>
